<compile_context>
chip_gen: v7x
topology: tpu7x:2x2x1
jax: 0.10.0
libtpu: 0.0.40
codegen_flags: <defaults>
</compile_context>

<pallas_src>
import functools
import math

import jax
import jax.numpy as jnp
from jax.experimental import pallas as pl
from jax.experimental.pallas import tpu as pltpu

_LN_EPS = 1e-5                       # PyTorch layer_norm_eps default
_VMEM_LIMIT = 32 * 1024 * 1024       # explicit scoped-VMEM budget (safe on v5e/v6e/v7x)


# --------------------------------------------------------------------------- #
# Kernel 1: fused self-attention block (QKV -> MHA -> out-proj -> +res -> LN1)
# --------------------------------------------------------------------------- #
def _attn_block_kernel(x_ref, wqkv_ref, bqkv_ref, wo_ref, bo_ref, g_ref, b_ref,
                       o_ref, *, nh, eps):
    Bt, S, H = x_ref.shape
    dh = H // nh
    scale = 1.0 / math.sqrt(dh)

    x2 = x_ref[...].reshape(Bt * S, H)                       # f32 residual copy
    xb = x2.astype(jnp.bfloat16)

    # Packed QKV projection: one MXU matmul, f32 accumulation.
    qkv = jnp.dot(xb, wqkv_ref[...],
                  preferred_element_type=jnp.float32) + bqkv_ref[...]   # (Bt*S, 3H)

    # Per-head attention; out-projection accumulated per head so no concat.
    acc = jnp.zeros((Bt * S, H), jnp.float32)
    for h in range(nh):
        q_h = (qkv[:, h * dh:(h + 1) * dh] * scale).astype(jnp.bfloat16)
        k_h = qkv[:, H + h * dh:H + (h + 1) * dh].astype(jnp.bfloat16)
        v_h = qkv[:, 2 * H + h * dh:2 * H + (h + 1) * dh].astype(jnp.bfloat16)
        q_h = q_h.reshape(Bt, S, dh)
        k_h = k_h.reshape(Bt, S, dh)
        v_h = v_h.reshape(Bt, S, dh)

        # scores via dot_general (no explicit k.T transpose), f32 accumulate.
        s = jnp.einsum("bqd,bkd->bqk", q_h, k_h,
                       preferred_element_type=jnp.float32)              # (Bt,S,S)
        m = jnp.max(s, axis=-1, keepdims=True)
        p = jnp.exp(s - m)
        p = p * pl.reciprocal(jnp.sum(p, axis=-1, keepdims=True), approx=True)
        o_h = jnp.einsum("bqk,bkd->bqd", p.astype(jnp.bfloat16), v_h,
                         preferred_element_type=jnp.float32)            # (Bt,S,dh)
        o_h = o_h.reshape(Bt * S, dh).astype(jnp.bfloat16)
        acc = acc + jnp.dot(o_h, wo_ref[h],                             # (dh, H)
                            preferred_element_type=jnp.float32)

    # out-proj bias + residual + LayerNorm1, fused epilogue in f32.
    y = x2 + acc + bo_ref[...]
    mu = jnp.mean(y, axis=-1, keepdims=True)
    var = jnp.mean((y - mu) * (y - mu), axis=-1, keepdims=True)
    out = (y - mu) * jax.lax.rsqrt(var + eps) * g_ref[...] + b_ref[...]
    o_ref[...] = out.reshape(Bt, S, H)


# --------------------------------------------------------------------------- #
# Kernel 2: fused feed-forward block (relu(x@W1+b1)@W2+b2 -> +res -> LN2)
# --------------------------------------------------------------------------- #
def _ffn_block_kernel(x_ref, w1_ref, b1_ref, w2_ref, b2_ref, g_ref, b_ref,
                      o_ref, acc_ref, *, eps):
    f = pl.program_id(1)
    Bt, S, H = x_ref.shape

    @pl.when(f == 0)
    def _():
        acc_ref[...] = jnp.zeros_like(acc_ref)

    x2 = x_ref[...].reshape(Bt * S, H)
    xb = x2.astype(jnp.bfloat16)
    h1 = jnp.dot(xb, w1_ref[...], preferred_element_type=jnp.float32) + b1_ref[...]
    h1 = jnp.maximum(h1, 0.0).astype(jnp.bfloat16)                      # (Bt*S, tf)
    acc_ref[...] += jnp.dot(h1, w2_ref[...], preferred_element_type=jnp.float32)

    @pl.when(f == pl.num_programs(1) - 1)
    def _():
        y = x2 + acc_ref[...] + b2_ref[...]
        mu = jnp.mean(y, axis=-1, keepdims=True)
        var = jnp.mean((y - mu) * (y - mu), axis=-1, keepdims=True)
        out = (y - mu) * jax.lax.rsqrt(var + eps) * g_ref[...] + b_ref[...]
        o_ref[...] = out.reshape(Bt, S, H)


# --------------------------------------------------------------------------- #
# Wrappers
# --------------------------------------------------------------------------- #
def _largest_divisor_leq(n, cap):
    cap = max(1, min(n, cap))
    for d in range(cap, 0, -1):
        if n % d == 0:
            return d
    return 1


def attn_block(x, wqkv, bqkv, wo_heads, bo, gamma, beta, *, nh, eps=_LN_EPS,
               target_rows=256):
    B, S, H = x.shape
    dh = H // nh
    bt = _largest_divisor_leq(B, max(1, target_rows // S))
    grid = (B // bt,)

    flops = 2 * B * S * H * (3 * H) + 4 * B * nh * S * S * dh + 2 * B * S * H * H
    bytes_acc = 2 * (4 * B * S * H) + 2 * (3 * H * H + H * H) + 4 * 6 * H
    cost = pl.CostEstimate(flops=int(flops),
                           transcendentals=int(B * nh * S * S),
                           bytes_accessed=int(bytes_acc))

    kern = functools.partial(_attn_block_kernel, nh=nh, eps=eps)
    return pl.pallas_call(
        kern,
        grid=grid,
        in_specs=[
            pl.BlockSpec((bt, S, H), lambda i: (i, 0, 0)),
            pl.BlockSpec((H, 3 * H), lambda i: (0, 0)),
            pl.BlockSpec((1, 3 * H), lambda i: (0, 0)),
            pl.BlockSpec((nh, dh, H), lambda i: (0, 0, 0)),
            pl.BlockSpec((1, H), lambda i: (0, 0)),
            pl.BlockSpec((1, H), lambda i: (0, 0)),
            pl.BlockSpec((1, H), lambda i: (0, 0)),
        ],
        out_specs=pl.BlockSpec((bt, S, H), lambda i: (i, 0, 0)),
        out_shape=jax.ShapeDtypeStruct((B, S, H), jnp.float32),
        compiler_params=pltpu.CompilerParams(
            dimension_semantics=("parallel",),
            vmem_limit_bytes=_VMEM_LIMIT),
        cost_estimate=cost,
    )(x, wqkv, bqkv, wo_heads, bo, gamma, beta)


def ffn_block(x, w1, b1, w2, b2, gamma, beta, *, eps=_LN_EPS, target_rows=256):
    B, S, H = x.shape
    FF = w1.shape[1]
    bt = _largest_divisor_leq(B, max(1, target_rows // S))
    tf = FF
    for c in (512, 256, 128):
        if FF % c == 0:
            tf = c
            break
    grid = (B // bt, FF // tf)

    flops = 4 * B * S * H * FF
    bytes_acc = 2 * (4 * B * S * H) + 2 * (2 * H * FF) + 4 * (FF + 3 * H)
    cost = pl.CostEstimate(flops=int(flops), transcendentals=0,
                           bytes_accessed=int(bytes_acc))

    kern = functools.partial(_ffn_block_kernel, eps=eps)
    return pl.pallas_call(
        kern,
        grid=grid,
        in_specs=[
            pl.BlockSpec((bt, S, H), lambda i, f: (i, 0, 0)),
            pl.BlockSpec((H, tf), lambda i, f: (0, f)),
            pl.BlockSpec((1, tf), lambda i, f: (0, f)),
            pl.BlockSpec((tf, H), lambda i, f: (f, 0)),
            pl.BlockSpec((1, H), lambda i, f: (0, 0)),
            pl.BlockSpec((1, H), lambda i, f: (0, 0)),
            pl.BlockSpec((1, H), lambda i, f: (0, 0)),
        ],
        out_specs=pl.BlockSpec((bt, S, H), lambda i, f: (i, 0, 0)),
        out_shape=jax.ShapeDtypeStruct((B, S, H), jnp.float32),
        scratch_shapes=[pltpu.VMEM((bt * S, H), jnp.float32)],
        compiler_params=pltpu.CompilerParams(
            dimension_semantics=("parallel", "arbitrary"),
            vmem_limit_bytes=_VMEM_LIMIT),
        cost_estimate=cost,
    )(x, w1, b1, w2, b2, gamma, beta)


# --------------------------------------------------------------------------- #
# Encoder layer / stack (no host-side transposes or reshapes between kernels)
# --------------------------------------------------------------------------- #
def encoder_layer(x, p, nh):
    x = attn_block(x, p["in_proj_w"], p["in_proj_b"], p["out_proj_w"],
                   p["out_proj_b"], p["ln1_g"], p["ln1_b"], nh=nh)
    x = ffn_block(x, p["ff1_w"], p["ff1_b"], p["ff2_w"], p["ff2_b"],
                  p["ln2_g"], p["ln2_b"])
    return x


def general_transformer_nope(x, params, nh):
    for p in params:
        x = encoder_layer(x, p, nh)
    return x


# --------------------------------------------------------------------------- #
# Deterministic parameter construction (matches nn.TransformerEncoderLayer shapes;
# linear weights stored transposed (in, out) and in bf16 for MXU / halved DMA)
# --------------------------------------------------------------------------- #
def make_params(key, hd, nh, nl, dim_feedforward=2048):
    dh = hd // nh

    def xavier(k, fan_in, fan_out, shape):
        a = math.sqrt(6.0 / (fan_in + fan_out))
        return jax.random.uniform(k, shape, jnp.float32, -a, a)

    params = []
    for _ in range(nl):
        key, *ks = jax.random.split(key, 7)
        in_proj_w = xavier(ks[0], hd, 3 * hd, (hd, 3 * hd))     # cols = [Q | K | V]
        out_proj_w = xavier(ks[1], hd, hd, (hd, hd))
        p = {
            "in_proj_w": in_proj_w.astype(jnp.bfloat16),
            "in_proj_b": jnp.zeros((1, 3 * hd), jnp.float32),
            # pre-split per head so the kernel indexes wo_ref[h] directly
            "out_proj_w": out_proj_w.reshape(nh, dh, hd).astype(jnp.bfloat16),
            "out_proj_b": jnp.zeros((1, hd), jnp.float32),
            "ff1_w": xavier(ks[2], hd, dim_feedforward,
                            (hd, dim_feedforward)).astype(jnp.bfloat16),
            "ff1_b": 0.01 * jax.random.normal(ks[3], (1, dim_feedforward),
                                              jnp.float32),
            "ff2_w": xavier(ks[4], dim_feedforward, hd,
                            (dim_feedforward, hd)).astype(jnp.bfloat16),
            "ff2_b": 0.01 * jax.random.normal(ks[5], (1, hd), jnp.float32),
            "ln1_g": jnp.ones((1, hd), jnp.float32),
            "ln1_b": jnp.zeros((1, hd), jnp.float32),
            "ln2_g": jnp.ones((1, hd), jnp.float32),
            "ln2_b": jnp.zeros((1, hd), jnp.float32),
        }
        params.append(p)
    return params


# --------------------------------------------------------------------------- #
if __name__ == "__main__":
    # GeneralTransformerNoPE(msl=8, hd=32, nh=4, nl=2); input (batch=2, seq=8, hd=32)
    msl, hd, nh, nl = 8, 32, 4, 2
    B = 2

    key = jax.random.PRNGKey(0)
    kx, kp = jax.random.split(key)
    x = jax.random.normal(kx, (B, msl, hd), jnp.float32)
    params = make_params(kp, hd, nh, nl)

    fwd = jax.jit(functools.partial(general_transformer_nope, nh=nh))
    out = jax.block_until_ready(fwd(x, params))

    assert out.shape == (B, msl, hd), out.shape
    assert bool(jnp.all(jnp.isfinite(out)))
    # TODO(synk): dropout layers are identity (eval mode), so they are not emitted.
    print("KERNEL_OK")
</pallas_src>

<mosaic_0001>
module attributes {stable_mosaic.version = 11 : i64} {
  func.func @_ffn_block_kernel(%arg0: i32, %arg1: i32, %arg2: memref<2x8x32xf32, #tpu.memory_space<vmem>>, %arg3: memref<32x512xbf16, #tpu.memory_space<vmem>>, %arg4: memref<1x512xf32, #tpu.memory_space<vmem>>, %arg5: memref<512x32xbf16, #tpu.memory_space<vmem>>, %arg6: memref<1x32xf32, #tpu.memory_space<vmem>>, %arg7: memref<1x32xf32, #tpu.memory_space<vmem>>, %arg8: memref<1x32xf32, #tpu.memory_space<vmem>>, %arg9: memref<2x8x32xf32, #tpu.memory_space<vmem>>, %arg10: memref<16x32xf32, #tpu.memory_space<vmem>>) attributes {dimension_semantics = [#tpu.dimension_semantics<parallel>, #tpu.dimension_semantics<arbitrary>], iteration_bounds = array<i64: 1, 4>, scalar_prefetch = 0 : i64, scratch_operands = 1 : i64, tpu.core_type = #tpu.core_type<tc>, window_params = [{transform_indices = @transform_0, window_bounds = array<i64: 2, 8, 32>}, {transform_indices = @transform_1, window_bounds = array<i64: 32, 512>}, {transform_indices = @transform_2, window_bounds = array<i64: 1, 512>}, {transform_indices = @transform_3, window_bounds = array<i64: 512, 32>}, {pipeline_mode = #tpu.pipeline_mode<synchronous>, transform_indices = @transform_4, window_bounds = array<i64: 1, 32>}, {pipeline_mode = #tpu.pipeline_mode<synchronous>, transform_indices = @transform_5, window_bounds = array<i64: 1, 32>}, {pipeline_mode = #tpu.pipeline_mode<synchronous>, transform_indices = @transform_6, window_bounds = array<i64: 1, 32>}, {transform_indices = @transform_7, window_bounds = array<i64: 2, 8, 32>}]} {
    %c0_i32 = arith.constant 0 : i32
    %0 = arith.cmpi eq, %arg1, %c0_i32 : i32
    %1 = arith.extui %0 : i1 to i32
    %c0_i32_0 = arith.constant 0 : i32
    %2 = arith.cmpi ne, %1, %c0_i32_0 : i32
    scf.if %2 {
      %cst_16 = arith.constant 0.000000e+00 : f32
      %22 = vector.broadcast %cst_16 : f32 to vector<16x32xf32>
      %c0_17 = arith.constant 0 : index
      %c0_18 = arith.constant 0 : index
      %23 = vector.load %arg10[%c0_17, %c0_18] : memref<16x32xf32, #tpu.memory_space<vmem>>, vector<16x32xf32>
      tpu.vector_store %arg10[%c0_17, %c0_18], %22 {strides = array<i32>} : memref<16x32xf32, #tpu.memory_space<vmem>>, vector<16x32xf32>,
    } else {
    }
    %c0 = arith.constant 0 : index
    %c0_1 = arith.constant 0 : index
    %c0_2 = arith.constant 0 : index
    %3 = vector.load %arg2[%c0, %c0_1, %c0_2] : memref<2x8x32xf32, #tpu.memory_space<vmem>>, vector<2x8x32xf32>
    %4 = vector.shape_cast %3 : vector<2x8x32xf32> to vector<16x32xf32>
    %5 = arith.truncf %4 : vector<16x32xf32> to vector<16x32xbf16>
    %c0_3 = arith.constant 0 : index
    %c0_4 = arith.constant 0 : index
    %6 = vector.load %arg3[%c0_3, %c0_4] : memref<32x512xbf16, #tpu.memory_space<vmem>>, vector<32x512xbf16>
    %cst = arith.constant dense<0.000000e+00> : vector<16x512xf32>
    %7 = tpu.matmul %5, %6, %cst {dimension_numbers = #tpu.dot_dimension_numbers<[1], [0], [0], [1], [0, 0, 1, 1], [], []>} : vector<16x32xbf16>, vector<32x512xbf16>, vector<16x512xf32> -> vector<16x512xf32>
    %c0_5 = arith.constant 0 : index
    %c0_6 = arith.constant 0 : index
    %8 = vector.load %arg4[%c0_5, %c0_6] : memref<1x512xf32, #tpu.memory_space<vmem>>, vector<1x512xf32>
    %9 = vector.broadcast %8 : vector<1x512xf32> to vector<16x512xf32>
    %10 = arith.addf %7, %9 : vector<16x512xf32>
    %cst_7 = arith.constant 0.000000e+00 : f32
    %11 = vector.broadcast %cst_7 : f32 to vector<16x512xf32>
    %12 = arith.maximumf %10, %11 : vector<16x512xf32>
    %13 = arith.truncf %12 : vector<16x512xf32> to vector<16x512xbf16>
    %c0_8 = arith.constant 0 : index
    %c0_9 = arith.constant 0 : index
    %14 = vector.load %arg10[%c0_8, %c0_9] : memref<16x32xf32, #tpu.memory_space<vmem>>, vector<16x32xf32>
    %c0_10 = arith.constant 0 : index
    %c0_11 = arith.constant 0 : index
    %15 = vector.load %arg5[%c0_10, %c0_11] : memref<512x32xbf16, #tpu.memory_space<vmem>>, vector<512x32xbf16>
    %cst_12 = arith.constant dense<0.000000e+00> : vector<16x32xf32>
    %16 = tpu.matmul %13, %15, %cst_12 {dimension_numbers = #tpu.dot_dimension_numbers<[1], [0], [0], [1], [0, 0, 1, 1], [], []>} : vector<16x512xbf16>, vector<512x32xbf16>, vector<16x32xf32> -> vector<16x32xf32>
    %17 = arith.addf %14, %16 : vector<16x32xf32>
    %c0_13 = arith.constant 0 : index
    %c0_14 = arith.constant 0 : index
    %18 = vector.load %arg10[%c0_13, %c0_14] : memref<16x32xf32, #tpu.memory_space<vmem>>, vector<16x32xf32>
    tpu.vector_store %arg10[%c0_13, %c0_14], %17 {strides = array<i32>} : memref<16x32xf32, #tpu.memory_space<vmem>>, vector<16x32xf32>,
    %c3_i32 = arith.constant 3 : i32
    %19 = arith.cmpi eq, %arg1, %c3_i32 : i32
    %20 = arith.extui %19 : i1 to i32
    %c0_i32_15 = arith.constant 0 : i32
    %21 = arith.cmpi ne, %20, %c0_i32_15 : i32
    scf.if %21 {
      %c0_16 = arith.constant 0 : index
      %c0_17 = arith.constant 0 : index
      %22 = vector.load %arg10[%c0_16, %c0_17] : memref<16x32xf32, #tpu.memory_space<vmem>>, vector<16x32xf32>
      %23 = arith.addf %4, %22 : vector<16x32xf32>
      %c0_18 = arith.constant 0 : index
      %c0_19 = arith.constant 0 : index
      %24 = vector.load %arg6[%c0_18, %c0_19] : memref<1x32xf32, #tpu.memory_space<vmem>>, vector<1x32xf32>
      %25 = vector.broadcast %24 : vector<1x32xf32> to vector<16x32xf32>
      %26 = arith.addf %23, %25 : vector<16x32xf32>
      %cst_20 = arith.constant dense<0.000000e+00> : vector<16xf32>
      %27 = vector.multi_reduction <add>, %26, %cst_20 [1] : vector<16x32xf32> to vector<16xf32>
      %28 = vector.shape_cast %27 : vector<16xf32> to vector<16x1xf32>
      %cst_21 = arith.constant 3.200000e+01 : f32
      %29 = vector.broadcast %cst_21 : f32 to vector<16x1xf32>
      %30 = arith.divf %28, %29 : vector<16x1xf32>
      %31 = vector.broadcast %30 : vector<16x1xf32> to vector<16x32xf32>
      %32 = arith.subf %26, %31 : vector<16x32xf32>
      %33 = vector.broadcast %30 : vector<16x1xf32> to vector<16x32xf32>
      %34 = arith.subf %26, %33 : vector<16x32xf32>
      %35 = arith.mulf %32, %34 : vector<16x32xf32>
      %cst_22 = arith.constant dense<0.000000e+00> : vector<16xf32>
      %36 = vector.multi_reduction <add>, %35, %cst_22 [1] : vector<16x32xf32> to vector<16xf32>
      %37 = vector.shape_cast %36 : vector<16xf32> to vector<16x1xf32>
      %cst_23 = arith.constant 3.200000e+01 : f32
      %38 = vector.broadcast %cst_23 : f32 to vector<16x1xf32>
      %39 = arith.divf %37, %38 : vector<16x1xf32>
      %40 = vector.broadcast %30 : vector<16x1xf32> to vector<16x32xf32>
      %41 = arith.subf %26, %40 : vector<16x32xf32>
      %cst_24 = arith.constant 9.99999974E-6 : f32
      %42 = vector.broadcast %cst_24 : f32 to vector<16x1xf32>
      %43 = arith.addf %39, %42 : vector<16x1xf32>
      %44 = math.rsqrt %43 : vector<16x1xf32>
      %45 = vector.broadcast %44 : vector<16x1xf32> to vector<16x32xf32>
      %46 = arith.mulf %41, %45 : vector<16x32xf32>
      %c0_25 = arith.constant 0 : index
      %c0_26 = arith.constant 0 : index
      %47 = vector.load %arg7[%c0_25, %c0_26] : memref<1x32xf32, #tpu.memory_space<vmem>>, vector<1x32xf32>
      %48 = vector.broadcast %47 : vector<1x32xf32> to vector<16x32xf32>
      %49 = arith.mulf %46, %48 : vector<16x32xf32>
      %c0_27 = arith.constant 0 : index
      %c0_28 = arith.constant 0 : index
      %50 = vector.load %arg8[%c0_27, %c0_28] : memref<1x32xf32, #tpu.memory_space<vmem>>, vector<1x32xf32>
      %51 = vector.broadcast %50 : vector<1x32xf32> to vector<16x32xf32>
      %52 = arith.addf %49, %51 : vector<16x32xf32>
      %53 = vector.shape_cast %52 : vector<16x32xf32> to vector<2x8x32xf32>
      %c0_29 = arith.constant 0 : index
      %c0_30 = arith.constant 0 : index
      %c0_31 = arith.constant 0 : index
      %54 = vector.load %arg9[%c0_29, %c0_30, %c0_31] : memref<2x8x32xf32, #tpu.memory_space<vmem>>, vector<2x8x32xf32>
      tpu.vector_store %arg9[%c0_29, %c0_30, %c0_31], %53 {strides = array<i32>} : memref<2x8x32xf32, #tpu.memory_space<vmem>>, vector<2x8x32xf32>,
    } else {
    }
    return
  }
  func.func @transform_0(%arg0: i32, %arg1: i32) -> (i32, i32, i32) {
    %c0_i32 = arith.constant 0 : i32
    %c0_i32_0 = arith.constant 0 : i32
    %c0_i32_1 = arith.constant 0 : i32
    return %arg0, %c0_i32, %c0_i32_0 : i32, i32, i32
  }
  func.func @transform_1(%arg0: i32, %arg1: i32) -> (i32, i32) {
    %c0_i32 = arith.constant 0 : i32
    %c0_i32_0 = arith.constant 0 : i32
    return %c0_i32, %arg1 : i32, i32
  }
  func.func @transform_2(%arg0: i32, %arg1: i32) -> (i32, i32) {
    %c0_i32 = arith.constant 0 : i32
    %c0_i32_0 = arith.constant 0 : i32
    return %c0_i32, %arg1 : i32, i32
  }
  func.func @transform_3(%arg0: i32, %arg1: i32) -> (i32, i32) {
    %c0_i32 = arith.constant 0 : i32
    %c0_i32_0 = arith.constant 0 : i32
    return %arg1, %c0_i32 : i32, i32
  }
  func.func @transform_4(%arg0: i32, %arg1: i32) -> (i32, i32) {
    %c0_i32 = arith.constant 0 : i32
    %c0_i32_0 = arith.constant 0 : i32
    %c0_i32_1 = arith.constant 0 : i32
    return %c0_i32, %c0_i32_0 : i32, i32
  }
  func.func @transform_5(%arg0: i32, %arg1: i32) -> (i32, i32) {
    %c0_i32 = arith.constant 0 : i32
    %c0_i32_0 = arith.constant 0 : i32
    %c0_i32_1 = arith.constant 0 : i32
    return %c0_i32, %c0_i32_0 : i32, i32
  }
  func.func @transform_6(%arg0: i32, %arg1: i32) -> (i32, i32) {
    %c0_i32 = arith.constant 0 : i32
    %c0_i32_0 = arith.constant 0 : i32
    %c0_i32_1 = arith.constant 0 : i32
    return %c0_i32, %c0_i32_0 : i32, i32
  }
  func.func @transform_7(%arg0: i32, %arg1: i32) -> (i32, i32, i32) {
    %c0_i32 = arith.constant 0 : i32
    %c0_i32_0 = arith.constant 0 : i32
    %c0_i32_1 = arith.constant 0 : i32
    return %arg0, %c0_i32, %c0_i32_0 : i32, i32, i32
  }
}

module attributes {stable_mosaic.version = 11 : i64} {
  func.func @_attn_block_kernel(%arg0: i32, %arg1: memref<2x8x32xf32, #tpu.memory_space<vmem>>, %arg2: memref<32x96xbf16, #tpu.memory_space<vmem>>, %arg3: memref<1x96xf32, #tpu.memory_space<vmem>>, %arg4: memref<4x8x32xbf16, #tpu.memory_space<vmem>>, %arg5: memref<1x32xf32, #tpu.memory_space<vmem>>, %arg6: memref<1x32xf32, #tpu.memory_space<vmem>>, %arg7: memref<1x32xf32, #tpu.memory_space<vmem>>, %arg8: memref<2x8x32xf32, #tpu.memory_space<vmem>>) attributes {dimension_semantics = [#tpu.dimension_semantics<parallel>], iteration_bounds = array<i64: 1>, scalar_prefetch = 0 : i64, scratch_operands = 0 : i64, tpu.core_type = #tpu.core_type<tc>, window_params = [{transform_indices = @transform_0, window_bounds = array<i64: 2, 8, 32>}, {pipeline_mode = #tpu.pipeline_mode<synchronous>, transform_indices = @transform_1, window_bounds = array<i64: 32, 96>}, {pipeline_mode = #tpu.pipeline_mode<synchronous>, transform_indices = @transform_2, window_bounds = array<i64: 1, 96>}, {pipeline_mode = #tpu.pipeline_mode<synchronous>, transform_indices = @transform_3, window_bounds = array<i64: 4, 8, 32>}, {pipeline_mode = #tpu.pipeline_mode<synchronous>, transform_indices = @transform_4, window_bounds = array<i64: 1, 32>}, {pipeline_mode = #tpu.pipeline_mode<synchronous>, transform_indices = @transform_5, window_bounds = array<i64: 1, 32>}, {pipeline_mode = #tpu.pipeline_mode<synchronous>, transform_indices = @transform_6, window_bounds = array<i64: 1, 32>}, {transform_indices = @transform_7, window_bounds = array<i64: 2, 8, 32>}]} {
    %c0 = arith.constant 0 : index
    %c0_0 = arith.constant 0 : index
    %c0_1 = arith.constant 0 : index
    %0 = vector.load %arg1[%c0, %c0_0, %c0_1] : memref<2x8x32xf32, #tpu.memory_space<vmem>>, vector<2x8x32xf32>
    %1 = vector.shape_cast %0 : vector<2x8x32xf32> to vector<16x32xf32>
    %2 = arith.truncf %1 : vector<16x32xf32> to vector<16x32xbf16>
    %c0_2 = arith.constant 0 : index
    %c0_3 = arith.constant 0 : index
    %3 = vector.load %arg2[%c0_2, %c0_3] : memref<32x96xbf16, #tpu.memory_space<vmem>>, vector<32x96xbf16>
    %cst = arith.constant dense<0.000000e+00> : vector<16x96xf32>
    %4 = tpu.matmul %2, %3, %cst {dimension_numbers = #tpu.dot_dimension_numbers<[1], [0], [0], [1], [0, 0, 1, 1], [], []>} : vector<16x32xbf16>, vector<32x96xbf16>, vector<16x96xf32> -> vector<16x96xf32>
    %c0_4 = arith.constant 0 : index
    %c0_5 = arith.constant 0 : index
    %5 = vector.load %arg3[%c0_4, %c0_5] : memref<1x96xf32, #tpu.memory_space<vmem>>, vector<1x96xf32>
    %6 = vector.broadcast %5 : vector<1x96xf32> to vector<16x96xf32>
    %7 = arith.addf %4, %6 : vector<16x96xf32>
    %cst_6 = arith.constant 0.000000e+00 : f32
    %8 = vector.broadcast %cst_6 : f32 to vector<16x32xf32>
    %9 = vector.extract_strided_slice %7 {offsets = [0, 0], sizes = [16, 8], strides = [1, 1]} : vector<16x96xf32> to vector<16x8xf32>
    %cst_7 = arith.constant 0.353553385 : f32
    %10 = vector.broadcast %cst_7 : f32 to vector<16x8xf32>
    %11 = arith.mulf %9, %10 : vector<16x8xf32>
    %12 = arith.truncf %11 : vector<16x8xf32> to vector<16x8xbf16>
    %13 = vector.extract_strided_slice %7 {offsets = [0, 32], sizes = [16, 8], strides = [1, 1]} : vector<16x96xf32> to vector<16x8xf32>
    %14 = arith.truncf %13 : vector<16x8xf32> to vector<16x8xbf16>
    %15 = vector.extract_strided_slice %7 {offsets = [0, 64], sizes = [16, 8], strides = [1, 1]} : vector<16x96xf32> to vector<16x8xf32>
    %16 = arith.truncf %15 : vector<16x8xf32> to vector<16x8xbf16>
    %17 = vector.shape_cast %12 : vector<16x8xbf16> to vector<2x8x8xbf16>
    %18 = vector.shape_cast %14 : vector<16x8xbf16> to vector<2x8x8xbf16>
    %19 = vector.shape_cast %16 : vector<16x8xbf16> to vector<2x8x8xbf16>
    "tpu.trace_start"() <{level = 10 : i32, message = "bqd,bkd->bqk"}> : () -> ()
    %cst_8 = arith.constant dense<0.000000e+00> : vector<2x8x8xf32>
    %20 = tpu.matmul %17, %18, %cst_8 {dimension_numbers = #tpu.dot_dimension_numbers<[2], [2], [1], [1], [0, 0, 0, 1, 1, 1], [0], [0]>} : vector<2x8x8xbf16>, vector<2x8x8xbf16>, vector<2x8x8xf32> -> vector<2x8x8xf32>
    "tpu.trace_stop"() : () -> ()
    %cst_9 = arith.constant dense<0xFF800000> : vector<2x8xf32>
    %21 = vector.multi_reduction <maximumf>, %20, %cst_9 [2] : vector<2x8x8xf32> to vector<2x8xf32>
    %22 = vector.shape_cast %21 : vector<2x8xf32> to vector<2x8x1xf32>
    %23 = vector.broadcast %22 : vector<2x8x1xf32> to vector<2x8x8xf32>
    %24 = arith.subf %20, %23 : vector<2x8x8xf32>
    %25 = math.exp %24 : vector<2x8x8xf32>
    %cst_10 = arith.constant dense<0.000000e+00> : vector<2x8xf32>
    %26 = vector.multi_reduction <add>, %25, %cst_10 [2] : vector<2x8x8xf32> to vector<2x8xf32>
    %27 = vector.shape_cast %26 : vector<2x8xf32> to vector<2x8x1xf32>
    %28 = tpu.reciprocal %27 {approx = true} : vector<2x8x1xf32> -> vector<2x8x1xf32>
    %29 = vector.broadcast %28 : vector<2x8x1xf32> to vector<2x8x8xf32>
    %30 = arith.mulf %25, %29 : vector<2x8x8xf32>
    %31 = arith.truncf %30 : vector<2x8x8xf32> to vector<2x8x8xbf16>
    "tpu.trace_start"() <{level = 10 : i32, message = "bqk,bkd->bqd"}> : () -> ()
    %cst_11 = arith.constant dense<0.000000e+00> : vector<2x8x8xf32>
    %32 = tpu.matmul %31, %19, %cst_11 {dimension_numbers = #tpu.dot_dimension_numbers<[2], [1], [1], [2], [0, 0, 0, 1, 1, 2], [0], [0]>} : vector<2x8x8xbf16>, vector<2x8x8xbf16>, vector<2x8x8xf32> -> vector<2x8x8xf32>
    "tpu.trace_stop"() : () -> ()
    %33 = vector.shape_cast %32 : vector<2x8x8xf32> to vector<16x8xf32>
    %34 = arith.truncf %33 : vector<16x8xf32> to vector<16x8xbf16>
    %c0_12 = arith.constant 0 : index
    %c0_13 = arith.constant 0 : index
    %c0_14 = arith.constant 0 : index
    %35 = vector.load %arg4[%c0_12, %c0_13, %c0_14] : memref<4x8x32xbf16, #tpu.memory_space<vmem>>, vector<1x8x32xbf16>
    %36 = vector.shape_cast %35 : vector<1x8x32xbf16> to vector<8x32xbf16>
    %cst_15 = arith.constant dense<0.000000e+00> : vector<16x32xf32>
    %37 = tpu.matmul %34, %36, %cst_15 {dimension_numbers = #tpu.dot_dimension_numbers<[1], [0], [0], [1], [0, 0, 1, 1], [], []>} : vector<16x8xbf16>, vector<8x32xbf16>, vector<16x32xf32> -> vector<16x32xf32>
    %38 = arith.addf %8, %37 : vector<16x32xf32>
    %39 = vector.extract_strided_slice %7 {offsets = [0, 8], sizes = [16, 8], strides = [1, 1]} : vector<16x96xf32> to vector<16x8xf32>
    %cst_16 = arith.constant 0.353553385 : f32
    %40 = vector.broadcast %cst_16 : f32 to vector<16x8xf32>
    %41 = arith.mulf %39, %40 : vector<16x8xf32>
    %42 = arith.truncf %41 : vector<16x8xf32> to vector<16x8xbf16>
    %43 = vector.extract_strided_slice %7 {offsets = [0, 40], sizes = [16, 8], strides = [1, 1]} : vector<16x96xf32> to vector<16x8xf32>
    %44 = arith.truncf %43 : vector<16x8xf32> to vector<16x8xbf16>
    %45 = vector.extract_strided_slice %7 {offsets = [0, 72], sizes = [16, 8], strides = [1, 1]} : vector<16x96xf32> to vector<16x8xf32>
    %46 = arith.truncf %45 : vector<16x8xf32> to vector<16x8xbf16>
    %47 = vector.shape_cast %42 : vector<16x8xbf16> to vector<2x8x8xbf16>
    %48 = vector.shape_cast %44 : vector<16x8xbf16> to vector<2x8x8xbf16>
    %49 = vector.shape_cast %46 : vector<16x8xbf16> to vector<2x8x8xbf16>
    "tpu.trace_start"() <{level = 10 : i32, message = "bqd,bkd->bqk"}> : () -> ()
    %cst_17 = arith.constant dense<0.000000e+00> : vector<2x8x8xf32>
    %50 = tpu.matmul %47, %48, %cst_17 {dimension_numbers = #tpu.dot_dimension_numbers<[2], [2], [1], [1], [0, 0, 0, 1, 1, 1], [0], [0]>} : vector<2x8x8xbf16>, vector<2x8x8xbf16>, vector<2x8x8xf32> -> vector<2x8x8xf32>
    "tpu.trace_stop"() : () -> ()
    %cst_18 = arith.constant dense<0xFF800000> : vector<2x8xf32>
    %51 = vector.multi_reduction <maximumf>, %50, %cst_18 [2] : vector<2x8x8xf32> to vector<2x8xf32>
    %52 = vector.shape_cast %51 : vector<2x8xf32> to vector<2x8x1xf32>
    %53 = vector.broadcast %52 : vector<2x8x1xf32> to vector<2x8x8xf32>
    %54 = arith.subf %50, %53 : vector<2x8x8xf32>
    %55 = math.exp %54 : vector<2x8x8xf32>
    %cst_19 = arith.constant dense<0.000000e+00> : vector<2x8xf32>
    %56 = vector.multi_reduction <add>, %55, %cst_19 [2] : vector<2x8x8xf32> to vector<2x8xf32>
    %57 = vector.shape_cast %56 : vector<2x8xf32> to vector<2x8x1xf32>
    %58 = tpu.reciprocal %57 {approx = true} : vector<2x8x1xf32> -> vector<2x8x1xf32>
    %59 = vector.broadcast %58 : vector<2x8x1xf32> to vector<2x8x8xf32>
    %60 = arith.mulf %55, %59 : vector<2x8x8xf32>
    %61 = arith.truncf %60 : vector<2x8x8xf32> to vector<2x8x8xbf16>
    "tpu.trace_start"() <{level = 10 : i32, message = "bqk,bkd->bqd"}> : () -> ()
    %cst_20 = arith.constant dense<0.000000e+00> : vector<2x8x8xf32>
    %62 = tpu.matmul %61, %49, %cst_20 {dimension_numbers = #tpu.dot_dimension_numbers<[2], [1], [1], [2], [0, 0, 0, 1, 1, 2], [0], [0]>} : vector<2x8x8xbf16>, vector<2x8x8xbf16>, vector<2x8x8xf32> -> vector<2x8x8xf32>
    "tpu.trace_stop"() : () -> ()
    %63 = vector.shape_cast %62 : vector<2x8x8xf32> to vector<16x8xf32>
    %64 = arith.truncf %63 : vector<16x8xf32> to vector<16x8xbf16>
    %c1 = arith.constant 1 : index
    %c0_21 = arith.constant 0 : index
    %c0_22 = arith.constant 0 : index
    %65 = vector.load %arg4[%c1, %c0_21, %c0_22] : memref<4x8x32xbf16, #tpu.memory_space<vmem>>, vector<1x8x32xbf16>
    %66 = vector.shape_cast %65 : vector<1x8x32xbf16> to vector<8x32xbf16>
    %cst_23 = arith.constant dense<0.000000e+00> : vector<16x32xf32>
    %67 = tpu.matmul %64, %66, %cst_23 {dimension_numbers = #tpu.dot_dimension_numbers<[1], [0], [0], [1], [0, 0, 1, 1], [], []>} : vector<16x8xbf16>, vector<8x32xbf16>, vector<16x32xf32> -> vector<16x32xf32>
    %68 = arith.addf %38, %67 : vector<16x32xf32>
    %69 = vector.extract_strided_slice %7 {offsets = [0, 16], sizes = [16, 8], strides = [1, 1]} : vector<16x96xf32> to vector<16x8xf32>
    %cst_24 = arith.constant 0.353553385 : f32
    %70 = vector.broadcast %cst_24 : f32 to vector<16x8xf32>
    %71 = arith.mulf %69, %70 : vector<16x8xf32>
    %72 = arith.truncf %71 : vector<16x8xf32> to vector<16x8xbf16>
    %73 = vector.extract_strided_slice %7 {offsets = [0, 48], sizes = [16, 8], strides = [1, 1]} : vector<16x96xf32> to vector<16x8xf32>
    %74 = arith.truncf %73 : vector<16x8xf32> to vector<16x8xbf16>
    %75 = vector.extract_strided_slice %7 {offsets = [0, 80], sizes = [16, 8], strides = [1, 1]} : vector<16x96xf32> to vector<16x8xf32>
    %76 = arith.truncf %75 : vector<16x8xf32> to vector<16x8xbf16>
    %77 = vector.shape_cast %72 : vector<16x8xbf16> to vector<2x8x8xbf16>
    %78 = vector.shape_cast %74 : vector<16x8xbf16> to vector<2x8x8xbf16>
    %79 = vector.shape_cast %76 : vector<16x8xbf16> to vector<2x8x8xbf16>
    "tpu.trace_start"() <{level = 10 : i32, message = "bqd,bkd->bqk"}> : () -> ()
    %cst_25 = arith.constant dense<0.000000e+00> : vector<2x8x8xf32>
    %80 = tpu.matmul %77, %78, %cst_25 {dimension_numbers = #tpu.dot_dimension_numbers<[2], [2], [1], [1], [0, 0, 0, 1, 1, 1], [0], [0]>} : vector<2x8x8xbf16>, vector<2x8x8xbf16>, vector<2x8x8xf32> -> vector<2x8x8xf32>
    "tpu.trace_stop"() : () -> ()
    %cst_26 = arith.constant dense<0xFF800000> : vector<2x8xf32>
    %81 = vector.multi_reduction <maximumf>, %80, %cst_26 [2] : vector<2x8x8xf32> to vector<2x8xf32>
    %82 = vector.shape_cast %81 : vector<2x8xf32> to vector<2x8x1xf32>
    %83 = vector.broadcast %82 : vector<2x8x1xf32> to vector<2x8x8xf32>
    %84 = arith.subf %80, %83 : vector<2x8x8xf32>
    %85 = math.exp %84 : vector<2x8x8xf32>
    %cst_27 = arith.constant dense<0.000000e+00> : vector<2x8xf32>
    %86 = vector.multi_reduction <add>, %85, %cst_27 [2] : vector<2x8x8xf32> to vector<2x8xf32>
    %87 = vector.shape_cast %86 : vector<2x8xf32> to vector<2x8x1xf32>
    %88 = tpu.reciprocal %87 {approx = true} : vector<2x8x1xf32> -> vector<2x8x1xf32>
    %89 = vector.broadcast %88 : vector<2x8x1xf32> to vector<2x8x8xf32>
    %90 = arith.mulf %85, %89 : vector<2x8x8xf32>
    %91 = arith.truncf %90 : vector<2x8x8xf32> to vector<2x8x8xbf16>
    "tpu.trace_start"() <{level = 10 : i32, message = "bqk,bkd->bqd"}> : () -> ()
    %cst_28 = arith.constant dense<0.000000e+00> : vector<2x8x8xf32>
    %92 = tpu.matmul %91, %79, %cst_28 {dimension_numbers = #tpu.dot_dimension_numbers<[2], [1], [1], [2], [0, 0, 0, 1, 1, 2], [0], [0]>} : vector<2x8x8xbf16>, vector<2x8x8xbf16>, vector<2x8x8xf32> -> vector<2x8x8xf32>
    "tpu.trace_stop"() : () -> ()
    %93 = vector.shape_cast %92 : vector<2x8x8xf32> to vector<16x8xf32>
    %94 = arith.truncf %93 : vector<16x8xf32> to vector<16x8xbf16>
    %c2 = arith.constant 2 : index
    %c0_29 = arith.constant 0 : index
    %c0_30 = arith.constant 0 : index
    %95 = vector.load %arg4[%c2, %c0_29, %c0_30] : memref<4x8x32xbf16, #tpu.memory_space<vmem>>, vector<1x8x32xbf16>
    %96 = vector.shape_cast %95 : vector<1x8x32xbf16> to vector<8x32xbf16>
    %cst_31 = arith.constant dense<0.000000e+00> : vector<16x32xf32>
    %97 = tpu.matmul %94, %96, %cst_31 {dimension_numbers = #tpu.dot_dimension_numbers<[1], [0], [0], [1], [0, 0, 1, 1], [], []>} : vector<16x8xbf16>, vector<8x32xbf16>, vector<16x32xf32> -> vector<16x32xf32>
    %98 = arith.addf %68, %97 : vector<16x32xf32>
    %99 = vector.extract_strided_slice %7 {offsets = [0, 24], sizes = [16, 8], strides = [1, 1]} : vector<16x96xf32> to vector<16x8xf32>
    %cst_32 = arith.constant 0.353553385 : f32
    %100 = vector.broadcast %cst_32 : f32 to vector<16x8xf32>
    %101 = arith.mulf %99, %100 : vector<16x8xf32>
    %102 = arith.truncf %101 : vector<16x8xf32> to vector<16x8xbf16>
    %103 = vector.extract_strided_slice %7 {offsets = [0, 56], sizes = [16, 8], strides = [1, 1]} : vector<16x96xf32> to vector<16x8xf32>
    %104 = arith.truncf %103 : vector<16x8xf32> to vector<16x8xbf16>
    %105 = vector.extract_strided_slice %7 {offsets = [0, 88], sizes = [16, 8], strides = [1, 1]} : vector<16x96xf32> to vector<16x8xf32>
    %106 = arith.truncf %105 : vector<16x8xf32> to vector<16x8xbf16>
    %107 = vector.shape_cast %102 : vector<16x8xbf16> to vector<2x8x8xbf16>
    %108 = vector.shape_cast %104 : vector<16x8xbf16> to vector<2x8x8xbf16>
    %109 = vector.shape_cast %106 : vector<16x8xbf16> to vector<2x8x8xbf16>
    "tpu.trace_start"() <{level = 10 : i32, message = "bqd,bkd->bqk"}> : () -> ()
    %cst_33 = arith.constant dense<0.000000e+00> : vector<2x8x8xf32>
    %110 = tpu.matmul %107, %108, %cst_33 {dimension_numbers = #tpu.dot_dimension_numbers<[2], [2], [1], [1], [0, 0, 0, 1, 1, 1], [0], [0]>} : vector<2x8x8xbf16>, vector<2x8x8xbf16>, vector<2x8x8xf32> -> vector<2x8x8xf32>
    "tpu.trace_stop"() : () -> ()
    %cst_34 = arith.constant dense<0xFF800000> : vector<2x8xf32>
    %111 = vector.multi_reduction <maximumf>, %110, %cst_34 [2] : vector<2x8x8xf32> to vector<2x8xf32>
    %112 = vector.shape_cast %111 : vector<2x8xf32> to vector<2x8x1xf32>
    %113 = vector.broadcast %112 : vector<2x8x1xf32> to vector<2x8x8xf32>
    %114 = arith.subf %110, %113 : vector<2x8x8xf32>
    %115 = math.exp %114 : vector<2x8x8xf32>
    %cst_35 = arith.constant dense<0.000000e+00> : vector<2x8xf32>
    %116 = vector.multi_reduction <add>, %115, %cst_35 [2] : vector<2x8x8xf32> to vector<2x8xf32>
    %117 = vector.shape_cast %116 : vector<2x8xf32> to vector<2x8x1xf32>
    %118 = tpu.reciprocal %117 {approx = true} : vector<2x8x1xf32> -> vector<2x8x1xf32>
    %119 = vector.broadcast %118 : vector<2x8x1xf32> to vector<2x8x8xf32>
    %120 = arith.mulf %115, %119 : vector<2x8x8xf32>
    %121 = arith.truncf %120 : vector<2x8x8xf32> to vector<2x8x8xbf16>
    "tpu.trace_start"() <{level = 10 : i32, message = "bqk,bkd->bqd"}> : () -> ()
    %cst_36 = arith.constant dense<0.000000e+00> : vector<2x8x8xf32>
    %122 = tpu.matmul %121, %109, %cst_36 {dimension_numbers = #tpu.dot_dimension_numbers<[2], [1], [1], [2], [0, 0, 0, 1, 1, 2], [0], [0]>} : vector<2x8x8xbf16>, vector<2x8x8xbf16>, vector<2x8x8xf32> -> vector<2x8x8xf32>
    "tpu.trace_stop"() : () -> ()
    %123 = vector.shape_cast %122 : vector<2x8x8xf32> to vector<16x8xf32>
    %124 = arith.truncf %123 : vector<16x8xf32> to vector<16x8xbf16>
    %c3 = arith.constant 3 : index
    %c0_37 = arith.constant 0 : index
    %c0_38 = arith.constant 0 : index
    %125 = vector.load %arg4[%c3, %c0_37, %c0_38] : memref<4x8x32xbf16, #tpu.memory_space<vmem>>, vector<1x8x32xbf16>
    %126 = vector.shape_cast %125 : vector<1x8x32xbf16> to vector<8x32xbf16>
    %cst_39 = arith.constant dense<0.000000e+00> : vector<16x32xf32>
    %127 = tpu.matmul %124, %126, %cst_39 {dimension_numbers = #tpu.dot_dimension_numbers<[1], [0], [0], [1], [0, 0, 1, 1], [], []>} : vector<16x8xbf16>, vector<8x32xbf16>, vector<16x32xf32> -> vector<16x32xf32>
    %128 = arith.addf %98, %127 : vector<16x32xf32>
    %129 = arith.addf %1, %128 : vector<16x32xf32>
    %c0_40 = arith.constant 0 : index
    %c0_41 = arith.constant 0 : index
    %130 = vector.load %arg5[%c0_40, %c0_41] : memref<1x32xf32, #tpu.memory_space<vmem>>, vector<1x32xf32>
    %131 = vector.broadcast %130 : vector<1x32xf32> to vector<16x32xf32>
    %132 = arith.addf %129, %131 : vector<16x32xf32>
    %cst_42 = arith.constant dense<0.000000e+00> : vector<16xf32>
    %133 = vector.multi_reduction <add>, %132, %cst_42 [1] : vector<16x32xf32> to vector<16xf32>
    %134 = vector.shape_cast %133 : vector<16xf32> to vector<16x1xf32>
    %cst_43 = arith.constant 3.200000e+01 : f32
    %135 = vector.broadcast %cst_43 : f32 to vector<16x1xf32>
    %136 = arith.divf %134, %135 : vector<16x1xf32>
    %137 = vector.broadcast %136 : vector<16x1xf32> to vector<16x32xf32>
    %138 = arith.subf %132, %137 : vector<16x32xf32>
    %139 = vector.broadcast %136 : vector<16x1xf32> to vector<16x32xf32>
    %140 = arith.subf %132, %139 : vector<16x32xf32>
    %141 = arith.mulf %138, %140 : vector<16x32xf32>
    %cst_44 = arith.constant dense<0.000000e+00> : vector<16xf32>
    %142 = vector.multi_reduction <add>, %141, %cst_44 [1] : vector<16x32xf32> to vector<16xf32>
    %143 = vector.shape_cast %142 : vector<16xf32> to vector<16x1xf32>
    %cst_45 = arith.constant 3.200000e+01 : f32
    %144 = vector.broadcast %cst_45 : f32 to vector<16x1xf32>
    %145 = arith.divf %143, %144 : vector<16x1xf32>
    %146 = vector.broadcast %136 : vector<16x1xf32> to vector<16x32xf32>
    %147 = arith.subf %132, %146 : vector<16x32xf32>
    %cst_46 = arith.constant 9.99999974E-6 : f32
    %148 = vector.broadcast %cst_46 : f32 to vector<16x1xf32>
    %149 = arith.addf %145, %148 : vector<16x1xf32>
    %150 = math.rsqrt %149 : vector<16x1xf32>
    %151 = vector.broadcast %150 : vector<16x1xf32> to vector<16x32xf32>
    %152 = arith.mulf %147, %151 : vector<16x32xf32>
    %c0_47 = arith.constant 0 : index
    %c0_48 = arith.constant 0 : index
    %153 = vector.load %arg6[%c0_47, %c0_48] : memref<1x32xf32, #tpu.memory_space<vmem>>, vector<1x32xf32>
    %154 = vector.broadcast %153 : vector<1x32xf32> to vector<16x32xf32>
    %155 = arith.mulf %152, %154 : vector<16x32xf32>
    %c0_49 = arith.constant 0 : index
    %c0_50 = arith.constant 0 : index
    %156 = vector.load %arg7[%c0_49, %c0_50] : memref<1x32xf32, #tpu.memory_space<vmem>>, vector<1x32xf32>
    %157 = vector.broadcast %156 : vector<1x32xf32> to vector<16x32xf32>
    %158 = arith.addf %155, %157 : vector<16x32xf32>
    %159 = vector.shape_cast %158 : vector<16x32xf32> to vector<2x8x32xf32>
    %c0_51 = arith.constant 0 : index
    %c0_52 = arith.constant 0 : index
    %c0_53 = arith.constant 0 : index
    %160 = vector.load %arg8[%c0_51, %c0_52, %c0_53] : memref<2x8x32xf32, #tpu.memory_space<vmem>>, vector<2x8x32xf32>
    tpu.vector_store %arg8[%c0_51, %c0_52, %c0_53], %159 {strides = array<i32>} : memref<2x8x32xf32, #tpu.memory_space<vmem>>, vector<2x8x32xf32>,
    return
  }
  func.func @transform_0(%arg0: i32) -> (i32, i32, i32) {
    %c0_i32 = arith.constant 0 : i32
    %c0_i32_0 = arith.constant 0 : i32
    %c0_i32_1 = arith.constant 0 : i32
    return %arg0, %c0_i32, %c0_i32_0 : i32, i32, i32
  }
  func.func @transform_1(%arg0: i32) -> (i32, i32) {
    %c0_i32 = arith.constant 0 : i32
    %c0_i32_0 = arith.constant 0 : i32
    %c0_i32_1 = arith.constant 0 : i32
    return %c0_i32, %c0_i32_0 : i32, i32
  }
  func.func @transform_2(%arg0: i32) -> (i32, i32) {
    %c0_i32 = arith.constant 0 : i32
    %c0_i32_0 = arith.constant 0 : i32
    %c0_i32_1 = arith.constant 0 : i32
    return %c0_i32, %c0_i32_0 : i32, i32
  }
  func.func @transform_3(%arg0: i32) -> (i32, i32, i32) {
    %c0_i32 = arith.constant 0 : i32
    %c0_i32_0 = arith.constant 0 : i32
    %c0_i32_1 = arith.constant 0 : i32
    %c0_i32_2 = arith.constant 0 : i32
    return %c0_i32, %c0_i32_0, %c0_i32_1 : i32, i32, i32
  }
  func.func @transform_4(%arg0: i32) -> (i32, i32) {
    %c0_i32 = arith.constant 0 : i32
    %c0_i32_0 = arith.constant 0 : i32
    %c0_i32_1 = arith.constant 0 : i32
    return %c0_i32, %c0_i32_0 : i32, i32
  }
  func.func @transform_5(%arg0: i32) -> (i32, i32) {
    %c0_i32 = arith.constant 0 : i32
    %c0_i32_0 = arith.constant 0 : i32
    %c0_i32_1 = arith.constant 0 : i32
    return %c0_i32, %c0_i32_0 : i32, i32
  }
  func.func @transform_6(%arg0: i32) -> (i32, i32) {
    %c0_i32 = arith.constant 0 : i32
    %c0_i32_0 = arith.constant 0 : i32
    %c0_i32_1 = arith.constant 0 : i32
    return %c0_i32, %c0_i32_0 : i32, i32
  }
  func.func @transform_7(%arg0: i32) -> (i32, i32, i32) {
    %c0_i32 = arith.constant 0 : i32
    %c0_i32_0 = arith.constant 0 : i32
    %c0_i32_1 = arith.constant 0 : i32
    return %arg0, %c0_i32, %c0_i32_0 : i32, i32, i32
  }
}

module attributes {stable_mosaic.version = 11 : i64} {
  func.func @_attn_block_kernel(%arg0: i32, %arg1: memref<2x8x32xf32, #tpu.memory_space<vmem>>, %arg2: memref<32x96xbf16, #tpu.memory_space<vmem>>, %arg3: memref<1x96xf32, #tpu.memory_space<vmem>>, %arg4: memref<4x8x32xbf16, #tpu.memory_space<vmem>>, %arg5: memref<1x32xf32, #tpu.memory_space<vmem>>, %arg6: memref<1x32xf32, #tpu.memory_space<vmem>>, %arg7: memref<1x32xf32, #tpu.memory_space<vmem>>, %arg8: memref<2x8x32xf32, #tpu.memory_space<vmem>>) attributes {dimension_semantics = [#tpu.dimension_semantics<parallel>], iteration_bounds = array<i64: 1>, scalar_prefetch = 0 : i64, scratch_operands = 0 : i64, tpu.core_type = #tpu.core_type<tc>, window_params = [{transform_indices = @transform_0, window_bounds = array<i64: 2, 8, 32>}, {pipeline_mode = #tpu.pipeline_mode<synchronous>, transform_indices = @transform_1, window_bounds = array<i64: 32, 96>}, {pipeline_mode = #tpu.pipeline_mode<synchronous>, transform_indices = @transform_2, window_bounds = array<i64: 1, 96>}, {pipeline_mode = #tpu.pipeline_mode<synchronous>, transform_indices = @transform_3, window_bounds = array<i64: 4, 8, 32>}, {pipeline_mode = #tpu.pipeline_mode<synchronous>, transform_indices = @transform_4, window_bounds = array<i64: 1, 32>}, {pipeline_mode = #tpu.pipeline_mode<synchronous>, transform_indices = @transform_5, window_bounds = array<i64: 1, 32>}, {pipeline_mode = #tpu.pipeline_mode<synchronous>, transform_indices = @transform_6, window_bounds = array<i64: 1, 32>}, {transform_indices = @transform_7, window_bounds = array<i64: 2, 8, 32>}]} {
    %c0 = arith.constant 0 : index
    %c0_0 = arith.constant 0 : index
    %c0_1 = arith.constant 0 : index
    %0 = vector.load %arg1[%c0, %c0_0, %c0_1] : memref<2x8x32xf32, #tpu.memory_space<vmem>>, vector<2x8x32xf32>
    %1 = vector.shape_cast %0 : vector<2x8x32xf32> to vector<16x32xf32>
    %2 = arith.truncf %1 : vector<16x32xf32> to vector<16x32xbf16>
    %c0_2 = arith.constant 0 : index
    %c0_3 = arith.constant 0 : index
    %3 = vector.load %arg2[%c0_2, %c0_3] : memref<32x96xbf16, #tpu.memory_space<vmem>>, vector<32x96xbf16>
    %cst = arith.constant dense<0.000000e+00> : vector<16x96xf32>
    %4 = tpu.matmul %2, %3, %cst {dimension_numbers = #tpu.dot_dimension_numbers<[1], [0], [0], [1], [0, 0, 1, 1], [], []>} : vector<16x32xbf16>, vector<32x96xbf16>, vector<16x96xf32> -> vector<16x96xf32>
    %c0_4 = arith.constant 0 : index
    %c0_5 = arith.constant 0 : index
    %5 = vector.load %arg3[%c0_4, %c0_5] : memref<1x96xf32, #tpu.memory_space<vmem>>, vector<1x96xf32>
    %6 = vector.broadcast %5 : vector<1x96xf32> to vector<16x96xf32>
    %7 = arith.addf %4, %6 : vector<16x96xf32>
    %cst_6 = arith.constant 0.000000e+00 : f32
    %8 = vector.broadcast %cst_6 : f32 to vector<16x32xf32>
    %9 = vector.extract_strided_slice %7 {offsets = [0, 0], sizes = [16, 8], strides = [1, 1]} : vector<16x96xf32> to vector<16x8xf32>
    %cst_7 = arith.constant 0.353553385 : f32
    %10 = vector.broadcast %cst_7 : f32 to vector<16x8xf32>
    %11 = arith.mulf %9, %10 : vector<16x8xf32>
    %12 = arith.truncf %11 : vector<16x8xf32> to vector<16x8xbf16>
    %13 = vector.extract_strided_slice %7 {offsets = [0, 32], sizes = [16, 8], strides = [1, 1]} : vector<16x96xf32> to vector<16x8xf32>
    %14 = arith.truncf %13 : vector<16x8xf32> to vector<16x8xbf16>
    %15 = vector.extract_strided_slice %7 {offsets = [0, 64], sizes = [16, 8], strides = [1, 1]} : vector<16x96xf32> to vector<16x8xf32>
    %16 = arith.truncf %15 : vector<16x8xf32> to vector<16x8xbf16>
    %17 = vector.shape_cast %12 : vector<16x8xbf16> to vector<2x8x8xbf16>
    %18 = vector.shape_cast %14 : vector<16x8xbf16> to vector<2x8x8xbf16>
    %19 = vector.shape_cast %16 : vector<16x8xbf16> to vector<2x8x8xbf16>
    "tpu.trace_start"() <{level = 10 : i32, message = "bqd,bkd->bqk"}> : () -> ()
    %cst_8 = arith.constant dense<0.000000e+00> : vector<2x8x8xf32>
    %20 = tpu.matmul %17, %18, %cst_8 {dimension_numbers = #tpu.dot_dimension_numbers<[2], [2], [1], [1], [0, 0, 0, 1, 1, 1], [0], [0]>} : vector<2x8x8xbf16>, vector<2x8x8xbf16>, vector<2x8x8xf32> -> vector<2x8x8xf32>
    "tpu.trace_stop"() : () -> ()
    %cst_9 = arith.constant dense<0xFF800000> : vector<2x8xf32>
    %21 = vector.multi_reduction <maximumf>, %20, %cst_9 [2] : vector<2x8x8xf32> to vector<2x8xf32>
    %22 = vector.shape_cast %21 : vector<2x8xf32> to vector<2x8x1xf32>
    %23 = vector.broadcast %22 : vector<2x8x1xf32> to vector<2x8x8xf32>
    %24 = arith.subf %20, %23 : vector<2x8x8xf32>
    %25 = math.exp %24 : vector<2x8x8xf32>
    %cst_10 = arith.constant dense<0.000000e+00> : vector<2x8xf32>
    %26 = vector.multi_reduction <add>, %25, %cst_10 [2] : vector<2x8x8xf32> to vector<2x8xf32>
    %27 = vector.shape_cast %26 : vector<2x8xf32> to vector<2x8x1xf32>
    %28 = tpu.reciprocal %27 {approx = true} : vector<2x8x1xf32> -> vector<2x8x1xf32>
    %29 = vector.broadcast %28 : vector<2x8x1xf32> to vector<2x8x8xf32>
    %30 = arith.mulf %25, %29 : vector<2x8x8xf32>
    %31 = arith.truncf %30 : vector<2x8x8xf32> to vector<2x8x8xbf16>
    "tpu.trace_start"() <{level = 10 : i32, message = "bqk,bkd->bqd"}> : () -> ()
    %cst_11 = arith.constant dense<0.000000e+00> : vector<2x8x8xf32>
    %32 = tpu.matmul %31, %19, %cst_11 {dimension_numbers = #tpu.dot_dimension_numbers<[2], [1], [1], [2], [0, 0, 0, 1, 1, 2], [0], [0]>} : vector<2x8x8xbf16>, vector<2x8x8xbf16>, vector<2x8x8xf32> -> vector<2x8x8xf32>
    "tpu.trace_stop"() : () -> ()
    %33 = vector.shape_cast %32 : vector<2x8x8xf32> to vector<16x8xf32>
    %34 = arith.truncf %33 : vector<16x8xf32> to vector<16x8xbf16>
    %c0_12 = arith.constant 0 : index
    %c0_13 = arith.constant 0 : index
    %c0_14 = arith.constant 0 : index
    %35 = vector.load %arg4[%c0_12, %c0_13, %c0_14] : memref<4x8x32xbf16, #tpu.memory_space<vmem>>, vector<1x8x32xbf16>
    %36 = vector.shape_cast %35 : vector<1x8x32xbf16> to vector<8x32xbf16>
    %cst_15 = arith.constant dense<0.000000e+00> : vector<16x32xf32>
    %37 = tpu.matmul %34, %36, %cst_15 {dimension_numbers = #tpu.dot_dimension_numbers<[1], [0], [0], [1], [0, 0, 1, 1], [], []>} : vector<16x8xbf16>, vector<8x32xbf16>, vector<16x32xf32> -> vector<16x32xf32>
    %38 = arith.addf %8, %37 : vector<16x32xf32>
    %39 = vector.extract_strided_slice %7 {offsets = [0, 8], sizes = [16, 8], strides = [1, 1]} : vector<16x96xf32> to vector<16x8xf32>
    %cst_16 = arith.constant 0.353553385 : f32
    %40 = vector.broadcast %cst_16 : f32 to vector<16x8xf32>
    %41 = arith.mulf %39, %40 : vector<16x8xf32>
    %42 = arith.truncf %41 : vector<16x8xf32> to vector<16x8xbf16>
    %43 = vector.extract_strided_slice %7 {offsets = [0, 40], sizes = [16, 8], strides = [1, 1]} : vector<16x96xf32> to vector<16x8xf32>
    %44 = arith.truncf %43 : vector<16x8xf32> to vector<16x8xbf16>
    %45 = vector.extract_strided_slice %7 {offsets = [0, 72], sizes = [16, 8], strides = [1, 1]} : vector<16x96xf32> to vector<16x8xf32>
    %46 = arith.truncf %45 : vector<16x8xf32> to vector<16x8xbf16>
    %47 = vector.shape_cast %42 : vector<16x8xbf16> to vector<2x8x8xbf16>
    %48 = vector.shape_cast %44 : vector<16x8xbf16> to vector<2x8x8xbf16>
    %49 = vector.shape_cast %46 : vector<16x8xbf16> to vector<2x8x8xbf16>
    "tpu.trace_start"() <{level = 10 : i32, message = "bqd,bkd->bqk"}> : () -> ()
    %cst_17 = arith.constant dense<0.000000e+00> : vector<2x8x8xf32>
    %50 = tpu.matmul %47, %48, %cst_17 {dimension_numbers = #tpu.dot_dimension_numbers<[2], [2], [1], [1], [0, 0, 0, 1, 1, 1], [0], [0]>} : vector<2x8x8xbf16>, vector<2x8x8xbf16>, vector<2x8x8xf32> -> vector<2x8x8xf32>
    "tpu.trace_stop"() : () -> ()
    %cst_18 = arith.constant dense<0xFF800000> : vector<2x8xf32>
    %51 = vector.multi_reduction <maximumf>, %50, %cst_18 [2] : vector<2x8x8xf32> to vector<2x8xf32>
    %52 = vector.shape_cast %51 : vector<2x8xf32> to vector<2x8x1xf32>
    %53 = vector.broadcast %52 : vector<2x8x1xf32> to vector<2x8x8xf32>
    %54 = arith.subf %50, %53 : vector<2x8x8xf32>
    %55 = math.exp %54 : vector<2x8x8xf32>
    %cst_19 = arith.constant dense<0.000000e+00> : vector<2x8xf32>
    %56 = vector.multi_reduction <add>, %55, %cst_19 [2] : vector<2x8x8xf32> to vector<2x8xf32>
    %57 = vector.shape_cast %56 : vector<2x8xf32> to vector<2x8x1xf32>
    %58 = tpu.reciprocal %57 {approx = true} : vector<2x8x1xf32> -> vector<2x8x1xf32>
    %59 = vector.broadcast %58 : vector<2x8x1xf32> to vector<2x8x8xf32>
    %60 = arith.mulf %55, %59 : vector<2x8x8xf32>
    %61 = arith.truncf %60 : vector<2x8x8xf32> to vector<2x8x8xbf16>
    "tpu.trace_start"() <{level = 10 : i32, message = "bqk,bkd->bqd"}> : () -> ()
    %cst_20 = arith.constant dense<0.000000e+00> : vector<2x8x8xf32>
    %62 = tpu.matmul %61, %49, %cst_20 {dimension_numbers = #tpu.dot_dimension_numbers<[2], [1], [1], [2], [0, 0, 0, 1, 1, 2], [0], [0]>} : vector<2x8x8xbf16>, vector<2x8x8xbf16>, vector<2x8x8xf32> -> vector<2x8x8xf32>
    "tpu.trace_stop"() : () -> ()
    %63 = vector.shape_cast %62 : vector<2x8x8xf32> to vector<16x8xf32>
    %64 = arith.truncf %63 : vector<16x8xf32> to vector<16x8xbf16>
    %c1 = arith.constant 1 : index
    %c0_21 = arith.constant 0 : index
    %c0_22 = arith.constant 0 : index
    %65 = vector.load %arg4[%c1, %c0_21, %c0_22] : memref<4x8x32xbf16, #tpu.memory_space<vmem>>, vector<1x8x32xbf16>
    %66 = vector.shape_cast %65 : vector<1x8x32xbf16> to vector<8x32xbf16>
    %cst_23 = arith.constant dense<0.000000e+00> : vector<16x32xf32>
    %67 = tpu.matmul %64, %66, %cst_23 {dimension_numbers = #tpu.dot_dimension_numbers<[1], [0], [0], [1], [0, 0, 1, 1], [], []>} : vector<16x8xbf16>, vector<8x32xbf16>, vector<16x32xf32> -> vector<16x32xf32>
    %68 = arith.addf %38, %67 : vector<16x32xf32>
    %69 = vector.extract_strided_slice %7 {offsets = [0, 16], sizes = [16, 8], strides = [1, 1]} : vector<16x96xf32> to vector<16x8xf32>
    %cst_24 = arith.constant 0.353553385 : f32
    %70 = vector.broadcast %cst_24 : f32 to vector<16x8xf32>
    %71 = arith.mulf %69, %70 : vector<16x8xf32>
    %72 = arith.truncf %71 : vector<16x8xf32> to vector<16x8xbf16>
    %73 = vector.extract_strided_slice %7 {offsets = [0, 48], sizes = [16, 8], strides = [1, 1]} : vector<16x96xf32> to vector<16x8xf32>
    %74 = arith.truncf %73 : vector<16x8xf32> to vector<16x8xbf16>
    %75 = vector.extract_strided_slice %7 {offsets = [0, 80], sizes = [16, 8], strides = [1, 1]} : vector<16x96xf32> to vector<16x8xf32>
    %76 = arith.truncf %75 : vector<16x8xf32> to vector<16x8xbf16>
    %77 = vector.shape_cast %72 : vector<16x8xbf16> to vector<2x8x8xbf16>
    %78 = vector.shape_cast %74 : vector<16x8xbf16> to vector<2x8x8xbf16>
    %79 = vector.shape_cast %76 : vector<16x8xbf16> to vector<2x8x8xbf16>
    "tpu.trace_start"() <{level = 10 : i32, message = "bqd,bkd->bqk"}> : () -> ()
    %cst_25 = arith.constant dense<0.000000e+00> : vector<2x8x8xf32>
    %80 = tpu.matmul %77, %78, %cst_25 {dimension_numbers = #tpu.dot_dimension_numbers<[2], [2], [1], [1], [0, 0, 0, 1, 1, 1], [0], [0]>} : vector<2x8x8xbf16>, vector<2x8x8xbf16>, vector<2x8x8xf32> -> vector<2x8x8xf32>
    "tpu.trace_stop"() : () -> ()
    %cst_26 = arith.constant dense<0xFF800000> : vector<2x8xf32>
    %81 = vector.multi_reduction <maximumf>, %80, %cst_26 [2] : vector<2x8x8xf32> to vector<2x8xf32>
    %82 = vector.shape_cast %81 : vector<2x8xf32> to vector<2x8x1xf32>
    %83 = vector.broadcast %82 : vector<2x8x1xf32> to vector<2x8x8xf32>
    %84 = arith.subf %80, %83 : vector<2x8x8xf32>
    %85 = math.exp %84 : vector<2x8x8xf32>
    %cst_27 = arith.constant dense<0.000000e+00> : vector<2x8xf32>
    %86 = vector.multi_reduction <add>, %85, %cst_27 [2] : vector<2x8x8xf32> to vector<2x8xf32>
    %87 = vector.shape_cast %86 : vector<2x8xf32> to vector<2x8x1xf32>
    %88 = tpu.reciprocal %87 {approx = true} : vector<2x8x1xf32> -> vector<2x8x1xf32>
    %89 = vector.broadcast %88 : vector<2x8x1xf32> to vector<2x8x8xf32>
    %90 = arith.mulf %85, %89 : vector<2x8x8xf32>
    %91 = arith.truncf %90 : vector<2x8x8xf32> to vector<2x8x8xbf16>
    "tpu.trace_start"() <{level = 10 : i32, message = "bqk,bkd->bqd"}> : () -> ()
    %cst_28 = arith.constant dense<0.000000e+00> : vector<2x8x8xf32>
    %92 = tpu.matmul %91, %79, %cst_28 {dimension_numbers = #tpu.dot_dimension_numbers<[2], [1], [1], [2], [0, 0, 0, 1, 1, 2], [0], [0]>} : vector<2x8x8xbf16>, vector<2x8x8xbf16>, vector<2x8x8xf32> -> vector<2x8x8xf32>
    "tpu.trace_stop"() : () -> ()
    %93 = vector.shape_cast %92 : vector<2x8x8xf32> to vector<16x8xf32>
    %94 = arith.truncf %93 : vector<16x8xf32> to vector<16x8xbf16>
    %c2 = arith.constant 2 : index
    %c0_29 = arith.constant 0 : index
    %c0_30 = arith.constant 0 : index
    %95 = vector.load %arg4[%c2, %c0_29, %c0_30] : memref<4x8x32xbf16, #tpu.memory_space<vmem>>, vector<1x8x32xbf16>
    %96 = vector.shape_cast %95 : vector<1x8x32xbf16> to vector<8x32xbf16>
    %cst_31 = arith.constant dense<0.000000e+00> : vector<16x32xf32>
    %97 = tpu.matmul %94, %96, %cst_31 {dimension_numbers = #tpu.dot_dimension_numbers<[1], [0], [0], [1], [0, 0, 1, 1], [], []>} : vector<16x8xbf16>, vector<8x32xbf16>, vector<16x32xf32> -> vector<16x32xf32>
    %98 = arith.addf %68, %97 : vector<16x32xf32>
    %99 = vector.extract_strided_slice %7 {offsets = [0, 24], sizes = [16, 8], strides = [1, 1]} : vector<16x96xf32> to vector<16x8xf32>
    %cst_32 = arith.constant 0.353553385 : f32
    %100 = vector.broadcast %cst_32 : f32 to vector<16x8xf32>
    %101 = arith.mulf %99, %100 : vector<16x8xf32>
    %102 = arith.truncf %101 : vector<16x8xf32> to vector<16x8xbf16>
    %103 = vector.extract_strided_slice %7 {offsets = [0, 56], sizes = [16, 8], strides = [1, 1]} : vector<16x96xf32> to vector<16x8xf32>
    %104 = arith.truncf %103 : vector<16x8xf32> to vector<16x8xbf16>
    %105 = vector.extract_strided_slice %7 {offsets = [0, 88], sizes = [16, 8], strides = [1, 1]} : vector<16x96xf32> to vector<16x8xf32>
    %106 = arith.truncf %105 : vector<16x8xf32> to vector<16x8xbf16>
    %107 = vector.shape_cast %102 : vector<16x8xbf16> to vector<2x8x8xbf16>
    %108 = vector.shape_cast %104 : vector<16x8xbf16> to vector<2x8x8xbf16>
    %109 = vector.shape_cast %106 : vector<16x8xbf16> to vector<2x8x8xbf16>
    "tpu.trace_start"() <{level = 10 : i32, message = "bqd,bkd->bqk"}> : () -> ()
    %cst_33 = arith.constant dense<0.000000e+00> : vector<2x8x8xf32>
    %110 = tpu.matmul %107, %108, %cst_33 {dimension_numbers = #tpu.dot_dimension_numbers<[2], [2], [1], [1], [0, 0, 0, 1, 1, 1], [0], [0]>} : vector<2x8x8xbf16>, vector<2x8x8xbf16>, vector<2x8x8xf32> -> vector<2x8x8xf32>
    "tpu.trace_stop"() : () -> ()
    %cst_34 = arith.constant dense<0xFF800000> : vector<2x8xf32>
    %111 = vector.multi_reduction <maximumf>, %110, %cst_34 [2] : vector<2x8x8xf32> to vector<2x8xf32>
    %112 = vector.shape_cast %111 : vector<2x8xf32> to vector<2x8x1xf32>
    %113 = vector.broadcast %112 : vector<2x8x1xf32> to vector<2x8x8xf32>
    %114 = arith.subf %110, %113 : vector<2x8x8xf32>
    %115 = math.exp %114 : vector<2x8x8xf32>
    %cst_35 = arith.constant dense<0.000000e+00> : vector<2x8xf32>
    %116 = vector.multi_reduction <add>, %115, %cst_35 [2] : vector<2x8x8xf32> to vector<2x8xf32>
    %117 = vector.shape_cast %116 : vector<2x8xf32> to vector<2x8x1xf32>
    %118 = tpu.reciprocal %117 {approx = true} : vector<2x8x1xf32> -> vector<2x8x1xf32>
    %119 = vector.broadcast %118 : vector<2x8x1xf32> to vector<2x8x8xf32>
    %120 = arith.mulf %115, %119 : vector<2x8x8xf32>
    %121 = arith.truncf %120 : vector<2x8x8xf32> to vector<2x8x8xbf16>
    "tpu.trace_start"() <{level = 10 : i32, message = "bqk,bkd->bqd"}> : () -> ()
    %cst_36 = arith.constant dense<0.000000e+00> : vector<2x8x8xf32>
    %122 = tpu.matmul %121, %109, %cst_36 {dimension_numbers = #tpu.dot_dimension_numbers<[2], [1], [1], [2], [0, 0, 0, 1, 1, 2], [0], [0]>} : vector<2x8x8xbf16>, vector<2x8x8xbf16>, vector<2x8x8xf32> -> vector<2x8x8xf32>
    "tpu.trace_stop"() : () -> ()
    %123 = vector.shape_cast %122 : vector<2x8x8xf32> to vector<16x8xf32>
    %124 = arith.truncf %123 : vector<16x8xf32> to vector<16x8xbf16>
    %c3 = arith.constant 3 : index
    %c0_37 = arith.constant 0 : index
    %c0_38 = arith.constant 0 : index
    %125 = vector.load %arg4[%c3, %c0_37, %c0_38] : memref<4x8x32xbf16, #tpu.memory_space<vmem>>, vector<1x8x32xbf16>
    %126 = vector.shape_cast %125 : vector<1x8x32xbf16> to vector<8x32xbf16>
    %cst_39 = arith.constant dense<0.000000e+00> : vector<16x32xf32>
    %127 = tpu.matmul %124, %126, %cst_39 {dimension_numbers = #tpu.dot_dimension_numbers<[1], [0], [0], [1], [0, 0, 1, 1], [], []>} : vector<16x8xbf16>, vector<8x32xbf16>, vector<16x32xf32> -> vector<16x32xf32>
    %128 = arith.addf %98, %127 : vector<16x32xf32>
    %129 = arith.addf %1, %128 : vector<16x32xf32>
    %c0_40 = arith.constant 0 : index
    %c0_41 = arith.constant 0 : index
    %130 = vector.load %arg5[%c0_40, %c0_41] : memref<1x32xf32, #tpu.memory_space<vmem>>, vector<1x32xf32>
    %131 = vector.broadcast %130 : vector<1x32xf32> to vector<16x32xf32>
    %132 = arith.addf %129, %131 : vector<16x32xf32>
    %cst_42 = arith.constant dense<0.000000e+00> : vector<16xf32>
    %133 = vector.multi_reduction <add>, %132, %cst_42 [1] : vector<16x32xf32> to vector<16xf32>
    %134 = vector.shape_cast %133 : vector<16xf32> to vector<16x1xf32>
    %cst_43 = arith.constant 3.200000e+01 : f32
    %135 = vector.broadcast %cst_43 : f32 to vector<16x1xf32>
    %136 = arith.divf %134, %135 : vector<16x1xf32>
    %137 = vector.broadcast %136 : vector<16x1xf32> to vector<16x32xf32>
    %138 = arith.subf %132, %137 : vector<16x32xf32>
    %139 = vector.broadcast %136 : vector<16x1xf32> to vector<16x32xf32>
    %140 = arith.subf %132, %139 : vector<16x32xf32>
    %141 = arith.mulf %138, %140 : vector<16x32xf32>
    %cst_44 = arith.constant dense<0.000000e+00> : vector<16xf32>
    %142 = vector.multi_reduction <add>, %141, %cst_44 [1] : vector<16x32xf32> to vector<16xf32>
    %143 = vector.shape_cast %142 : vector<16xf32> to vector<16x1xf32>
    %cst_45 = arith.constant 3.200000e+01 : f32
    %144 = vector.broadcast %cst_45 : f32 to vector<16x1xf32>
    %145 = arith.divf %143, %144 : vector<16x1xf32>
    %146 = vector.broadcast %136 : vector<16x1xf32> to vector<16x32xf32>
    %147 = arith.subf %132, %146 : vector<16x32xf32>
    %cst_46 = arith.constant 9.99999974E-6 : f32
    %148 = vector.broadcast %cst_46 : f32 to vector<16x1xf32>
    %149 = arith.addf %145, %148 : vector<16x1xf32>
    %150 = math.rsqrt %149 : vector<16x1xf32>
    %151 = vector.broadcast %150 : vector<16x1xf32> to vector<16x32xf32>
    %152 = arith.mulf %147, %151 : vector<16x32xf32>
    %c0_47 = arith.constant 0 : index
    %c0_48 = arith.constant 0 : index
    %153 = vector.load %arg6[%c0_47, %c0_48] : memref<1x32xf32, #tpu.memory_space<vmem>>, vector<1x32xf32>
    %154 = vector.broadcast %153 : vector<1x32xf32> to vector<16x32xf32>
    %155 = arith.mulf %152, %154 : vector<16x32xf32>
    %c0_49 = arith.constant 0 : index
    %c0_50 = arith.constant 0 : index
    %156 = vector.load %arg7[%c0_49, %c0_50] : memref<1x32xf32, #tpu.memory_space<vmem>>, vector<1x32xf32>
    %157 = vector.broadcast %156 : vector<1x32xf32> to vector<16x32xf32>
    %158 = arith.addf %155, %157 : vector<16x32xf32>
    %159 = vector.shape_cast %158 : vector<16x32xf32> to vector<2x8x32xf32>
    %c0_51 = arith.constant 0 : index
    %c0_52 = arith.constant 0 : index
    %c0_53 = arith.constant 0 : index
    %160 = vector.load %arg8[%c0_51, %c0_52, %c0_53] : memref<2x8x32xf32, #tpu.memory_space<vmem>>, vector<2x8x32xf32>
    tpu.vector_store %arg8[%c0_51, %c0_52, %c0_53], %159 {strides = array<i32>} : memref<2x8x32xf32, #tpu.memory_space<vmem>>, vector<2x8x32xf32>,
    return
  }
  func.func @transform_0(%arg0: i32) -> (i32, i32, i32) {
    %c0_i32 = arith.constant 0 : i32
    %c0_i32_0 = arith.constant 0 : i32
    %c0_i32_1 = arith.constant 0 : i32
    return %arg0, %c0_i32, %c0_i32_0 : i32, i32, i32
  }
  func.func @transform_1(%arg0: i32) -> (i32, i32) {
    %c0_i32 = arith.constant 0 : i32
    %c0_i32_0 = arith.constant 0 : i32
    %c0_i32_1 = arith.constant 0 : i32
    return %c0_i32, %c0_i32_0 : i32, i32
  }
  func.func @transform_2(%arg0: i32) -> (i32, i32) {
    %c0_i32 = arith.constant 0 : i32
    %c0_i32_0 = arith.constant 0 : i32
    %c0_i32_1 = arith.constant 0 : i32
    return %c0_i32, %c0_i32_0 : i32, i32
  }
  func.func @transform_3(%arg0: i32) -> (i32, i32, i32) {
    %c0_i32 = arith.constant 0 : i32
    %c0_i32_0 = arith.constant 0 : i32
    %c0_i32_1 = arith.constant 0 : i32
    %c0_i32_2 = arith.constant 0 : i32
    return %c0_i32, %c0_i32_0, %c0_i32_1 : i32, i32, i32
  }
  func.func @transform_4(%arg0: i32) -> (i32, i32) {
    %c0_i32 = arith.constant 0 : i32
    %c0_i32_0 = arith.constant 0 : i32
    %c0_i32_1 = arith.constant 0 : i32
    return %c0_i32, %c0_i32_0 : i32, i32
  }
  func.func @transform_5(%arg0: i32) -> (i32, i32) {
    %c0_i32 = arith.constant 0 : i32
    %c0_i32_0 = arith.constant 0 : i32
    %c0_i32_1 = arith.constant 0 : i32
    return %c0_i32, %c0_i32_0 : i32, i32
  }
  func.func @transform_6(%arg0: i32) -> (i32, i32) {
    %c0_i32 = arith.constant 0 : i32
    %c0_i32_0 = arith.constant 0 : i32
    %c0_i32_1 = arith.constant 0 : i32
    return %c0_i32, %c0_i32_0 : i32, i32
  }
  func.func @transform_7(%arg0: i32) -> (i32, i32, i32) {
    %c0_i32 = arith.constant 0 : i32
    %c0_i32_0 = arith.constant 0 : i32
    %c0_i32_1 = arith.constant 0 : i32
    return %arg0, %c0_i32, %c0_i32_0 : i32, i32, i32
  }
}

module attributes {stable_mosaic.version = 11 : i64} {
  func.func @_ffn_block_kernel(%arg0: i32, %arg1: i32, %arg2: memref<2x8x32xf32, #tpu.memory_space<vmem>>, %arg3: memref<32x512xbf16, #tpu.memory_space<vmem>>, %arg4: memref<1x512xf32, #tpu.memory_space<vmem>>, %arg5: memref<512x32xbf16, #tpu.memory_space<vmem>>, %arg6: memref<1x32xf32, #tpu.memory_space<vmem>>, %arg7: memref<1x32xf32, #tpu.memory_space<vmem>>, %arg8: memref<1x32xf32, #tpu.memory_space<vmem>>, %arg9: memref<2x8x32xf32, #tpu.memory_space<vmem>>, %arg10: memref<16x32xf32, #tpu.memory_space<vmem>>) attributes {dimension_semantics = [#tpu.dimension_semantics<parallel>, #tpu.dimension_semantics<arbitrary>], iteration_bounds = array<i64: 1, 4>, scalar_prefetch = 0 : i64, scratch_operands = 1 : i64, tpu.core_type = #tpu.core_type<tc>, window_params = [{transform_indices = @transform_0, window_bounds = array<i64: 2, 8, 32>}, {transform_indices = @transform_1, window_bounds = array<i64: 32, 512>}, {transform_indices = @transform_2, window_bounds = array<i64: 1, 512>}, {transform_indices = @transform_3, window_bounds = array<i64: 512, 32>}, {pipeline_mode = #tpu.pipeline_mode<synchronous>, transform_indices = @transform_4, window_bounds = array<i64: 1, 32>}, {pipeline_mode = #tpu.pipeline_mode<synchronous>, transform_indices = @transform_5, window_bounds = array<i64: 1, 32>}, {pipeline_mode = #tpu.pipeline_mode<synchronous>, transform_indices = @transform_6, window_bounds = array<i64: 1, 32>}, {transform_indices = @transform_7, window_bounds = array<i64: 2, 8, 32>}]} {
    %c0_i32 = arith.constant 0 : i32
    %0 = arith.cmpi eq, %arg1, %c0_i32 : i32
    %1 = arith.extui %0 : i1 to i32
    %c0_i32_0 = arith.constant 0 : i32
    %2 = arith.cmpi ne, %1, %c0_i32_0 : i32
    scf.if %2 {
      %cst_16 = arith.constant 0.000000e+00 : f32
      %22 = vector.broadcast %cst_16 : f32 to vector<16x32xf32>
      %c0_17 = arith.constant 0 : index
      %c0_18 = arith.constant 0 : index
      %23 = vector.load %arg10[%c0_17, %c0_18] : memref<16x32xf32, #tpu.memory_space<vmem>>, vector<16x32xf32>
      tpu.vector_store %arg10[%c0_17, %c0_18], %22 {strides = array<i32>} : memref<16x32xf32, #tpu.memory_space<vmem>>, vector<16x32xf32>,
    } else {
    }
    %c0 = arith.constant 0 : index
    %c0_1 = arith.constant 0 : index
    %c0_2 = arith.constant 0 : index
    %3 = vector.load %arg2[%c0, %c0_1, %c0_2] : memref<2x8x32xf32, #tpu.memory_space<vmem>>, vector<2x8x32xf32>
    %4 = vector.shape_cast %3 : vector<2x8x32xf32> to vector<16x32xf32>
    %5 = arith.truncf %4 : vector<16x32xf32> to vector<16x32xbf16>
    %c0_3 = arith.constant 0 : index
    %c0_4 = arith.constant 0 : index
    %6 = vector.load %arg3[%c0_3, %c0_4] : memref<32x512xbf16, #tpu.memory_space<vmem>>, vector<32x512xbf16>
    %cst = arith.constant dense<0.000000e+00> : vector<16x512xf32>
    %7 = tpu.matmul %5, %6, %cst {dimension_numbers = #tpu.dot_dimension_numbers<[1], [0], [0], [1], [0, 0, 1, 1], [], []>} : vector<16x32xbf16>, vector<32x512xbf16>, vector<16x512xf32> -> vector<16x512xf32>
    %c0_5 = arith.constant 0 : index
    %c0_6 = arith.constant 0 : index
    %8 = vector.load %arg4[%c0_5, %c0_6] : memref<1x512xf32, #tpu.memory_space<vmem>>, vector<1x512xf32>
    %9 = vector.broadcast %8 : vector<1x512xf32> to vector<16x512xf32>
    %10 = arith.addf %7, %9 : vector<16x512xf32>
    %cst_7 = arith.constant 0.000000e+00 : f32
    %11 = vector.broadcast %cst_7 : f32 to vector<16x512xf32>
    %12 = arith.maximumf %10, %11 : vector<16x512xf32>
    %13 = arith.truncf %12 : vector<16x512xf32> to vector<16x512xbf16>
    %c0_8 = arith.constant 0 : index
    %c0_9 = arith.constant 0 : index
    %14 = vector.load %arg10[%c0_8, %c0_9] : memref<16x32xf32, #tpu.memory_space<vmem>>, vector<16x32xf32>
    %c0_10 = arith.constant 0 : index
    %c0_11 = arith.constant 0 : index
    %15 = vector.load %arg5[%c0_10, %c0_11] : memref<512x32xbf16, #tpu.memory_space<vmem>>, vector<512x32xbf16>
    %cst_12 = arith.constant dense<0.000000e+00> : vector<16x32xf32>
    %16 = tpu.matmul %13, %15, %cst_12 {dimension_numbers = #tpu.dot_dimension_numbers<[1], [0], [0], [1], [0, 0, 1, 1], [], []>} : vector<16x512xbf16>, vector<512x32xbf16>, vector<16x32xf32> -> vector<16x32xf32>
    %17 = arith.addf %14, %16 : vector<16x32xf32>
    %c0_13 = arith.constant 0 : index
    %c0_14 = arith.constant 0 : index
    %18 = vector.load %arg10[%c0_13, %c0_14] : memref<16x32xf32, #tpu.memory_space<vmem>>, vector<16x32xf32>
    tpu.vector_store %arg10[%c0_13, %c0_14], %17 {strides = array<i32>} : memref<16x32xf32, #tpu.memory_space<vmem>>, vector<16x32xf32>,
    %c3_i32 = arith.constant 3 : i32
    %19 = arith.cmpi eq, %arg1, %c3_i32 : i32
    %20 = arith.extui %19 : i1 to i32
    %c0_i32_15 = arith.constant 0 : i32
    %21 = arith.cmpi ne, %20, %c0_i32_15 : i32
    scf.if %21 {
      %c0_16 = arith.constant 0 : index
      %c0_17 = arith.constant 0 : index
      %22 = vector.load %arg10[%c0_16, %c0_17] : memref<16x32xf32, #tpu.memory_space<vmem>>, vector<16x32xf32>
      %23 = arith.addf %4, %22 : vector<16x32xf32>
      %c0_18 = arith.constant 0 : index
      %c0_19 = arith.constant 0 : index
      %24 = vector.load %arg6[%c0_18, %c0_19] : memref<1x32xf32, #tpu.memory_space<vmem>>, vector<1x32xf32>
      %25 = vector.broadcast %24 : vector<1x32xf32> to vector<16x32xf32>
      %26 = arith.addf %23, %25 : vector<16x32xf32>
      %cst_20 = arith.constant dense<0.000000e+00> : vector<16xf32>
      %27 = vector.multi_reduction <add>, %26, %cst_20 [1] : vector<16x32xf32> to vector<16xf32>
      %28 = vector.shape_cast %27 : vector<16xf32> to vector<16x1xf32>
      %cst_21 = arith.constant 3.200000e+01 : f32
      %29 = vector.broadcast %cst_21 : f32 to vector<16x1xf32>
      %30 = arith.divf %28, %29 : vector<16x1xf32>
      %31 = vector.broadcast %30 : vector<16x1xf32> to vector<16x32xf32>
      %32 = arith.subf %26, %31 : vector<16x32xf32>
      %33 = vector.broadcast %30 : vector<16x1xf32> to vector<16x32xf32>
      %34 = arith.subf %26, %33 : vector<16x32xf32>
      %35 = arith.mulf %32, %34 : vector<16x32xf32>
      %cst_22 = arith.constant dense<0.000000e+00> : vector<16xf32>
      %36 = vector.multi_reduction <add>, %35, %cst_22 [1] : vector<16x32xf32> to vector<16xf32>
      %37 = vector.shape_cast %36 : vector<16xf32> to vector<16x1xf32>
      %cst_23 = arith.constant 3.200000e+01 : f32
      %38 = vector.broadcast %cst_23 : f32 to vector<16x1xf32>
      %39 = arith.divf %37, %38 : vector<16x1xf32>
      %40 = vector.broadcast %30 : vector<16x1xf32> to vector<16x32xf32>
      %41 = arith.subf %26, %40 : vector<16x32xf32>
      %cst_24 = arith.constant 9.99999974E-6 : f32
      %42 = vector.broadcast %cst_24 : f32 to vector<16x1xf32>
      %43 = arith.addf %39, %42 : vector<16x1xf32>
      %44 = math.rsqrt %43 : vector<16x1xf32>
      %45 = vector.broadcast %44 : vector<16x1xf32> to vector<16x32xf32>
      %46 = arith.mulf %41, %45 : vector<16x32xf32>
      %c0_25 = arith.constant 0 : index
      %c0_26 = arith.constant 0 : index
      %47 = vector.load %arg7[%c0_25, %c0_26] : memref<1x32xf32, #tpu.memory_space<vmem>>, vector<1x32xf32>
      %48 = vector.broadcast %47 : vector<1x32xf32> to vector<16x32xf32>
      %49 = arith.mulf %46, %48 : vector<16x32xf32>
      %c0_27 = arith.constant 0 : index
      %c0_28 = arith.constant 0 : index
      %50 = vector.load %arg8[%c0_27, %c0_28] : memref<1x32xf32, #tpu.memory_space<vmem>>, vector<1x32xf32>
      %51 = vector.broadcast %50 : vector<1x32xf32> to vector<16x32xf32>
      %52 = arith.addf %49, %51 : vector<16x32xf32>
      %53 = vector.shape_cast %52 : vector<16x32xf32> to vector<2x8x32xf32>
      %c0_29 = arith.constant 0 : index
      %c0_30 = arith.constant 0 : index
      %c0_31 = arith.constant 0 : index
      %54 = vector.load %arg9[%c0_29, %c0_30, %c0_31] : memref<2x8x32xf32, #tpu.memory_space<vmem>>, vector<2x8x32xf32>
      tpu.vector_store %arg9[%c0_29, %c0_30, %c0_31], %53 {strides = array<i32>} : memref<2x8x32xf32, #tpu.memory_space<vmem>>, vector<2x8x32xf32>,
    } else {
    }
    return
  }
  func.func @transform_0(%arg0: i32, %arg1: i32) -> (i32, i32, i32) {
    %c0_i32 = arith.constant 0 : i32
    %c0_i32_0 = arith.constant 0 : i32
    %c0_i32_1 = arith.constant 0 : i32
    return %arg0, %c0_i32, %c0_i32_0 : i32, i32, i32
  }
  func.func @transform_1(%arg0: i32, %arg1: i32) -> (i32, i32) {
    %c0_i32 = arith.constant 0 : i32
    %c0_i32_0 = arith.constant 0 : i32
    return %c0_i32, %arg1 : i32, i32
  }
  func.func @transform_2(%arg0: i32, %arg1: i32) -> (i32, i32) {
    %c0_i32 = arith.constant 0 : i32
    %c0_i32_0 = arith.constant 0 : i32
    return %c0_i32, %arg1 : i32, i32
  }
  func.func @transform_3(%arg0: i32, %arg1: i32) -> (i32, i32) {
    %c0_i32 = arith.constant 0 : i32
    %c0_i32_0 = arith.constant 0 : i32
    return %arg1, %c0_i32 : i32, i32
  }
  func.func @transform_4(%arg0: i32, %arg1: i32) -> (i32, i32) {
    %c0_i32 = arith.constant 0 : i32
    %c0_i32_0 = arith.constant 0 : i32
    %c0_i32_1 = arith.constant 0 : i32
    return %c0_i32, %c0_i32_0 : i32, i32
  }
  func.func @transform_5(%arg0: i32, %arg1: i32) -> (i32, i32) {
    %c0_i32 = arith.constant 0 : i32
    %c0_i32_0 = arith.constant 0 : i32
    %c0_i32_1 = arith.constant 0 : i32
    return %c0_i32, %c0_i32_0 : i32, i32
  }
  func.func @transform_6(%arg0: i32, %arg1: i32) -> (i32, i32) {
    %c0_i32 = arith.constant 0 : i32
    %c0_i32_0 = arith.constant 0 : i32
    %c0_i32_1 = arith.constant 0 : i32
    return %c0_i32, %c0_i32_0 : i32, i32
  }
  func.func @transform_7(%arg0: i32, %arg1: i32) -> (i32, i32, i32) {
    %c0_i32 = arith.constant 0 : i32
    %c0_i32_0 = arith.constant 0 : i32
    %c0_i32_1 = arith.constant 0 : i32
    return %arg0, %c0_i32, %c0_i32_0 : i32, i32, i32
  }
}

</mosaic_0001>

<bundles_post_ra>
// kernel: general_transformer_nope.5
= control target key start
LH: loop header
LB: loop body
LE: loop exit
PB: predicated region body
PF: predicated region fallthrough
CT: control target
= control target key end

     0   :  { %s1365_s24 = smov 0   ;;  %s1367_s25 = smov 0   ;;  %s1517_s0 = inlined_call_operand.vmem [shape: f32[2,8,32], index: 0, kind: input, shape index: {}]   ;;  %s1518_s1 = inlined_call_operand.vmem [shape: bf16[32,2048], index: 1, kind: input, shape index: {}]   ;;  %s1519_s2 = inlined_call_operand.vmem [shape: f32[1,2048], index: 2, kind: input, shape index: {}]   ;;  %s1520_s3 = inlined_call_operand.vmem [shape: bf16[2048,32], index: 3, kind: input, shape index: {}]   ;;  %s1521_s4 = inlined_call_operand.vmem [shape: f32[1,32], index: 4, kind: input, shape index: {}]   ;;  %s1522_s5 = inlined_call_operand.vmem [shape: f32[1,32], index: 5, kind: input, shape index: {}]   ;;  %s1523_s6 = inlined_call_operand.vmem [shape: f32[1,32], index: 6, kind: input, shape index: {}]   ;;  %s1524_s7 = inlined_call_operand.vmem [shape: f32[2,8,32], index: 7, kind: output, shape index: {}]  }
   0x1   :  { %s1369_s26 = smov 0   ;;  %s1371_s27 = smov 0  }
   0x2   :  { %s1373_s28 = smov 0  }
   0x3 LB: > { %s26_s29 = sadd.s32 1, %s1317_s27  ;;  %p69_p1 = scmp.ne.s32.totalorder %s1309_s25, %s1305_s24  ;;  %s1321_s28 = sphi %s1373_s28, %s17_s28   ;;  %s1317_s27 = sphi %s1371_s27, %s1528_s27   ;;  %s1313_s26 = sphi %s1369_s26, %s1527_s26   ;;  %s1309_s25 = sphi %s1367_s25, %s1526_s25   ;;  %s1305_s24 = sphi %s1365_s24, %s1525_s24  }
   0x4   : > { %p27_p0 = scmp.ge.s32.totalorder %s26_s29, 4  ;;  %p70_p2 = scmp.eq.s32.totalorder %s1321_s28, 0 }
   0x5   : > { %s62_s8 = sadd.s32 1, %s1309_s25  ;;  %p1088_p5 = scmp.ge.s32.totalorder %s1321_s28, 4 }
   0x6   : > { %s1530_s29 = smov (%p27_p0, %s26_s29), 0  ;;  %p71_p3 = por %p70_p2, %p69_p1 }
   0x7   : > { %s59_s30 = ssub.s32 %s1317_s27, %s1530_s29  ;;  %254 = sbr.rel (%p1088_p5) target bundleno = 22 (0x16), region = 32 }
   0x8   : > { %p60_p4 = scmp.eq.s32.totalorder %s59_s30, 0 }
   0xa   : > { %s1400_s9 = scalar_select %p60_p4, %s1309_s25, %s62_s8  }
   0xe   : > { %257 = sbr.rel (!%p71_p3) target bundleno = 22 (0x16), region = 36  ;;  %s259_s10 = sand.u32 (%p71_p3), 1, %s1309_s25  }
   0xf   : > { %s1148_s11 = sshll.u32 (%p71_p3), %s1317_s27, 4  ;;  %s1089_s12 = sshll.u32 (%p71_p3), %s259_s10, 6 }
  0x10   : > { %s264_s15 = scalar_lea.vmem (%p71_p3), %s1518_s1, %s1148_s11  ;;  %s261_s16 = scalar_lea.vmem (%p71_p3), [#allocation3], %s1089_s12 }
  0x11   : > { %v277_v0 = vld [vmem:[%s264_s15] sm:$0xff] (%p71_p3)  ;;  %v279_v1 = vld [vmem:[%s264_s15 + $0x8] sm:$0xff] (%p71_p3) }
  0x12   : > { %v281_v2 = vld [vmem:[%s264_s15 + $0x40] sm:$0xff] (%p71_p3)  ;;  %278 = vst [vmem:[%s261_s16] sm:$0xff] (%p71_p3), %v277_v0  ;;  %280 = vst [vmem:[%s261_s16 + $0x8] sm:$0xff] (%p71_p3), %v279_v1  ;;  %v283_v3 = vld [vmem:[%s264_s15 + $0x48] sm:$0xff] (%p71_p3) }
  0x13   : > { %282 = vst [vmem:[%s261_s16 + $0x10] sm:$0xff] (%p71_p3), %v281_v2  ;;  %v285_v4 = vld [vmem:[%s264_s15 + $0x80] sm:$0xff] (%p71_p3)  ;;  %v287_v5 = vld [vmem:[%s264_s15 + $0x88] sm:$0xff] (%p71_p3)  ;;  %284 = vst [vmem:[%s261_s16 + $0x18] sm:$0xff] (%p71_p3), %v283_v3 }
  0x14   : > { %286 = vst [vmem:[%s261_s16 + $0x20] sm:$0xff] (%p71_p3), %v285_v4  ;;  %288 = vst [vmem:[%s261_s16 + $0x28] sm:$0xff] (%p71_p3), %v287_v5  ;;  %v289_v6 = vld [vmem:[%s264_s15 + $0xc0] sm:$0xff] (%p71_p3)  ;;  %v291_v7 = vld [vmem:[%s264_s15 + $0xc8] sm:$0xff] (%p71_p3) }
  0x15   : > { %290 = vst [vmem:[%s261_s16 + $0x30] sm:$0xff] %v289_v6  ;;  %292 = vst [vmem:[%s261_s16 + $0x38] sm:$0xff] %v291_v7 }
  0x16 PF: > { %p1092_p6 = scmp.ge.s32.totalorder %s1321_s28, 1  ;;  %p314_p7 = scmp.lt.s32.totalorder %s1321_s28, 5 }
  0x18   : > { %p315_p8 = pnand %p1092_p6, %p314_p7 }
  0x19   : > { %s321_s17 = sand.u32 (!%p315_p8), 1, %s1305_s24   ;;  %s1094_s18 = sshll.u32 (!%p315_p8), %s1313_s26, 2 }
  0x1a   : > { %318 = sbr.rel (%p315_p8) target bundleno = 823 (0x337), region = 67  ;;  %s1093_s19 = sshll.u32 (!%p315_p8), %s321_s17, 6 }
  0x1b   : > { %p374_p9 = scmp.lt.s32.totalorder (!%p315_p8), %s1094_s18, 15  ;;  %s1095_s20 = sshll.u32 (!%p315_p8), %s1313_s26, 6 }
  0x1c   : > { %p379_p10 = scmp.lt.s32.totalorder (!%p315_p8), %s1095_s20, 255  ;;  %s323_s24 = scalar_lea.vmem (!%p315_p8), [#allocation3], %s1093_s19 }
  0x1d   : > { %p1097_p11 = scmp.ne.s32.totalorder (!%p315_p8), %s1313_s26, 0 }
  0x21   : > { %s1532_s18 = smov (!%p374_p9, %s1094_s18), 15  ;;  %s1534_s20 = smov (!%p379_p10, %s1095_s20), 255 }
  0x22   : > { %s376_s23 = scalar_lea.vmem %s1519_s2, %s1532_s18  ;;  %s1096_s30 = sshll.u32 %s1534_s20, 2  ;;  %vm395_vm0 = vcmask (!%p1097_p11), 261120   ;;  %v1323_v8 = vmov (!%p1097_p11), 0.0  }
  0x23   : > { %s1422_s11 = scalar_lea.vmem %s1520_s3, %s1096_s30  ;;  %394 = sbr.rel (%p1097_p11) target bundleno = 42 (0x2a), region = 75  ;;  %396 = vst.msk [vmem:[#allocation2] sm:$0xff] (!%p1097_p11), %vm395_vm0, %v1323_v8  ;;  %397 = vst.msk [vmem:[#allocation2 + $0x8] sm:$0xff] (!%p1097_p11), %vm395_vm0, %v1323_v8 }
  0x2a PF: > { %v1235_v9 = vld [vmem:[%s323_s24 + $0x4] ss:$16 sps:$4 sm:$0xff]   ;;  %v1237_v10 = vld [vmem:[%s323_s24 + $0xc] ss:$16 sps:$4 sm:$0xff]   ;;  %v1324_v11 = vmov 0   ;;  %vm471_vm1 = vcmask 261120   ;;  %v411_v53 = vlaneseq }
  0x2b   : > { %507 = vmatprep.mubr.bf16.mxu0 %v1324_v11  ;;  %550 = vmatprep.mubr.bf16.mxu1 %v1324_v11  ;;  %v1239_v12 = vld [vmem:[%s323_s24] ss:$16 sps:$4 sm:$0xff]   ;;  %v1240_v13 = vld [vmem:[%s323_s24 + $0x8] ss:$16 sps:$4 sm:$0xff]   ;;  %v1241_v14 = vld [vmem:[%s323_s24 + $0x24] ss:$16 sps:$4 sm:$0xff]  }
  0x2c   : > { %475 = vmatprep.subr.bf16.mxu0 %v1235_v9  ;;  %518 = vmatprep.subr.bf16.mxu1 %v1237_v10  ;;  %v1243_v15 = vld [vmem:[%s323_s24 + $0x2c] ss:$16 sps:$4 sm:$0xff]   ;;  %v1245_v16 = vld [vmem:[%s323_s24 + $0x20] ss:$16 sps:$4 sm:$0xff]   ;;  %v1246_v17 = vld [vmem:[%s323_s24 + $0x28] ss:$16 sps:$4 sm:$0xff]  }
  0x2d   : > { %476 = vmatpush1.bf16.msra.mxu0 %v1239_v12  ;;  %519 = vmatpush1.bf16.msra.mxu1 %v1240_v13  ;;  %v1428_v18 = vld [vmem:[%s1517_s0] sm:$0xff]  ;;  %v1433_v19 = vld [vmem:[%s1517_s0 + $0x8] sm:$0xff]  ;;  %v1255_v29 = vld [vmem:[%s1422_s11 + $0x50] sm:$0xff]   ;;  %v412_v54 = vshrl.u32 %v411_v53, 7  ;;  %p1140_p12 = scmp.ne.s32.totalorder %s1313_s26, 3 }
  0x2e   : > { %477 = vmatprep.subr.bf16.mxu0 %v1241_v14  ;;  %520 = vmatprep.subr.bf16.mxu1 %v1243_v15  ;;  %v1247_v20 = vld [vmem:[%s1422_s11 + $0x40] sm:$0xff]   ;;  %v400_v21 = vpack.c.bf16 %v1433_v19, %v1428_v18  ;;  %v1251_v25 = vld [vmem:[%s1422_s11 + $0x48] sm:$0xff]   ;;  %v1256_v30 = vld [vmem:[%s1422_s11 + $0xd0] sm:$0xff]  }
  0x2f   : > { %v1248_v22 = vld [vmem:[%s1422_s11 + $0xc0] sm:$0xff]   ;;  %v1252_v26 = vld [vmem:[%s1422_s11 + $0xc8] sm:$0xff]   ;;  %v1257_v31 = vld [vmem:[%s1422_s11 + $0x10] sm:$0xff]   ;;  %v413_v55 = vsub.s32 0, %v412_v54  ;;  %v421_v56 = vsub.s32 2, %v412_v54  ;;  %v417_v58 = vsub.s32 1, %v412_v54 }
  0x30   : > { %v1249_v23 = vld [vmem:[%s1422_s11] sm:$0xff]   ;;  %v1253_v27 = vld [vmem:[%s1422_s11 + $0x8] sm:$0xff]   ;;  %v1258_v32 = vld [vmem:[%s1422_s11 + $0x90] sm:$0xff]   ;;  %v425_v59 = vsub.s32 3, %v412_v54 }
  0x31   : > { %478 = vmatpush1.bf16.msra.mxu0 %v1245_v16  ;;  %521 = vmatpush1.bf16.msra.mxu1 %v1246_v17  ;;  %v1250_v24 = vld [vmem:[%s1422_s11 + $0x80] sm:$0xff]   ;;  %v1254_v28 = vld [vmem:[%s1422_s11 + $0x88] sm:$0xff]   ;;  %v1259_v33 = vld [vmem:[%s1422_s11 + $0x58] sm:$0xff]  }
  0x32   : > { %1149 = vmatprep.subr.bf16.mxu0 %v1247_v20  ;;  %1171 = vmatprep.subr.bf16.mxu1 %v1248_v22  ;;  %v1260_v34 = vld [vmem:[%s1422_s11 + $0xd8] sm:$0xff]   ;;  %v1263_v37 = vld [vmem:[%s1422_s11 + $0x60] sm:$0xff]   ;;  %v1267_v41 = vld [vmem:[%s1422_s11 + $0x68] sm:$0xff]  }
  0x33   : > { %v1261_v35 = vld [vmem:[%s1422_s11 + $0x18] sm:$0xff]   ;;  %v1264_v38 = vld [vmem:[%s1422_s11 + $0xe0] sm:$0xff]   ;;  %v1268_v42 = vld [vmem:[%s1422_s11 + $0xe8] sm:$0xff]  }
  0x34   : > { %1106 = vmatmul.mubr.msk.bf16.vlgmr.msra.gmra.mrb[0].mxu0 %vm471_vm1, %v400_v21  ;;  %1107 = vmatmul.mubr.msk.bf16.vlgmr.msra.gmra.mrb[0].mxu1 %vm471_vm1, %v400_v21  ;;  %v1262_v36 = vld [vmem:[%s1422_s11 + $0x98] sm:$0xff]   ;;  %v1265_v39 = vld [vmem:[%s1422_s11 + $0x20] sm:$0xff]   ;;  %v1269_v43 = vld [vmem:[%s1422_s11 + $0x28] sm:$0xff]  }
  0x35   : > { %1150 = vmatpush3.bf16.msra.mxu0 %v1249_v23  ;;  %1172 = vmatpush3.bf16.msra.mxu1 %v1250_v24  ;;  %v1266_v40 = vld [vmem:[%s1422_s11 + $0xa0] sm:$0xff]   ;;  %v1270_v44 = vld [vmem:[%s1422_s11 + $0xa8] sm:$0xff]   ;;  %v1271_v45 = vld [vmem:[%s1422_s11 + $0x70] sm:$0xff]  }
  0x36   : > { %1151 = vmatprep.subr.bf16.mxu0 %v1251_v25  ;;  %1173 = vmatprep.subr.bf16.mxu1 %v1252_v26  ;;  %v1272_v46 = vld [vmem:[%s1422_s11 + $0xf0] sm:$0xff]   ;;  %v1275_v49 = vld [vmem:[%s1422_s11 + $0x78] sm:$0xff]   ;;  %v409_v57 = vld [vmem:[%s376_s23] sm:$0xf] }
  0x37   : > { %v1273_v47 = vld [vmem:[%s1422_s11 + $0x30] sm:$0xff]   ;;  %v1276_v50 = vld [vmem:[%s1422_s11 + $0xf8] sm:$0xff]   ;;  %v414_v60 = vrot.slane %v409_v57, %v413_v55  ;;  %v422_v61 = vrot.slane %v409_v57, %v421_v56  ;;  %v418_v62 = vrot.slane %v409_v57, %v417_v58  ;;  %v426_v63 = vrot.slane %v409_v57, %v425_v59 }
  0x38   : > { %v1274_v48 = vld [vmem:[%s1422_s11 + $0xb0] sm:$0xff]   ;;  %v1277_v51 = vld [vmem:[%s1422_s11 + $0x38] sm:$0xff]  }
  0x39   : > { %1152 = vmatpush3.bf16.msra.mxu0 %v1253_v27  ;;  %1174 = vmatpush3.bf16.msra.mxu1 %v1254_v28  ;;  %v1278_v52 = vld [vmem:[%s1422_s11 + $0xb8] sm:$0xff]  }
  0x3a   : > { %1153 = vmatprep.subr.bf16.mxu0 %v1255_v29  ;;  %1175 = vmatprep.subr.bf16.mxu1 %v1256_v30 }
  0x3d   : > { %1154 = vmatpush3.bf16.msra.mxu0 %v1257_v31  ;;  %1176 = vmatpush3.bf16.msra.mxu1 %v1258_v32 }
  0x3e   : > { %1155 = vmatprep.subr.bf16.mxu0 %v1259_v33  ;;  %1177 = vmatprep.subr.bf16.mxu1 %v1260_v34 }
  0x41   : > { %1156 = vmatpush3.bf16.msra.mxu0 %v1261_v35  ;;  %1178 = vmatpush3.bf16.msra.mxu1 %v1262_v36 }
  0x42   : > { %1157 = vmatprep.subr.bf16.mxu0 %v1263_v37  ;;  %1179 = vmatprep.subr.bf16.mxu1 %v1264_v38  ;;  %v573_v38 = vld [vmem:[#allocation2] sm:$0xff] }
  0x45   : > { %1158 = vmatpush3.bf16.msra.mxu0 %v1265_v39  ;;  %1180 = vmatpush3.bf16.msra.mxu1 %v1266_v40 }
  0x46   : > { %1159 = vmatprep.subr.bf16.mxu0 %v1267_v41  ;;  %1181 = vmatprep.subr.bf16.mxu1 %v1268_v42 }
  0x49   : > { %1160 = vmatpush3.bf16.msra.mxu0 %v1269_v43  ;;  %1182 = vmatpush3.bf16.msra.mxu1 %v1270_v44  ;;  %v574_v44 = vld [vmem:[#allocation2 + $0x8] sm:$0xff] }
  0x4a   : > { %1161 = vmatprep.subr.bf16.mxu0 %v1271_v45  ;;  %1183 = vmatprep.subr.bf16.mxu1 %v1272_v46 }
  0x4d   : > { %1162 = vmatpush3.bf16.msra.mxu0 %v1273_v47  ;;  %1184 = vmatpush3.bf16.msra.mxu1 %v1274_v48 }
  0x4e   : > { %1163 = vmatprep.subr.bf16.mxu0 %v1275_v49  ;;  %1185 = vmatprep.subr.bf16.mxu1 %v1276_v50  ;;  %v1141_v49 = vld [vmem:[%s1521_s4] ss:$0 sm:$0xff] (!%p1140_p12) }
  0x51   : > { %1164 = vmatpush3.bf16.msra.mxu0 %v1277_v51  ;;  %1186 = vmatpush3.bf16.msra.mxu1 %v1278_v52 }
 0x107   : > { %v509_v0 = vpop.f32.mrb[0].mxu0  ;;  %v552_v1 = vpop.f32.mrb[0].mxu1 }
 0x108   : > { %v510_v2 = vadd.f32 %v509_v0, %v414_v60  ;;  %v553_v3 = vadd.f32 %v552_v1, %v422_v61  ;;  %v511_v4 = vpop.f32.mrb[1].mxu0  ;;  %v554_v5 = vpop.f32.mrb[1].mxu1 }
 0x109   : > { %v512_v6 = vadd.f32 %v511_v4, %v418_v62  ;;  %v555_v7 = vadd.f32 %v554_v5, %v426_v63  ;;  %v513_v8 = vpop.f32.mrb[2].mxu0  ;;  %v556_v9 = vpop.f32.mrb[2].mxu1 }
 0x10a   : > { %v514_v10 = vadd.f32 %v513_v8, %v414_v60  ;;  %v557_v11 = vadd.f32 %v556_v9, %v422_v61  ;;  %v515_v12 = vpop.f32.mrb[3].mxu0  ;;  %v558_v13 = vpop.f32.mrb[3].mxu1  ;;  %v561_v16 = vmax.f32 %v510_v2, 0.0  ;;  %v563_v17 = vmax.f32 %v553_v3, 0.0  ;;  %v1142_v8 = vld [vmem:[%s1522_s5] ss:$0 sm:$0xff] (!%p1140_p12) }
 0x10b   : > { %v516_v14 = vadd.f32 %v515_v12, %v418_v62  ;;  %v559_v15 = vadd.f32 %v558_v13, %v426_v63  ;;  %v562_v22 = vmax.f32 %v512_v6, 0.0  ;;  %v564_v23 = vmax.f32 %v555_v7, 0.0 }
 0x10c   : > { %v565_v20 = vmax.f32 %v514_v10, 0.0  ;;  %v567_v21 = vmax.f32 %v557_v11, 0.0  ;;  %v1143_v10 = vld [vmem:[%s1523_s6] ss:$0 sm:$0xff] (!%p1140_p12) }
 0x10d   : > { %v566_v24 = vmax.f32 %v516_v14, 0.0  ;;  %v568_v25 = vmax.f32 %v559_v15, 0.0 }
 0x10e   : > { %v569_v26 = vpack.c.bf16 %v565_v20, %v561_v16  ;;  %v571_v27 = vpack.c.bf16 %v567_v21, %v563_v17 }
 0x10f   : > { %v570_v28 = vpack.c.bf16 %v566_v24, %v562_v22  ;;  %v572_v29 = vpack.c.bf16 %v568_v25, %v564_v23 }
 0x111   : > { %863 = vmatprep.mubr.bf16.mxu0 %v570_v28  ;;  %904 = vmatprep.mubr.bf16.mxu1 %v572_v29 }
 0x112   : > { %864 = vmatmul.mubr.bf16.vlgmr.msra.gmra.mrb[4].mxu0 %v569_v26  ;;  %905 = vmatmul.mubr.bf16.vlgmr.msra.gmra.mrb[4].mxu1 %v571_v27 }
 0x1e5   : > { %v1165_v30 = vpop.f32.mrb[4].mxu0  ;;  %v1187_v31 = vpop.f32.mrb[4].mxu1 }
 0x1e6   : > { %v1166_v32 = vpop.f32.mrb[5].mxu0  ;;  %v1188_v33 = vpop.f32.mrb[5].mxu1 }
 0x1e7   : > { %v1167_v34 = vadd.f32 %v1166_v32, %v1165_v30  ;;  %v1189_v35 = vadd.f32 %v1188_v33, %v1187_v31  ;;  %v1168_v36 = vpop.f32.mrb[6].mxu0  ;;  %v1190_v37 = vpop.f32.mrb[6].mxu1 }
 0x1e8   : > { %v1169_v39 = vpop.f32.mrb[7].mxu0  ;;  %v1191_v40 = vpop.f32.mrb[7].mxu1 }
 0x1e9   : > { %v907_v41 = vadd.f32 %v1189_v35, %v1167_v34  ;;  %v1170_v42 = vadd.f32 %v1169_v39, %v1168_v36  ;;  %v1192_v43 = vadd.f32 %v1191_v40, %v1190_v37  ;;  %920 = sbr.rel (%p1140_p12) target bundleno = 823 (0x337), region = 79 }
 0x1eb   : > { %v913_v45 = vadd.f32 %v907_v41, %v573_v38  ;;  %v910_v46 = vadd.f32 %v1192_v43, %v1170_v42 }
 0x1ed   : > { %915 = vst.msk [vmem:[#allocation2] sm:$0xff] %vm471_vm1, %v913_v45  ;;  %v914_v47 = vadd.f32 %v910_v46, %v574_v44 }
 0x1ef   : > { %916 = vst.msk [vmem:[#allocation2 + $0x8] sm:$0xff] %vm471_vm1, %v914_v47 }
 0x1f4   : > { %v921_v48 = vld [vmem:[#allocation2] sm:$0xff] }
 0x1f5   : > { %v923_v51 = vadd.f32 %v921_v48, %v1428_v18 }
 0x1f6   : > { %v922_v50 = vld [vmem:[#allocation2 + $0x8] sm:$0xff] }
 0x1f7   : > { %v924_v52 = vadd.f32 %v922_v50, %v1433_v19  ;;  %v932_v53 = vadd.f32 %v1141_v49, %v923_v51 }
 0x1f9   : > { %v933_v54 = vadd.f32 %v1141_v49, %v924_v52  ;;  %v934_v55 = vsel %vm471_vm1, %v932_v53, 0.0 }
 0x1fa   : > { %935 = vadd.xlane.f32.xlu0 %v934_v55 }
 0x1fb   : > { %v937_v56 = vsel %vm471_vm1, %v933_v54, 0.0 }
 0x1fe   : > { %938 = vadd.xlane.f32.xlu0 %v937_v56 }
 0x287   : > { %v936_v57 = vpop.xlane.xlu0 %935 }
 0x288   : > { %v941_v58 = vmul.f32 0.03125, %v936_v57 }
 0x28a   : > { %v943_v59 = vsub.f32 %v932_v53, %v941_v58 }
 0x28b   : > { %v939_v60 = vpop.xlane.xlu0 %938 }
 0x28c   : > { %v942_v61 = vmul.f32 0.03125, %v939_v60  ;;  %v945_v62 = vmul.f32 %v943_v59, %v943_v59 }
 0x28e   : > { %v944_v63 = vsub.f32 %v933_v54, %v942_v61  ;;  %v947_v0 = vsel %vm471_vm1, %v945_v62, 0.0 }
 0x28f   : > { %948 = vadd.xlane.f32.xlu1 %v947_v0 }
 0x290   : > { %v946_v18 = vmul.f32 %v944_v63, %v944_v63 }
 0x292   : > { %v950_v19 = vsel %vm471_vm1, %v946_v18, 0.0 }
 0x293   : > { %951 = vadd.xlane.f32.xlu1 %v950_v19 }
 0x31c   : > { %v949_v1 = vpop.xlane.xlu1 %948 }
 0x31d   : > { %v953_v2 = vmul.f32 0.03125, %v949_v1 }
 0x31f   : > { %v955_v3 = vadd.f32 1e-05, %v953_v2 }
 0x320   : > { %v952_v4 = vpop.xlane.xlu1 %951 }
 0x321   : > { %1279 = vrsqrt.f32 %v955_v3  ;;  %v954_v5 = vmul.f32 0.03125, %v952_v4 }
 0x323   : > { %v956_v6 = vadd.f32 1e-05, %v954_v5 }
 0x325   : > { %1281 = vrsqrt.f32 %v956_v6 }
 0x32b   : > { %v1280_v7 = vpop.eup %1279 }
 0x32c   : > { %v959_v9 = vmul.f32 %v1280_v7, %v943_v59 }
 0x32e   : > { %v968_v11 = vmul.f32 %v1142_v8, %v959_v9 }
 0x32f   : > { %v1282_v12 = vpop.eup %1281 }
 0x330   : > { %v977_v13 = vadd.f32 %v1143_v10, %v968_v11  ;;  %v960_v14 = vmul.f32 %v1282_v12, %v944_v63 }
 0x332   : > { %979 = vst.msk [vmem:[%s1524_s7] sm:$0xff] %vm471_vm1, %v977_v13  ;;  %v969_v15 = vmul.f32 %v1142_v8, %v960_v14 }
 0x334   : > { %v978_v16 = vadd.f32 %v1143_v10, %v969_v15 }
 0x336   : > { %980 = vst.msk [vmem:[%s1524_s7 + $0x8] sm:$0xff] %vm471_vm1, %v978_v16 }
 0x337 PF: > { %s17_s28 = sadd.s32 1, %s1321_s28   ;;  %s1525_s24 = smov %s1309_s25 }
 0x338   : > { %p14_p13 = scmp.ge.s32.totalorder %s17_s28, 6   ;;  %s1526_s25 = smov %s1400_s9 }
 0x339   : > { %s1527_s26 = smov %s1317_s27  ;;  %s1528_s27 = smov %s1530_s29 }
 0x33a   :  { %16 = sbr.rel (!%p14_p13) target bundleno = 3 (0x3), region = 123 }

// kernel: general_transformer_nope.6
= control target key start
LH: loop header
LB: loop body
LE: loop exit
PB: predicated region body
PF: predicated region fallthrough
CT: control target
= control target key end

     0   :  { %v1515_v0 = vmov 0.0   ;;  %vm1516_vm0 = vmmov 0   ;;  %vm53_vm1 = vcmask 261120   ;;  %vm113_vm2 = vcmask 64512   ;;  %s1519_s10 = smov 88   ;;  %s1520_s11 = smov 120   ;;  %s1796_s1 = inlined_call_operand.vmem [shape: bf16[32,96], index: 1, kind: input, shape index: {}]   ;;  %s1797_s0 = inlined_call_operand.vmem [shape: f32[2,8,32], index: 0, kind: input, shape index: {}]   ;;  %s1798_s2 = inlined_call_operand.vmem [shape: f32[1,96], index: 2, kind: input, shape index: {}]   ;;  %s1799_s3 = inlined_call_operand.vmem [shape: bf16[4,8,32], index: 3, kind: input, shape index: {}]   ;;  %s1800_s4 = inlined_call_operand.vmem [shape: f32[1,32], index: 4, kind: input, shape index: {}]   ;;  %s1801_s5 = inlined_call_operand.vmem [shape: f32[1,32], index: 5, kind: input, shape index: {}]   ;;  %s1802_s6 = inlined_call_operand.vmem [shape: f32[1,32], index: 6, kind: input, shape index: {}]   ;;  %s1803_s7 = inlined_call_operand.vmem [shape: f32[2,8,32], index: 7, kind: output, shape index: {}]  }
   0x1   :  { %1336 = vmatprep.subr.bf16.mxu0 %v1515_v0  ;;  %v1477_v1 = vld [vmem:[%s1796_s1] sm:$0xff]   ;;  %1340 = vmatprep.mubr.msk.bf16.mxu0 %vm1516_vm0, %v1515_v0  ;;  %v1478_v2 = vld [vmem:[%s1796_s1 + $0x8] sm:$0xff]   ;;  %vm238_vm3 = vcmask 1043456   ;;  %s1521_s12 = smov 56   ;;  %s1522_s13 = smov 112  }
   0x2   :  { %1344 = vmatprep.subr.bf16.mxu1 %v1515_v0  ;;  %1346 = vmatprep.mubr.msk.bf16.mxu1 %vm1516_vm0, %v1515_v0  ;;  %v1583_v3 = vld [vmem:[%s1797_s0] sm:$0xff]  ;;  %v1588_v4 = vld [vmem:[%s1797_s0 + $0x8] sm:$0xff]  ;;  %s1517_s0 = smov 96   ;;  %s1523_s14 = smov 80  }
   0x3   :  { %1337 = vmatpush3.bf16.msra.mxu0 %v1477_v1  ;;  %v29_v5 = vpack.c.bf16 %v1588_v4, %v1583_v3  ;;  %v1255_v6 = vld [vmem:[%s1798_s2] ss:$0 sm:$0xff]  ;;  %s1518_s2 = smov 64   ;;  %s1524_s19 = smov 48  }
   0x4   :  { %1338 = vmatprep.subr.bf16.mxu0 %v1515_v0  ;;  %s1525_s20 = smov 72   ;;  %s1526_s21 = smov 104  }
   0x5   :  { %s1527_s24 = smov 40  }
   0x7   :  { %1339 = vmatpush3.bf16.msra.mxu0 %v1478_v2 }
   0x8   :  { %1350 = vmatprep.subr.bf16.mxu0 %v1515_v0 }
   0xa   :  { %1341 = vmatmul.mubr.msk.bf16.vlgmr.msra.gmra.mrb[0].mxu0 %vm53_vm1, %v29_v5 }
   0xb   :  { %1352 = vmatprep.mubr.msk.bf16.mxu0 %vm1516_vm0, %v1515_v0 }
  0xdd   :  { %v91_v7 = vpop.f32.mrb[0].mxu0 }
  0xde   :  { %v92_v8 = vadd.f32 %v1255_v6, %v91_v7  ;;  %v1342_v9 = vpop.f32.mrb[1].mxu0 }
  0xdf   :  { %v94_v10 = vpop.f32.mrb[2].mxu0 }
  0xe0   :  { %v1600_v11 = vpack.c.bf16 %v92_v8, %v92_v8  ;;  %v95_v12 = vadd.f32 %v1255_v6, %v94_v10  ;;  %v1343_v13 = vpop.f32.mrb[3].mxu0  ;;  %v98_v17 = vmul.f32 0.35355338, %v92_v8 }
  0xe2   :  { %111 = vrot.lane.b32.xlu0 %v1600_v11, %s1517_s0  ;;  %v1603_v14 = vpack.c.bf16 %v95_v12, %v95_v12  ;;  %v1609_v20 = vpack.c.bf16 %v98_v17, %v98_v17  ;;  %v99_v21 = vmul.f32 0.35355338, %v95_v12 }
  0xe4   :  { %v1616_v22 = vpack.c.bf16 %v99_v21, %v99_v21 }
  0xe6   :  { %161 = vrot.lane.b32.xlu0 %v1603_v14, %s1517_s0 }
 0x154   :  { %v112_v15 = vpop.permute.xlu0 %111 }
 0x155   :  { %v118_v16 = vsel %vm113_vm2, %v112_v15, 0 }
 0x156   :  { %1345 = vmatpush3.bf16.xpose.msra.mxu1 %v118_v16 }
 0x157   :  { %1356 = vmatprep.subr.bf16.mxu1 %v1515_v0 }
 0x158   :  { %v162_v18 = vpop.permute.xlu0 %161 }
 0x159   :  { %v167_v19 = vsel %vm113_vm2, %v162_v18, 0 }
 0x15a   :  { %1351 = vmatpush3.bf16.xpose.msra.mxu0 %v167_v19 }
 0x15b   :  { %1362 = vmatprep.subr.bf16.mxu0 %v1515_v0 }
 0x15d   :  { %1347 = vmatmul.mubr.msk.bf16.vlgmr.msra.gmra.mrb[0].mxu1 %vm113_vm2, %v1609_v20 }
 0x15e   :  { %1358 = vmatprep.mubr.msk.bf16.mxu1 %vm1516_vm0, %v1515_v0 }
 0x161   :  { %1353 = vmatmul.mubr.msk.bf16.vlgmr.msra.gmra.mrb[4].mxu0 %vm113_vm2, %v1616_v22 }
 0x162   :  { %1364 = vmatprep.mubr.msk.bf16.mxu0 %vm1516_vm0, %v1515_v0 }
 0x230   :  { %v154_v23 = vpop.f32.mrb[0].mxu1 }
 0x231   :  { %v1348_v24 = vpop.f32.mrb[1].mxu1  ;;  %v209_v25 = vsel %vm113_vm2, %v154_v23, -inf }
 0x232   :  { %210 = vmax.xlane.f32.xlu1 %v209_v25  ;;  %v157_v26 = vpop.f32.mrb[2].mxu1 }
 0x233   :  { %v1349_v27 = vpop.f32.mrb[3].mxu1 }
 0x234   :  { %v203_v28 = vpop.f32.mrb[4].mxu0 }
 0x235   :  { %v1354_v29 = vpop.f32.mrb[5].mxu0  ;;  %v212_v30 = vsel %vm113_vm2, %v203_v28, -inf }
 0x236   :  { %213 = vmax.xlane.f32.xlu1 %v212_v30  ;;  %v206_v31 = vpop.f32.mrb[6].mxu0 }
 0x237   :  { %v1355_v32 = vpop.f32.mrb[7].mxu0 }
 0x247   :  { %233 = vrot.lane.b32.xlu1 %v1600_v11, %s1518_s2 }
 0x24b   :  { %282 = vrot.lane.b32.xlu1 %v1603_v14, %s1518_s2 }
 0x24f   :  { %334 = vrot.lane.b32.xlu1 %v1600_v11, %s1519_s10 }
 0x2bf   :  { %v211_v33 = vpop.xlane.xlu1 %210 }
 0x2c0   :  { %v215_v34 = vsub.f32 %v154_v23, %v211_v33 }
 0x2c2   :  { %v217_v35 = vmul.f32 1.442695, %v215_v34 }
 0x2c3   :  { %v214_v36 = vpop.xlane.xlu1 %213 }
 0x2c4   :  { %1479 = vpow2.f32 %v217_v35  ;;  %v216_v37 = vsub.f32 %v203_v28, %v214_v36 }
 0x2c6   :  { %v219_v38 = vmul.f32 1.442695, %v216_v37 }
 0x2c7   :  { %v234_v39 = vpop.permute.xlu1 %233 }
 0x2c8   :  { %1481 = vpow2.f32 %v219_v38  ;;  %v240_v40 = vsel %vm238_vm3, %v234_v39, 0 }
 0x2c9   :  { %1357 = vmatpush3.bf16.msra.mxu1 %v240_v40  ;;  %v1271_v40 = vld [vmem:[%s1799_s3 + $0x4] sm:$0xf] }
 0x2ca   :  { %1368 = vmatprep.subr.bf16.mxu1 %v1515_v0 }
 0x2cb   :  { %v283_v41 = vpop.permute.xlu1 %282 }
 0x2cc   :  { %v288_v42 = vsel %vm238_vm3, %v283_v41, 0 }
 0x2cd   :  { %1363 = vmatpush3.bf16.msra.mxu0 %v288_v42 }
 0x2ce   :  { %v1480_v43 = vpop.eup %1479  ;;  %1374 = vmatprep.subr.bf16.mxu0 %v1515_v0 }
 0x2cf   :  { %v221_v44 = vsel %vm113_vm2, %v1480_v43, 0.0  ;;  %v335_v47 = vpop.permute.xlu1 %334 }
 0x2d0   :  { %222 = vadd.xlane.f32.xlu0 %v221_v44  ;;  %v340_v54 = vsel %vm113_vm2, %v335_v47, 0 }
 0x2d2   :  { %v1482_v45 = vpop.eup %1481 }
 0x2d3   :  { %v224_v46 = vsel %vm113_vm2, %v1482_v45, 0.0 }
 0x2d4   :  { %225 = vadd.xlane.f32.xlu1 %v224_v46 }
 0x2e5   :  { %384 = vrot.lane.b32.xlu1 %v1603_v14, %s1519_s10 }
 0x2e6   :  { %332 = vrot.lane.b32.xlu0 %v1609_v20, %s1520_s11 }
 0x2e9   :  { %382 = vrot.lane.b32.xlu1 %v1616_v22, %s1520_s11 }
 0x35d   :  { %v223_v48 = vpop.xlane.xlu0 %222 }
 0x35e   :  { %1483 = vrcp.f32 %v223_v48 }
 0x361   :  { %v226_v49 = vpop.xlane.xlu1 %225  ;;  %v333_v59 = vpop.permute.xlu0 %332 }
 0x362   :  { %1485 = vrcp.f32 %v226_v49 }
 0x365   :  { %v385_v56 = vpop.permute.xlu1 %384 }
 0x366   :  { %v390_v58 = vsel %vm113_vm2, %v385_v56, 0 }
 0x368   :  { %v1484_v50 = vpop.eup %1483 }
 0x369   :  { %v229_v51 = vmul.f32 %v1484_v50, %v1480_v43  ;;  %v383_v60 = vpop.permute.xlu1 %382  ;;  %v559_v43 = vsel %vm238_vm3, %v1271_v40, 0 }
 0x36b   :  { %v231_v52 = vpack.c.bf16 %v229_v51, %v229_v51 }
 0x36c   :  { %v1486_v53 = vpop.eup %1485 }
 0x36d   :  { %v230_v55 = vmul.f32 %v1486_v53, %v1482_v45  ;;  %1359 = vmatmul.mubr.msk.bf16.vlgmr.msra.gmra.mrb[4].mxu1 %vm113_vm2, %v231_v52  ;;  %v331_v45 = vld [vmem:[%s1799_s3] sm:$0xf] }
 0x36e   :  { %1369 = vmatpush3.bf16.xpose.msra.mxu1 %v340_v54  ;;  %1370 = vmatprep.mubr.msk.bf16.mxu1 %vm1516_vm0, %v1515_v0  ;;  %v606_v48 = vsel %vm238_vm3, %v331_v45, 0 }
 0x36f   :  { %v232_v57 = vpack.c.bf16 %v230_v55, %v230_v55  ;;  %1380 = vmatprep.subr.bf16.mxu1 %v1515_v0 }
 0x371   :  { %1365 = vmatmul.mubr.msk.bf16.vlgmr.msra.gmra.mrb[8].mxu0 %vm113_vm2, %v232_v57 }
 0x372   :  { %1375 = vmatpush3.bf16.xpose.msra.mxu0 %v390_v58  ;;  %1376 = vmatprep.mubr.msk.bf16.mxu0 %vm1516_vm0, %v1515_v0 }
 0x373   :  { %1386 = vmatprep.subr.bf16.mxu0 %v1515_v0 }
 0x375   :  { %1371 = vmatmul.mubr.msk.bf16.vlgmr.msra.gmra.mrb[8].mxu1 %vm113_vm2, %v333_v59 }
 0x376   :  { %1382 = vmatprep.mubr.msk.bf16.mxu1 %vm1516_vm0, %v1515_v0 }
 0x379   :  { %1377 = vmatmul.mubr.msk.bf16.vlgmr.msra.gmra.mrb[12].mxu0 %vm113_vm2, %v383_v60 }
 0x37a   :  { %1388 = vmatprep.mubr.msk.bf16.mxu0 %vm1516_vm0, %v1515_v0 }
 0x440   :  { %v1652_v61 = vpop.f32.mrb[4].mxu1 }
 0x441   :  { %v1360_v62 = vpop.f32.mrb[5].mxu1 }
 0x442   :  { %v279_v63 = vpop.f32.mrb[6].mxu1 }
 0x443   :  { %v1361_v1 = vpop.f32.mrb[7].mxu1 }
 0x444   :  { %v1654_v2 = vpop.f32.mrb[8].mxu0 }
 0x445   :  { %v330_v5 = vpack.c.bf16 %v1654_v2, %v1652_v61  ;;  %v1366_v6 = vpop.f32.mrb[9].mxu0 }
 0x446   :  { %v327_v7 = vpop.f32.mrb[10].mxu0 }
 0x447   :  { %v1367_v8 = vpop.f32.mrb[11].mxu0 }
 0x448   :  { %v376_v9 = vpop.f32.mrb[8].mxu1 }
 0x449   :  { %v1372_v10 = vpop.f32.mrb[9].mxu1  ;;  %v432_v12 = vsel %vm113_vm2, %v376_v9, -inf }
 0x44a   :  { %433 = vmax.xlane.f32.xlu1 %v432_v12  ;;  %v379_v13 = vpop.f32.mrb[10].mxu1 }
 0x44b   :  { %v1373_v15 = vpop.f32.mrb[11].mxu1 }
 0x44c   :  { %v426_v16 = vpop.f32.mrb[12].mxu0 }
 0x44d   :  { %v1378_v17 = vpop.f32.mrb[13].mxu0  ;;  %v435_v18 = vsel %vm113_vm2, %v426_v16, -inf }
 0x44e   :  { %436 = vmax.xlane.f32.xlu0 %v435_v18  ;;  %v429_v19 = vpop.f32.mrb[14].mxu0 }
 0x44f   :  { %v1379_v21 = vpop.f32.mrb[15].mxu0 }
 0x464   :  { %504 = vrot.lane.b32.xlu0 %v1603_v14, %s1521_s12 }
 0x468   :  { %649 = vrot.lane.b32.xlu0 %v1609_v20, %s1522_s13 }
 0x4d7   :  { %v434_v23 = vpop.xlane.xlu1 %433 }
 0x4d8   :  { %v438_v24 = vsub.f32 %v376_v9, %v434_v23 }
 0x4da   :  { %v440_v25 = vmul.f32 1.442695, %v438_v24 }
 0x4db   :  { %v437_v26 = vpop.xlane.xlu0 %436 }
 0x4dc   :  { %1487 = vpow2.f32 %v440_v25  ;;  %v439_v27 = vsub.f32 %v426_v16, %v437_v26 }
 0x4de   :  { %v442_v28 = vmul.f32 1.442695, %v439_v27 }
 0x4df   :  { %v505_v29 = vpop.permute.xlu0 %504 }
 0x4e0   :  { %1489 = vpow2.f32 %v442_v28  ;;  %v510_v30 = vsel %vm238_vm3, %v505_v29, 0 }
 0x4e1   :  { %1387 = vmatpush3.bf16.msra.mxu0 %v510_v30 }
 0x4e2   :  { %1398 = vmatprep.subr.bf16.mxu0 %v1515_v0 }
 0x4e3   :  { %v650_v2 = vpop.permute.xlu0 %649 }
 0x4e6   :  { %v1488_v31 = vpop.eup %1487 }
 0x4e7   :  { %v444_v32 = vsel %vm113_vm2, %v1488_v31, 0.0 }
 0x4e8   :  { %445 = vadd.xlane.f32.xlu1 %v444_v32 }
 0x4ea   :  { %v1490_v33 = vpop.eup %1489 }
 0x4eb   :  { %v447_v34 = vsel %vm113_vm2, %v1490_v33, 0.0 }
 0x4ec   :  { %448 = vadd.xlane.f32.xlu1 %v447_v34 }
 0x4fd   :  { %456 = vrot.lane.b32.xlu1 %v1600_v11, %s1521_s12 }
 0x501   :  { %651 = vrot.lane.b32.xlu1 %v1600_v11, %s1523_s14 }
 0x505   :  { %701 = vrot.lane.b32.xlu1 %v1603_v14, %s1523_s14 }
 0x509   :  { %699 = vrot.lane.b32.xlu1 %v1616_v22, %s1522_s13 }
 0x575   :  { %v446_v35 = vpop.xlane.xlu1 %445 }
 0x576   :  { %1491 = vrcp.f32 %v446_v35 }
 0x579   :  { %v449_v36 = vpop.xlane.xlu1 %448 }
 0x57a   :  { %1493 = vrcp.f32 %v449_v36 }
 0x57d   :  { %v457_v37 = vpop.permute.xlu1 %456 }
 0x57e   :  { %v462_v38 = vsel %vm238_vm3, %v457_v37, 0 }
 0x57f   :  { %1381 = vmatpush3.bf16.msra.mxu1 %v462_v38 }
 0x580   :  { %v1492_v39 = vpop.eup %1491  ;;  %1392 = vmatprep.subr.bf16.mxu1 %v1515_v0 }
 0x581   :  { %v452_v41 = vmul.f32 %v1492_v39, %v1488_v31  ;;  %v652_v49 = vpop.permute.xlu1 %651 }
 0x582   :  { %v657_v61 = vsel %vm113_vm2, %v652_v49, 0 }
 0x583   :  { %v454_v42 = vpack.c.bf16 %v452_v41, %v452_v41 }
 0x584   :  { %v1494_v44 = vpop.eup %1493 }
 0x585   :  { %v453_v46 = vmul.f32 %v1494_v44, %v1490_v33  ;;  %1383 = vmatmul.mubr.msk.bf16.vlgmr.msra.gmra.mrb[12].mxu1 %vm113_vm2, %v454_v42  ;;  %v702_v50 = vpop.permute.xlu1 %701 }
 0x586   :  { %1393 = vmatpush3.bf16.msra.mxu1 %v559_v43  ;;  %1394 = vmatprep.mubr.msk.bf16.mxu1 %vm1516_vm0, %v1515_v0  ;;  %v707_v51 = vsel %vm113_vm2, %v702_v50, 0  ;;  %v1278_v50 = vld [vmem:[%s1799_s3 + $0x8] sm:$0xf] }
 0x587   :  { %v455_v47 = vpack.c.bf16 %v453_v46, %v453_v46  ;;  %1404 = vmatprep.subr.bf16.mxu1 %v1515_v0 }
 0x589   :  { %1389 = vmatmul.mubr.msk.bf16.vlgmr.msra.gmra.mrb[16].mxu0 %vm113_vm2, %v455_v47  ;;  %v700_v52 = vpop.permute.xlu1 %699 }
 0x58a   :  { %1399 = vmatpush3.bf16.msra.mxu0 %v606_v48  ;;  %1400 = vmatprep.mubr.msk.bf16.mxu0 %vm1516_vm0, %v1515_v0 }
 0x58b   :  { %1410 = vmatprep.subr.bf16.mxu0 %v1515_v0 }
 0x591   :  { %1401 = vmatmul.mubr.msk.bf16.vlgmr.msra.gmra.mrb[20].mxu0 %vm113_vm2, %v330_v5 }
 0x592   :  { %1412 = vmatprep.mubr.msk.bf16.mxu0 %vm1516_vm0, %v1515_v0 }
 0x593   :  { %1411 = vmatpush3.bf16.xpose.msra.mxu0 %v707_v51  ;;  %v876_v51 = vsel %vm238_vm3, %v1278_v50, 0 }
 0x594   :  { %1422 = vmatprep.subr.bf16.mxu0 %v1515_v0 }
 0x59a   :  { %1413 = vmatmul.mubr.msk.bf16.vlgmr.msra.gmra.mrb[24].mxu0 %vm113_vm2, %v700_v52 }
 0x59b   :  { %1424 = vmatprep.mubr.msk.bf16.mxu0 %vm1516_vm0, %v1515_v0 }
 0x658   :  { %v498_v53 = vpop.f32.mrb[12].mxu1 }
 0x659   :  { %v1384_v54 = vpop.f32.mrb[13].mxu1 }
 0x65a   :  { %v501_v55 = vpop.f32.mrb[14].mxu1 }
 0x65b   :  { %v1385_v56 = vpop.f32.mrb[15].mxu1 }
 0x65c   :  { %v546_v57 = vpop.f32.mrb[16].mxu0 }
 0x65d   :  { %v552_v58 = vpack.c.bf16 %v546_v57, %v498_v53  ;;  %v1390_v59 = vpop.f32.mrb[17].mxu0 }
 0x65e   :  { %v549_v60 = vpop.f32.mrb[18].mxu0 }
 0x65f   :  { %v1391_v62 = vpop.f32.mrb[19].mxu0  ;;  %1395 = vmatmul.mubr.msk.bf16.vlgmr.msra.gmra.mrb[16].mxu1 %vm113_vm2, %v552_v58 }
 0x660   :  { %1405 = vmatpush3.bf16.xpose.msra.mxu1 %v657_v61  ;;  %1406 = vmatprep.mubr.msk.bf16.mxu1 %vm1516_vm0, %v1515_v0 }
 0x661   :  { %1416 = vmatprep.subr.bf16.mxu1 %v1515_v0 }
 0x664   :  { %v642_v63 = vpop.f32.mrb[20].mxu0 }
 0x665   :  { %v1402_v1 = vpop.f32.mrb[21].mxu0 }
 0x666   :  { %v645_v5 = vpop.f32.mrb[22].mxu0 }
 0x667   :  { %v1403_v6 = vpop.f32.mrb[23].mxu0  ;;  %1407 = vmatmul.mubr.msk.bf16.vlgmr.msra.gmra.mrb[20].mxu1 %vm113_vm2, %v650_v2 }
 0x668   :  { %1418 = vmatprep.mubr.msk.bf16.mxu1 %vm1516_vm0, %v1515_v0 }
 0x66d   :  { %v743_v7 = vpop.f32.mrb[24].mxu0 }
 0x66e   :  { %v1414_v8 = vpop.f32.mrb[25].mxu0  ;;  %v752_v9 = vsel %vm113_vm2, %v743_v7, -inf }
 0x66f   :  { %753 = vmax.xlane.f32.xlu1 %v752_v9  ;;  %v746_v10 = vpop.f32.mrb[26].mxu0 }
 0x670   :  { %v1415_v12 = vpop.f32.mrb[27].mxu0 }
 0x680   :  { %773 = vrot.lane.b32.xlu1 %v1600_v11, %s1524_s19 }
 0x684   :  { %923 = vrot.lane.b32.xlu1 %v1600_v11, %s1525_s20 }
 0x688   :  { %973 = vrot.lane.b32.xlu1 %v1603_v14, %s1525_s20 }
 0x68c   :  { %971 = vrot.lane.b32.xlu1 %v1616_v22, %s1526_s21 }
 0x6fc   :  { %v754_v13 = vpop.xlane.xlu1 %753 }
 0x6fd   :  { %v756_v17 = vsub.f32 %v743_v7, %v754_v13 }
 0x6ff   :  { %v759_v18 = vmul.f32 1.442695, %v756_v17 }
 0x700   :  { %v774_v15 = vpop.permute.xlu1 %773 }
 0x701   :  { %v779_v16 = vsel %vm238_vm3, %v774_v15, 0  ;;  %1495 = vpow2.f32 %v759_v18 }
 0x702   :  { %1417 = vmatpush3.bf16.msra.mxu1 %v779_v16 }
 0x703   :  { %1428 = vmatprep.subr.bf16.mxu1 %v1515_v0 }
 0x70b   :  { %v1496_v29 = vpop.eup %1495 }
 0x70c   :  { %v764_v32 = vsel %vm113_vm2, %v1496_v29, 0.0 }
 0x732   :  { %v595_v19 = vpop.f32.mrb[16].mxu1 }
 0x733   :  { %v1716_v21 = vadd.f32 %v642_v63, %v595_v19  ;;  %v1396_v23 = vpop.f32.mrb[17].mxu1 }
 0x734   :  { %v598_v24 = vpop.f32.mrb[18].mxu1 }
 0x735   :  { %v1718_v25 = vadd.f32 %v645_v5, %v598_v24  ;;  %v1397_v26 = vpop.f32.mrb[19].mxu1 }
 0x73a   :  { %v693_v27 = vpop.f32.mrb[20].mxu1 }
 0x73b   :  { %v1408_v22 = vpop.f32.mrb[21].mxu1  ;;  %v749_v28 = vsel %vm113_vm2, %v693_v27, -inf }
 0x73c   :  { %750 = vmax.xlane.f32.xlu0 %v749_v28  ;;  %v696_v30 = vpop.f32.mrb[22].mxu1 }
 0x73d   :  { %v1409_v31 = vpop.f32.mrb[23].mxu1 }
 0x740   :  { %765 = vadd.xlane.f32.xlu0 %v764_v32 }
 0x7c9   :  { %v751_v33 = vpop.xlane.xlu0 %750 }
 0x7ca   :  { %v755_v34 = vsub.f32 %v693_v27, %v751_v33 }
 0x7cc   :  { %v757_v35 = vmul.f32 1.442695, %v755_v34 }
 0x7cd   :  { %v766_v38 = vpop.xlane.xlu0 %765 }
 0x7ce   :  { %1497 = vpow2.f32 %v757_v35 }
 0x7cf   :  { %1499 = vrcp.f32 %v766_v38 }
 0x7d8   :  { %v1498_v36 = vpop.eup %1497 }
 0x7d9   :  { %v761_v37 = vsel %vm113_vm2, %v1498_v36, 0.0  ;;  %v1500_v39 = vpop.eup %1499 }
 0x7da   :  { %762 = vadd.xlane.f32.xlu0 %v761_v37  ;;  %v770_v41 = vmul.f32 %v1500_v39, %v1496_v29  ;;  %v1284_v37 = vld [vmem:[%s1799_s3 + $0xc] sm:$0xf] }
 0x7db   :  { %v1148_v38 = vsel %vm238_vm3, %v1284_v37, 0 }
 0x7dc   :  { %v772_v44 = vpack.c.bf16 %v770_v41, %v770_v41 }
 0x7f0   :  { %821 = vrot.lane.b32.xlu0 %v1603_v14, %s1524_s19 }
 0x7f4   :  { %921 = vrot.lane.b32.xlu0 %v1609_v20, %s1526_s21  ;;  %v924_v20 = vpop.permute.xlu1 %923 }
 0x7f5   :  { %v929_v47 = vsel %vm113_vm2, %v924_v20, 0 }
 0x7f8   :  { %v974_v56 = vpop.permute.xlu1 %973 }
 0x7f9   :  { %v979_v61 = vsel %vm113_vm2, %v974_v56, 0 }
 0x7fc   :  { %v972_v7 = vpop.permute.xlu1 %971 }
 0x867   :  { %v763_v40 = vpop.xlane.xlu0 %762 }
 0x868   :  { %1501 = vrcp.f32 %v763_v40 }
 0x86b   :  { %v822_v42 = vpop.permute.xlu0 %821 }
 0x86c   :  { %v827_v43 = vsel %vm238_vm3, %v822_v42, 0 }
 0x86d   :  { %1423 = vmatpush3.bf16.msra.mxu0 %v827_v43 }
 0x86e   :  { %1434 = vmatprep.subr.bf16.mxu0 %v1515_v0 }
 0x86f   :  { %v922_v49 = vpop.permute.xlu0 %921 }
 0x870   :  { %1425 = vmatmul.mubr.msk.bf16.vlgmr.msra.gmra.mrb[28].mxu0 %vm113_vm2, %v772_v44 }
 0x871   :  { %1436 = vmatprep.mubr.msk.bf16.mxu0 %vm1516_vm0, %v1515_v0 }
 0x872   :  { %v1502_v45 = vpop.eup %1501 }
 0x873   :  { %v769_v46 = vmul.f32 %v1502_v45, %v1498_v36 }
 0x875   :  { %v771_v48 = vpack.c.bf16 %v769_v46, %v769_v46 }
 0x876   :  { %1435 = vmatpush3.bf16.xpose.msra.mxu0 %v929_v47 }
 0x877   :  { %1419 = vmatmul.mubr.msk.bf16.vlgmr.msra.gmra.mrb[24].mxu1 %vm113_vm2, %v771_v48  ;;  %1446 = vmatprep.subr.bf16.mxu0 %v1515_v0 }
 0x878   :  { %1430 = vmatprep.mubr.msk.bf16.mxu1 %vm1516_vm0, %v1515_v0  ;;  %1429 = vmatpush3.bf16.msra.mxu1 %v876_v51 }
 0x879   :  { %1440 = vmatprep.subr.bf16.mxu1 %v1515_v0 }
 0x87d   :  { %1437 = vmatmul.mubr.msk.bf16.vlgmr.msra.gmra.mrb[32].mxu0 %vm113_vm2, %v922_v49 }
 0x87e   :  { %1448 = vmatprep.mubr.msk.bf16.mxu0 %vm1516_vm0, %v1515_v0 }
 0x943   :  { %v863_v52 = vpop.f32.mrb[28].mxu0 }
 0x944   :  { %v1426_v53 = vpop.f32.mrb[29].mxu0 }
 0x945   :  { %v866_v54 = vpop.f32.mrb[30].mxu0 }
 0x946   :  { %v1427_v55 = vpop.f32.mrb[31].mxu0 }
 0x947   :  { %v1286_v55 = vld [vmem:[%s1800_s4] ss:$0 sm:$0xff] }
 0x94a   :  { %v815_v57 = vpop.f32.mrb[24].mxu1 }
 0x94b   :  { %v869_v58 = vpack.c.bf16 %v863_v52, %v815_v57  ;;  %v1420_v59 = vpop.f32.mrb[25].mxu1 }
 0x94c   :  { %v818_v60 = vpop.f32.mrb[26].mxu1 }
 0x94d   :  { %v1421_v62 = vpop.f32.mrb[27].mxu1  ;;  %1431 = vmatmul.mubr.msk.bf16.vlgmr.msra.gmra.mrb[28].mxu1 %vm113_vm2, %v869_v58 }
 0x94e   :  { %1441 = vmatpush3.bf16.xpose.msra.mxu1 %v979_v61  ;;  %1442 = vmatprep.mubr.msk.bf16.mxu1 %vm1516_vm0, %v1515_v0 }
 0x94f   :  { %1452 = vmatprep.subr.bf16.mxu1 %v1515_v0 }
 0x950   :  { %v965_v63 = vpop.f32.mrb[32].mxu0 }
 0x951   :  { %v1438_v1 = vpop.f32.mrb[33].mxu0  ;;  %v1021_v2 = vsel %vm113_vm2, %v965_v63, -inf }
 0x952   :  { %1022 = vmax.xlane.f32.xlu0 %v1021_v2  ;;  %v968_v5 = vpop.f32.mrb[34].mxu0 }
 0x953   :  { %v1439_v6 = vpop.f32.mrb[35].mxu0 }
 0x955   :  { %1443 = vmatmul.mubr.msk.bf16.vlgmr.msra.gmra.mrb[32].mxu1 %vm113_vm2, %v972_v7 }
 0x956   :  { %1454 = vmatprep.mubr.msk.bf16.mxu1 %vm1516_vm0, %v1515_v0 }
 0x9df   :  { %v1023_v8 = vpop.xlane.xlu0 %1022 }
 0x9e0   :  { %v1027_v9 = vsub.f32 %v965_v63, %v1023_v8 }
 0x9e2   :  { %v1029_v10 = vmul.f32 1.442695, %v1027_v9 }
 0x9e4   :  { %1503 = vpow2.f32 %v1029_v10 }
 0x9ee   :  { %v1504_v12 = vpop.eup %1503 }
 0x9ef   :  { %v1033_v13 = vsel %vm113_vm2, %v1504_v12, 0.0 }
 0x9f0   :  { %1034 = vadd.xlane.f32.xlu0 %v1033_v13 }
 0xa20   :  { %v912_v15 = vpop.f32.mrb[28].mxu1 }
 0xa21   :  { %v919_v16 = vadd.f32 %v912_v15, %v1716_v21  ;;  %v1432_v17 = vpop.f32.mrb[29].mxu1 }
 0xa22   :  { %v915_v18 = vpop.f32.mrb[30].mxu1 }
 0xa23   :  { %v920_v19 = vadd.f32 %v915_v18, %v1718_v25  ;;  %v1433_v23 = vpop.f32.mrb[31].mxu1 }
 0xa24   :  { %v1287_v23 = vld [vmem:[%s1801_s5] ss:$0 sm:$0xff] }
 0xa28   :  { %v1015_v24 = vpop.f32.mrb[32].mxu1 }
 0xa29   :  { %v1444_v26 = vpop.f32.mrb[33].mxu1  ;;  %v1024_v27 = vsel %vm113_vm2, %v1015_v24, -inf }
 0xa2a   :  { %1025 = vmax.xlane.f32.xlu1 %v1024_v27  ;;  %v1018_v22 = vpop.f32.mrb[34].mxu1  ;;  %v1288_v27 = vld [vmem:[%s1802_s6] ss:$0 sm:$0xff] }
 0xa2b   :  { %v1445_v28 = vpop.f32.mrb[35].mxu1 }
 0xa3b   :  { %1045 = vrot.lane.b32.xlu1 %v1600_v11, %s1527_s24 }
 0xa7d   :  { %v1035_v29 = vpop.xlane.xlu0 %1034 }
 0xa7e   :  { %1505 = vrcp.f32 %v1035_v29 }
 0xa88   :  { %v1506_v30 = vpop.eup %1505 }
 0xa89   :  { %v1041_v32 = vmul.f32 %v1506_v30, %v1504_v12 }
 0xa8b   :  { %v1043_v35 = vpack.c.bf16 %v1041_v32, %v1041_v32 }
 0xab7   :  { %v1026_v31 = vpop.xlane.xlu1 %1025 }
 0xab8   :  { %v1028_v21 = vsub.f32 %v1015_v24, %v1026_v31 }
 0xaba   :  { %v1031_v33 = vmul.f32 1.442695, %v1028_v21 }
 0xabb   :  { %v1046_v34 = vpop.permute.xlu1 %1045 }
 0xabc   :  { %1507 = vpow2.f32 %v1031_v33  ;;  %v1051_v25 = vsel %vm238_vm3, %v1046_v34, 0 }
 0xabd   :  { %1447 = vmatpush3.bf16.msra.mxu0 %v1051_v25 }
 0xabe   :  { %1458 = vmatprep.subr.bf16.mxu0 %v1515_v0 }
 0xac0   :  { %1449 = vmatmul.mubr.msk.bf16.vlgmr.msra.gmra.mrb[36].mxu0 %vm113_vm2, %v1043_v35 }
 0xac1   :  { %1460 = vmatprep.mubr.msk.bf16.mxu0 %vm1516_vm0, %v1515_v0  ;;  %1459 = vmatpush3.bf16.msra.mxu0 %v1148_v38 }
 0xac6   :  { %v1508_v11 = vpop.eup %1507 }
 0xac7   :  { %v1036_v36 = vsel %vm113_vm2, %v1508_v11, 0.0 }
 0xac8   :  { %1037 = vadd.xlane.f32.xlu0 %v1036_v36 }
 0xade   :  { %1093 = vrot.lane.b32.xlu0 %v1603_v14, %s1527_s24 }
 0xb55   :  { %v1038_v39 = vpop.xlane.xlu0 %1037 }
 0xb56   :  { %1509 = vrcp.f32 %v1038_v39 }
 0xb59   :  { %v1094_v40 = vpop.permute.xlu0 %1093 }
 0xb5a   :  { %v1099_v41 = vsel %vm238_vm3, %v1094_v40, 0 }
 0xb5b   :  { %1453 = vmatpush3.bf16.msra.mxu1 %v1099_v41 }
 0xb60   :  { %v1510_v0 = vpop.eup %1509 }
 0xb61   :  { %v1042_v42 = vmul.f32 %v1510_v0, %v1508_v11 }
 0xb63   :  { %v1044_v43 = vpack.c.bf16 %v1042_v42, %v1042_v42 }
 0xb65   :  { %1455 = vmatmul.mubr.msk.bf16.vlgmr.msra.gmra.mrb[36].mxu1 %vm113_vm2, %v1044_v43 }
 0xb93   :  { %v1087_v44 = vpop.f32.mrb[36].mxu0 }
 0xb94   :  { %v1450_v14 = vpop.f32.mrb[37].mxu0 }
 0xb95   :  { %v1090_v45 = vpop.f32.mrb[38].mxu0 }
 0xb96   :  { %v1451_v20 = vpop.f32.mrb[39].mxu0 }
 0xc38   :  { %v1135_v46 = vpop.f32.mrb[36].mxu1 }
 0xc39   :  { %v1141_v47 = vpack.c.bf16 %v1135_v46, %v1087_v44  ;;  %v1456_v48 = vpop.f32.mrb[37].mxu1 }
 0xc3a   :  { %v1138_v49 = vpop.f32.mrb[38].mxu1 }
 0xc3b   :  { %v1457_v50 = vpop.f32.mrb[39].mxu1  ;;  %1461 = vmatmul.mubr.msk.bf16.vlgmr.msra.gmra.mrb[40].mxu0 %vm113_vm2, %v1141_v47 }
 0xd0e   :  { %v1184_v51 = vpop.f32.mrb[40].mxu0 }
 0xd0f   :  { %v1191_v52 = vadd.f32 %v1184_v51, %v919_v16  ;;  %v1462_v53 = vpop.f32.mrb[41].mxu0 }
 0xd10   :  { %v1187_v54 = vpop.f32.mrb[42].mxu0 }
 0xd11   :  { %v1193_v56 = vadd.f32 %v1191_v52, %v1583_v3  ;;  %v1192_v57 = vadd.f32 %v1187_v54, %v920_v19  ;;  %v1463_v58 = vpop.f32.mrb[43].mxu0 }
 0xd13   :  { %v1194_v59 = vadd.f32 %v1192_v57, %v1588_v4  ;;  %v1202_v60 = vadd.f32 %v1286_v55, %v1193_v56 }
 0xd15   :  { %v1204_v61 = vsel %vm53_vm1, %v1202_v60, 0.0  ;;  %v1203_v62 = vadd.f32 %v1286_v55, %v1194_v59 }
 0xd16   :  { %1205 = vadd.xlane.f32.xlu1 %v1204_v61 }
 0xd17   :  { %v1207_v63 = vsel %vm53_vm1, %v1203_v62, 0.0 }
 0xd18   :  { %1208 = vadd.xlane.f32.xlu0 %v1207_v63 }
 0xda3   :  { %v1206_v1 = vpop.xlane.xlu1 %1205 }
 0xda4   :  { %v1211_v2 = vmul.f32 0.03125, %v1206_v1 }
 0xda5   :  { %v1209_v5 = vpop.xlane.xlu0 %1208 }
 0xda6   :  { %v1213_v6 = vsub.f32 %v1202_v60, %v1211_v2  ;;  %v1212_v7 = vmul.f32 0.03125, %v1209_v5 }
 0xda8   :  { %v1214_v8 = vsub.f32 %v1203_v62, %v1212_v7  ;;  %v1215_v9 = vmul.f32 %v1213_v6, %v1213_v6 }
 0xdaa   :  { %v1217_v3 = vsel %vm53_vm1, %v1215_v9, 0.0  ;;  %v1216_v10 = vmul.f32 %v1214_v8, %v1214_v8 }
 0xdab   :  { %1218 = vadd.xlane.f32.xlu1 %v1217_v3 }
 0xdac   :  { %v1220_v4 = vsel %vm53_vm1, %v1216_v10, 0.0 }
 0xdad   :  { %1221 = vadd.xlane.f32.xlu0 %v1220_v4 }
 0xe38   :  { %v1219_v12 = vpop.xlane.xlu1 %1218 }
 0xe39   :  { %v1223_v13 = vmul.f32 0.03125, %v1219_v12 }
 0xe3a   :  { %v1222_v15 = vpop.xlane.xlu0 %1221 }
 0xe3b   :  { %v1225_v16 = vadd.f32 1e-05, %v1223_v13  ;;  %v1224_v17 = vmul.f32 0.03125, %v1222_v15 }
 0xe3d   :  { %1511 = vrsqrt.f32 %v1225_v16  ;;  %v1226_v18 = vadd.f32 1e-05, %v1224_v17 }
 0xe3f   :  { %1513 = vrsqrt.f32 %v1226_v18 }
 0xe47   :  { %v1512_v19 = vpop.eup %1511 }
 0xe48   :  { %v1229_v24 = vmul.f32 %v1512_v19, %v1213_v6 }
 0xe49   :  { %v1514_v26 = vpop.eup %1513 }
 0xe4a   :  { %v1238_v22 = vmul.f32 %v1287_v23, %v1229_v24  ;;  %v1230_v28 = vmul.f32 %v1514_v26, %v1214_v8 }
 0xe4c   :  { %v1247_v29 = vadd.f32 %v1288_v27, %v1238_v22  ;;  %v1239_v30 = vmul.f32 %v1287_v23, %v1230_v28 }
 0xe4e   :  { %1249 = vst.msk [vmem:[%s1803_s7] sm:$0xff] %vm53_vm1, %v1247_v29  ;;  %v1248_v31 = vadd.f32 %v1288_v27, %v1239_v30 }
 0xe50   :  { %1250 = vst.msk [vmem:[%s1803_s7 + $0x8] sm:$0xff] %vm53_vm1, %v1248_v31 }

// kernel: general_transformer_nope.4
= control target key start
LH: loop header
LB: loop body
LE: loop exit
PB: predicated region body
PF: predicated region fallthrough
CT: control target
= control target key end

     0   :  { %12 = vsyncpa [#allocation3], 0  ;;  %s1946_s0 = inlined_call_operand.hbm [shape: f32[2,8,32], index: 0, kind: input, shape index: {}]   ;;  %s1947_s1 = inlined_call_operand.vmem [shape: bf16[32,96], index: 1, kind: input, shape index: {}]   ;;  %s1948_s2 = inlined_call_operand.vmem [shape: f32[1,96], index: 2, kind: input, shape index: {}]   ;;  %s1949_s3 = inlined_call_operand.vmem [shape: bf16[4,8,32], index: 3, kind: input, shape index: {}]   ;;  %s1950_s4 = inlined_call_operand.vmem [shape: f32[1,32], index: 4, kind: input, shape index: {}]   ;;  %s1951_s5 = inlined_call_operand.hbm [shape: f32[1,32], index: 5, kind: input, shape index: {}]   ;;  %s1952_s6 = inlined_call_operand.hbm [shape: f32[1,32], index: 6, kind: input, shape index: {}]   ;;  %s1953_s7 = inlined_call_operand.vmem [shape: f32[2,8,32], index: 7, kind: output, shape index: {}]  }
   0x1   :  { %13 = vsyncpa [#allocation5], 0  ;;  %s1629_s24 = smov [#allocation4]   ;;  %s1630_s26 = smov [#allocation2]  }
   0x2   :  { %s40_s25 = sshll.u32 %s1629_s24, 4  ;;  %s19_s27 = sshll.u32 %s1630_s26, 4  ;;  %s41_s25 = int_to_ptr.vmem [resolvable:$true] %s40_s25  ;;  %s1687_s27 = int_to_ptr.vmem [resolvable:$true] %s19_s27 }
   0x3   :  { %s1559_s30 = scalar_lea.hbm %s1951_s5, 16 }
   0x4   :  { %p1560_p0 = scmp.ne.s32.totalorder %s1951_s5, %s1559_s30  ;;  %p1563_p1 = scmp.lt.u32.totalorder %s1559_s30, %s1951_s5 }
   0x6   :  { %p1565_p2 = pnand %p1563_p1, %p1560_p0 }
   0x8   :  { %1568 = shalt.err (!%p1565_p2)
}
   0x9   :  { %s1569_s12 = scalar_lea.vmem %s41_s25, 16  ;;  %s1573_s13 = scalar_lea.vmem %s41_s25, 32 }
   0xa   :  { %p1570_p3 = scmp.ne.s32.totalorder %s41_s25, %s1569_s12  ;;  %p1574_p4 = scmp.lt.s32.totalorder %s41_s25, %s41_s25 }
   0xb   :  { %p1575_p5 = scmp.lt.s32.totalorder %s1573_s13, %s1569_s12 }
   0xd   :  { %p1576_p6 = por %p1575_p5, %p1574_p4 }
   0xf   :  { %p1577_p7 = pnand %p1576_p6, %p1570_p3 }
  0x11   :  { %1580 = shalt.err (!%p1577_p7)
}
  0x12   :  { %43 = dma.hbm_to_vmem [thread:$0]  %s1951_s5, 16, %s41_s25, [#allocation5]  }
  0x13   :  { %s1581_s18 = scalar_lea.hbm %s1946_s0, 256 }
  0x14   :  { %p1582_p8 = scmp.ne.s32.totalorder %s1946_s0, %s1581_s18  ;;  %p1585_p9 = scmp.lt.u32.totalorder %s1581_s18, %s1946_s0 }
  0x16   :  { %p1587_p10 = pnand %p1585_p9, %p1582_p8 }
  0x18   :  { %1590 = shalt.err (!%p1587_p10)
}
  0x19   :  { %s1591_s23 = scalar_lea.vmem %s1687_s27, 256  ;;  %p1596_p12 = scmp.lt.s32.totalorder %s1687_s27, %s1687_s27 }
  0x1a   :  { %p1592_p11 = scmp.ne.s32.totalorder %s1687_s27, %s1591_s23  ;;  %p1597_p13 = scmp.lt.s32.totalorder %s1591_s23, %s1591_s23 }
  0x1c   :  { %p1598_p0 = por %p1597_p13, %p1596_p12 }
  0x1e   :  { %p1599_p1 = pnand %p1598_p0, %p1592_p11 }
  0x20   :  { %1602 = shalt.err (!%p1599_p1)
}
  0x21   :  { %s1631_s5 = smov 128   ;;  %s1632_s24 = smov 8  }
  0x22   :  { %25 = dma.hbm_to_vmem [thread:$0]  %s1946_s0, 256, %s1687_s27, [#allocation3], %s1631_s5, %s1631_s5, %s1632_s24  }
  0x23   :  { %s1633_s28 = smov [#allocation6]   ;;  %s1603_s9 = scalar_lea.hbm %s1952_s6, 16 }
  0x24   :  { %s50_s29 = sshll.u32 %s1633_s28, 4  ;;  %p1604_p2 = scmp.ne.s32.totalorder %s1952_s6, %s1603_s9  ;;  %s51_s29 = int_to_ptr.vmem [resolvable:$true] %s50_s29 }
  0x25   :  { %p1607_p3 = scmp.lt.u32.totalorder %s1603_s9, %s1952_s6 }
  0x27   :  { %p1609_p4 = pnand %p1607_p3, %p1604_p2 }
  0x29   :  { %1612 = shalt.err (!%p1609_p4)
}
  0x2a   :  { %s1613_s14 = scalar_lea.vmem %s51_s29, 16  ;;  %s1617_s0 = scalar_lea.vmem %s51_s29, 32 }
  0x2b   :  { %p1614_p5 = scmp.ne.s32.totalorder %s51_s29, %s1613_s14  ;;  %p1618_p6 = scmp.lt.s32.totalorder %s51_s29, %s51_s29 }
  0x2c   :  { %p1619_p7 = scmp.lt.s32.totalorder %s1617_s0, %s1613_s14 }
  0x2e   :  { %p1620_p8 = por %p1619_p7, %p1618_p6 }
  0x30   :  { %p1621_p9 = pnand %p1620_p8, %p1614_p5 }
  0x32   :  { %1624 = shalt.err (!%p1621_p9)
}
  0x33   :  { %53 = dma.hbm_to_vmem [thread:$0]  %s1952_s6, 16, %s51_s29, [#allocation5]  }
  0x34   :  { %1625 = dma.done.wait [#allocation3], 256  }
  0x35   :  { %1626 = vsyncadd [#allocation3], 4294967040 }
  0x36   :  { %1627 = dma.done.wait [#allocation5], 32  }
  0x37   :  { %1628 = vsyncadd [#allocation5], 4294967264  ;;  %v1634_v0 = vmov 0.0   ;;  %vm1635_vm0 = vmmov 0   ;;  %v1521_v1 = vld [vmem:[%s1947_s1] sm:$0xff]   ;;  %v1522_v2 = vld [vmem:[%s1947_s1 + $0x8] sm:$0xff]  }
  0x38   :  { %1375 = vmatprep.subr.bf16.mxu0 %v1634_v0  ;;  %1379 = vmatprep.mubr.msk.bf16.mxu0 %vm1635_vm0, %v1634_v0  ;;  %v1742_v3 = vld [vmem:[#allocation2] sm:$0xff]  ;;  %v1744_v4 = vld [vmem:[#allocation2 + $0x8] sm:$0xff]  ;;  %vm90_vm1 = vcmask 261120   ;;  %s1636_s20 = smov 96   ;;  %vm150_vm2 = vcmask 64512   ;;  %s1638_s21 = smov 88  }
  0x39   :  { %1383 = vmatprep.subr.bf16.mxu1 %v1634_v0  ;;  %1385 = vmatprep.mubr.msk.bf16.mxu1 %vm1635_vm0, %v1634_v0  ;;  %v66_v5 = vpack.c.bf16 %v1744_v4, %v1742_v3  ;;  %v1294_v6 = vld [vmem:[%s1948_s2] ss:$0 sm:$0xff]  ;;  %s1637_s2 = smov 64   ;;  %vm275_vm3 = vcmask 1043456   ;;  %s1639_s22 = smov 120  }
  0x3a   :  { %1376 = vmatpush3.bf16.msra.mxu0 %v1521_v1  ;;  %s1640_s23 = smov 56   ;;  %s1641_s5 = smov 112  }
  0x3b   :  { %1377 = vmatprep.subr.bf16.mxu0 %v1634_v0  ;;  %s1642_s24 = smov 80   ;;  %s1643_s30 = smov 48  }
  0x3c   :  { %s1644_s8 = smov 72   ;;  %s1645_s9 = smov 104  }
  0x3d   :  { %s1646_s12 = smov 40  }
  0x3e   :  { %1378 = vmatpush3.bf16.msra.mxu0 %v1522_v2 }
  0x3f   :  { %1389 = vmatprep.subr.bf16.mxu0 %v1634_v0 }
  0x41   :  { %1380 = vmatmul.mubr.msk.bf16.vlgmr.msra.gmra.mrb[0].mxu0 %vm90_vm1, %v66_v5 }
  0x42   :  { %1391 = vmatprep.mubr.msk.bf16.mxu0 %vm1635_vm0, %v1634_v0 }
 0x114   :  { %v128_v7 = vpop.f32.mrb[0].mxu0 }
 0x115   :  { %v129_v8 = vadd.f32 %v1294_v6, %v128_v7  ;;  %v1381_v9 = vpop.f32.mrb[1].mxu0 }
 0x116   :  { %v131_v10 = vpop.f32.mrb[2].mxu0 }
 0x117   :  { %v1756_v11 = vpack.c.bf16 %v129_v8, %v129_v8  ;;  %v132_v12 = vadd.f32 %v1294_v6, %v131_v10  ;;  %v1382_v13 = vpop.f32.mrb[3].mxu0  ;;  %v135_v17 = vmul.f32 0.35355338, %v129_v8 }
 0x119   :  { %148 = vrot.lane.b32.xlu0 %v1756_v11, %s1636_s20  ;;  %v1759_v14 = vpack.c.bf16 %v132_v12, %v132_v12  ;;  %v1765_v20 = vpack.c.bf16 %v135_v17, %v135_v17  ;;  %v136_v21 = vmul.f32 0.35355338, %v132_v12 }
 0x11b   :  { %v1772_v22 = vpack.c.bf16 %v136_v21, %v136_v21 }
 0x11d   :  { %198 = vrot.lane.b32.xlu0 %v1759_v14, %s1636_s20 }
 0x18b   :  { %v149_v15 = vpop.permute.xlu0 %148 }
 0x18c   :  { %v155_v16 = vsel %vm150_vm2, %v149_v15, 0 }
 0x18d   :  { %1384 = vmatpush3.bf16.xpose.msra.mxu1 %v155_v16 }
 0x18e   :  { %1395 = vmatprep.subr.bf16.mxu1 %v1634_v0 }
 0x18f   :  { %v199_v18 = vpop.permute.xlu0 %198 }
 0x190   :  { %v204_v19 = vsel %vm150_vm2, %v199_v18, 0 }
 0x191   :  { %1390 = vmatpush3.bf16.xpose.msra.mxu0 %v204_v19 }
 0x192   :  { %1401 = vmatprep.subr.bf16.mxu0 %v1634_v0 }
 0x194   :  { %1386 = vmatmul.mubr.msk.bf16.vlgmr.msra.gmra.mrb[0].mxu1 %vm150_vm2, %v1765_v20 }
 0x195   :  { %1397 = vmatprep.mubr.msk.bf16.mxu1 %vm1635_vm0, %v1634_v0 }
 0x198   :  { %1392 = vmatmul.mubr.msk.bf16.vlgmr.msra.gmra.mrb[4].mxu0 %vm150_vm2, %v1772_v22 }
 0x199   :  { %1403 = vmatprep.mubr.msk.bf16.mxu0 %vm1635_vm0, %v1634_v0 }
 0x267   :  { %v191_v23 = vpop.f32.mrb[0].mxu1 }
 0x268   :  { %v1387_v24 = vpop.f32.mrb[1].mxu1  ;;  %v246_v25 = vsel %vm150_vm2, %v191_v23, -inf }
 0x269   :  { %247 = vmax.xlane.f32.xlu1 %v246_v25  ;;  %v194_v26 = vpop.f32.mrb[2].mxu1 }
 0x26a   :  { %v1388_v27 = vpop.f32.mrb[3].mxu1 }
 0x26b   :  { %v240_v28 = vpop.f32.mrb[4].mxu0 }
 0x26c   :  { %v1393_v29 = vpop.f32.mrb[5].mxu0  ;;  %v249_v30 = vsel %vm150_vm2, %v240_v28, -inf }
 0x26d   :  { %250 = vmax.xlane.f32.xlu1 %v249_v30  ;;  %v243_v31 = vpop.f32.mrb[6].mxu0 }
 0x26e   :  { %v1394_v32 = vpop.f32.mrb[7].mxu0 }
 0x27e   :  { %270 = vrot.lane.b32.xlu1 %v1756_v11, %s1637_s2 }
 0x282   :  { %319 = vrot.lane.b32.xlu1 %v1759_v14, %s1637_s2 }
 0x286   :  { %371 = vrot.lane.b32.xlu1 %v1756_v11, %s1638_s21 }
 0x2f6   :  { %v248_v33 = vpop.xlane.xlu1 %247 }
 0x2f7   :  { %v252_v34 = vsub.f32 %v191_v23, %v248_v33 }
 0x2f9   :  { %v254_v35 = vmul.f32 1.442695, %v252_v34 }
 0x2fa   :  { %v251_v36 = vpop.xlane.xlu1 %250 }
 0x2fb   :  { %1523 = vpow2.f32 %v254_v35  ;;  %v253_v37 = vsub.f32 %v240_v28, %v251_v36 }
 0x2fd   :  { %v256_v38 = vmul.f32 1.442695, %v253_v37 }
 0x2fe   :  { %v271_v39 = vpop.permute.xlu1 %270 }
 0x2ff   :  { %1525 = vpow2.f32 %v256_v38  ;;  %v277_v40 = vsel %vm275_vm3, %v271_v39, 0 }
 0x300   :  { %1396 = vmatpush3.bf16.msra.mxu1 %v277_v40  ;;  %v1310_v40 = vld [vmem:[%s1949_s3 + $0x4] sm:$0xf] }
 0x301   :  { %1407 = vmatprep.subr.bf16.mxu1 %v1634_v0 }
 0x302   :  { %v320_v41 = vpop.permute.xlu1 %319 }
 0x303   :  { %v325_v42 = vsel %vm275_vm3, %v320_v41, 0 }
 0x304   :  { %1402 = vmatpush3.bf16.msra.mxu0 %v325_v42 }
 0x305   :  { %v1524_v43 = vpop.eup %1523  ;;  %1413 = vmatprep.subr.bf16.mxu0 %v1634_v0 }
 0x306   :  { %v258_v44 = vsel %vm150_vm2, %v1524_v43, 0.0  ;;  %v372_v47 = vpop.permute.xlu1 %371 }
 0x307   :  { %259 = vadd.xlane.f32.xlu0 %v258_v44  ;;  %v377_v54 = vsel %vm150_vm2, %v372_v47, 0 }
 0x309   :  { %v1526_v45 = vpop.eup %1525 }
 0x30a   :  { %v261_v46 = vsel %vm150_vm2, %v1526_v45, 0.0 }
 0x30b   :  { %262 = vadd.xlane.f32.xlu1 %v261_v46 }
 0x31c   :  { %421 = vrot.lane.b32.xlu1 %v1759_v14, %s1638_s21 }
 0x31d   :  { %369 = vrot.lane.b32.xlu0 %v1765_v20, %s1639_s22 }
 0x320   :  { %419 = vrot.lane.b32.xlu1 %v1772_v22, %s1639_s22 }
 0x394   :  { %v260_v48 = vpop.xlane.xlu0 %259 }
 0x395   :  { %1527 = vrcp.f32 %v260_v48 }
 0x398   :  { %v263_v49 = vpop.xlane.xlu1 %262  ;;  %v370_v59 = vpop.permute.xlu0 %369 }
 0x399   :  { %1529 = vrcp.f32 %v263_v49 }
 0x39c   :  { %v422_v56 = vpop.permute.xlu1 %421 }
 0x39d   :  { %v427_v58 = vsel %vm150_vm2, %v422_v56, 0 }
 0x39f   :  { %v1528_v50 = vpop.eup %1527 }
 0x3a0   :  { %v266_v51 = vmul.f32 %v1528_v50, %v1524_v43  ;;  %v420_v60 = vpop.permute.xlu1 %419  ;;  %v596_v43 = vsel %vm275_vm3, %v1310_v40, 0 }
 0x3a2   :  { %v268_v52 = vpack.c.bf16 %v266_v51, %v266_v51 }
 0x3a3   :  { %v1530_v53 = vpop.eup %1529 }
 0x3a4   :  { %v267_v55 = vmul.f32 %v1530_v53, %v1526_v45  ;;  %1398 = vmatmul.mubr.msk.bf16.vlgmr.msra.gmra.mrb[4].mxu1 %vm150_vm2, %v268_v52  ;;  %v368_v45 = vld [vmem:[%s1949_s3] sm:$0xf] }
 0x3a5   :  { %1408 = vmatpush3.bf16.xpose.msra.mxu1 %v377_v54  ;;  %1409 = vmatprep.mubr.msk.bf16.mxu1 %vm1635_vm0, %v1634_v0  ;;  %v643_v48 = vsel %vm275_vm3, %v368_v45, 0 }
 0x3a6   :  { %v269_v57 = vpack.c.bf16 %v267_v55, %v267_v55  ;;  %1419 = vmatprep.subr.bf16.mxu1 %v1634_v0 }
 0x3a8   :  { %1404 = vmatmul.mubr.msk.bf16.vlgmr.msra.gmra.mrb[8].mxu0 %vm150_vm2, %v269_v57 }
 0x3a9   :  { %1414 = vmatpush3.bf16.xpose.msra.mxu0 %v427_v58  ;;  %1415 = vmatprep.mubr.msk.bf16.mxu0 %vm1635_vm0, %v1634_v0 }
 0x3aa   :  { %1425 = vmatprep.subr.bf16.mxu0 %v1634_v0 }
 0x3ac   :  { %1410 = vmatmul.mubr.msk.bf16.vlgmr.msra.gmra.mrb[8].mxu1 %vm150_vm2, %v370_v59 }
 0x3ad   :  { %1421 = vmatprep.mubr.msk.bf16.mxu1 %vm1635_vm0, %v1634_v0 }
 0x3b0   :  { %1416 = vmatmul.mubr.msk.bf16.vlgmr.msra.gmra.mrb[12].mxu0 %vm150_vm2, %v420_v60 }
 0x3b1   :  { %1427 = vmatprep.mubr.msk.bf16.mxu0 %vm1635_vm0, %v1634_v0 }
 0x477   :  { %v1808_v61 = vpop.f32.mrb[4].mxu1 }
 0x478   :  { %v1399_v62 = vpop.f32.mrb[5].mxu1 }
 0x479   :  { %v316_v63 = vpop.f32.mrb[6].mxu1 }
 0x47a   :  { %v1400_v1 = vpop.f32.mrb[7].mxu1 }
 0x47b   :  { %v1810_v2 = vpop.f32.mrb[8].mxu0 }
 0x47c   :  { %v367_v5 = vpack.c.bf16 %v1810_v2, %v1808_v61  ;;  %v1405_v6 = vpop.f32.mrb[9].mxu0 }
 0x47d   :  { %v364_v7 = vpop.f32.mrb[10].mxu0 }
 0x47e   :  { %v1406_v8 = vpop.f32.mrb[11].mxu0 }
 0x47f   :  { %v413_v9 = vpop.f32.mrb[8].mxu1 }
 0x480   :  { %v1411_v10 = vpop.f32.mrb[9].mxu1  ;;  %v469_v12 = vsel %vm150_vm2, %v413_v9, -inf }
 0x481   :  { %470 = vmax.xlane.f32.xlu1 %v469_v12  ;;  %v416_v13 = vpop.f32.mrb[10].mxu1 }
 0x482   :  { %v1412_v15 = vpop.f32.mrb[11].mxu1 }
 0x483   :  { %v463_v16 = vpop.f32.mrb[12].mxu0 }
 0x484   :  { %v1417_v17 = vpop.f32.mrb[13].mxu0  ;;  %v472_v18 = vsel %vm150_vm2, %v463_v16, -inf }
 0x485   :  { %473 = vmax.xlane.f32.xlu0 %v472_v18  ;;  %v466_v19 = vpop.f32.mrb[14].mxu0 }
 0x486   :  { %v1418_v21 = vpop.f32.mrb[15].mxu0 }
 0x49b   :  { %541 = vrot.lane.b32.xlu0 %v1759_v14, %s1640_s23 }
 0x49f   :  { %686 = vrot.lane.b32.xlu0 %v1765_v20, %s1641_s5 }
 0x50e   :  { %v471_v23 = vpop.xlane.xlu1 %470 }
 0x50f   :  { %v475_v24 = vsub.f32 %v413_v9, %v471_v23 }
 0x511   :  { %v477_v25 = vmul.f32 1.442695, %v475_v24 }
 0x512   :  { %v474_v26 = vpop.xlane.xlu0 %473 }
 0x513   :  { %1531 = vpow2.f32 %v477_v25  ;;  %v476_v27 = vsub.f32 %v463_v16, %v474_v26 }
 0x515   :  { %v479_v28 = vmul.f32 1.442695, %v476_v27 }
 0x516   :  { %v542_v29 = vpop.permute.xlu0 %541 }
 0x517   :  { %1533 = vpow2.f32 %v479_v28  ;;  %v547_v30 = vsel %vm275_vm3, %v542_v29, 0 }
 0x518   :  { %1426 = vmatpush3.bf16.msra.mxu0 %v547_v30 }
 0x519   :  { %1437 = vmatprep.subr.bf16.mxu0 %v1634_v0 }
 0x51a   :  { %v687_v2 = vpop.permute.xlu0 %686 }
 0x51d   :  { %v1532_v31 = vpop.eup %1531 }
 0x51e   :  { %v481_v32 = vsel %vm150_vm2, %v1532_v31, 0.0 }
 0x51f   :  { %482 = vadd.xlane.f32.xlu1 %v481_v32 }
 0x521   :  { %v1534_v33 = vpop.eup %1533 }
 0x522   :  { %v484_v34 = vsel %vm150_vm2, %v1534_v33, 0.0 }
 0x523   :  { %485 = vadd.xlane.f32.xlu1 %v484_v34 }
 0x534   :  { %493 = vrot.lane.b32.xlu1 %v1756_v11, %s1640_s23 }
 0x538   :  { %688 = vrot.lane.b32.xlu1 %v1756_v11, %s1642_s24 }
 0x53c   :  { %738 = vrot.lane.b32.xlu1 %v1759_v14, %s1642_s24 }
 0x540   :  { %736 = vrot.lane.b32.xlu1 %v1772_v22, %s1641_s5 }
 0x5ac   :  { %v483_v35 = vpop.xlane.xlu1 %482 }
 0x5ad   :  { %1535 = vrcp.f32 %v483_v35 }
 0x5b0   :  { %v486_v36 = vpop.xlane.xlu1 %485 }
 0x5b1   :  { %1537 = vrcp.f32 %v486_v36 }
 0x5b4   :  { %v494_v37 = vpop.permute.xlu1 %493 }
 0x5b5   :  { %v499_v38 = vsel %vm275_vm3, %v494_v37, 0 }
 0x5b6   :  { %1420 = vmatpush3.bf16.msra.mxu1 %v499_v38 }
 0x5b7   :  { %v1536_v39 = vpop.eup %1535  ;;  %1431 = vmatprep.subr.bf16.mxu1 %v1634_v0 }
 0x5b8   :  { %v489_v41 = vmul.f32 %v1536_v39, %v1532_v31  ;;  %v689_v49 = vpop.permute.xlu1 %688 }
 0x5b9   :  { %v694_v61 = vsel %vm150_vm2, %v689_v49, 0 }
 0x5ba   :  { %v491_v42 = vpack.c.bf16 %v489_v41, %v489_v41 }
 0x5bb   :  { %v1538_v44 = vpop.eup %1537 }
 0x5bc   :  { %v490_v46 = vmul.f32 %v1538_v44, %v1534_v33  ;;  %1422 = vmatmul.mubr.msk.bf16.vlgmr.msra.gmra.mrb[12].mxu1 %vm150_vm2, %v491_v42  ;;  %v739_v50 = vpop.permute.xlu1 %738 }
 0x5bd   :  { %1432 = vmatpush3.bf16.msra.mxu1 %v596_v43  ;;  %1433 = vmatprep.mubr.msk.bf16.mxu1 %vm1635_vm0, %v1634_v0  ;;  %v744_v51 = vsel %vm150_vm2, %v739_v50, 0  ;;  %v1317_v50 = vld [vmem:[%s1949_s3 + $0x8] sm:$0xf] }
 0x5be   :  { %v492_v47 = vpack.c.bf16 %v490_v46, %v490_v46  ;;  %1443 = vmatprep.subr.bf16.mxu1 %v1634_v0 }
 0x5c0   :  { %1428 = vmatmul.mubr.msk.bf16.vlgmr.msra.gmra.mrb[16].mxu0 %vm150_vm2, %v492_v47  ;;  %v737_v52 = vpop.permute.xlu1 %736 }
 0x5c1   :  { %1438 = vmatpush3.bf16.msra.mxu0 %v643_v48  ;;  %1439 = vmatprep.mubr.msk.bf16.mxu0 %vm1635_vm0, %v1634_v0 }
 0x5c2   :  { %1449 = vmatprep.subr.bf16.mxu0 %v1634_v0 }
 0x5c8   :  { %1440 = vmatmul.mubr.msk.bf16.vlgmr.msra.gmra.mrb[20].mxu0 %vm150_vm2, %v367_v5 }
 0x5c9   :  { %1451 = vmatprep.mubr.msk.bf16.mxu0 %vm1635_vm0, %v1634_v0 }
 0x5ca   :  { %1450 = vmatpush3.bf16.xpose.msra.mxu0 %v744_v51  ;;  %v913_v51 = vsel %vm275_vm3, %v1317_v50, 0 }
 0x5cb   :  { %1461 = vmatprep.subr.bf16.mxu0 %v1634_v0 }
 0x5d1   :  { %1452 = vmatmul.mubr.msk.bf16.vlgmr.msra.gmra.mrb[24].mxu0 %vm150_vm2, %v737_v52 }
 0x5d2   :  { %1463 = vmatprep.mubr.msk.bf16.mxu0 %vm1635_vm0, %v1634_v0 }
 0x68f   :  { %v535_v53 = vpop.f32.mrb[12].mxu1 }
 0x690   :  { %v1423_v54 = vpop.f32.mrb[13].mxu1 }
 0x691   :  { %v538_v55 = vpop.f32.mrb[14].mxu1 }
 0x692   :  { %v1424_v56 = vpop.f32.mrb[15].mxu1 }
 0x693   :  { %v583_v57 = vpop.f32.mrb[16].mxu0 }
 0x694   :  { %v589_v58 = vpack.c.bf16 %v583_v57, %v535_v53  ;;  %v1429_v59 = vpop.f32.mrb[17].mxu0 }
 0x695   :  { %v586_v60 = vpop.f32.mrb[18].mxu0 }
 0x696   :  { %v1430_v62 = vpop.f32.mrb[19].mxu0  ;;  %1434 = vmatmul.mubr.msk.bf16.vlgmr.msra.gmra.mrb[16].mxu1 %vm150_vm2, %v589_v58 }
 0x697   :  { %1444 = vmatpush3.bf16.xpose.msra.mxu1 %v694_v61  ;;  %1445 = vmatprep.mubr.msk.bf16.mxu1 %vm1635_vm0, %v1634_v0 }
 0x698   :  { %1455 = vmatprep.subr.bf16.mxu1 %v1634_v0 }
 0x69b   :  { %v679_v63 = vpop.f32.mrb[20].mxu0 }
 0x69c   :  { %v1441_v1 = vpop.f32.mrb[21].mxu0 }
 0x69d   :  { %v682_v5 = vpop.f32.mrb[22].mxu0 }
 0x69e   :  { %v1442_v6 = vpop.f32.mrb[23].mxu0  ;;  %1446 = vmatmul.mubr.msk.bf16.vlgmr.msra.gmra.mrb[20].mxu1 %vm150_vm2, %v687_v2 }
 0x69f   :  { %1457 = vmatprep.mubr.msk.bf16.mxu1 %vm1635_vm0, %v1634_v0 }
 0x6a4   :  { %v780_v7 = vpop.f32.mrb[24].mxu0 }
 0x6a5   :  { %v1453_v8 = vpop.f32.mrb[25].mxu0  ;;  %v789_v9 = vsel %vm150_vm2, %v780_v7, -inf }
 0x6a6   :  { %790 = vmax.xlane.f32.xlu1 %v789_v9  ;;  %v783_v10 = vpop.f32.mrb[26].mxu0 }
 0x6a7   :  { %v1454_v12 = vpop.f32.mrb[27].mxu0 }
 0x6b7   :  { %810 = vrot.lane.b32.xlu1 %v1756_v11, %s1643_s30 }
 0x6bb   :  { %960 = vrot.lane.b32.xlu1 %v1756_v11, %s1644_s8 }
 0x6bf   :  { %1010 = vrot.lane.b32.xlu1 %v1759_v14, %s1644_s8 }
 0x6c3   :  { %1008 = vrot.lane.b32.xlu1 %v1772_v22, %s1645_s9 }
 0x733   :  { %v791_v13 = vpop.xlane.xlu1 %790 }
 0x734   :  { %v793_v17 = vsub.f32 %v780_v7, %v791_v13 }
 0x736   :  { %v796_v18 = vmul.f32 1.442695, %v793_v17 }
 0x737   :  { %v811_v15 = vpop.permute.xlu1 %810 }
 0x738   :  { %v816_v16 = vsel %vm275_vm3, %v811_v15, 0  ;;  %1539 = vpow2.f32 %v796_v18 }
 0x739   :  { %1456 = vmatpush3.bf16.msra.mxu1 %v816_v16 }
 0x73a   :  { %1467 = vmatprep.subr.bf16.mxu1 %v1634_v0 }
 0x742   :  { %v1540_v29 = vpop.eup %1539 }
 0x743   :  { %v801_v32 = vsel %vm150_vm2, %v1540_v29, 0.0 }
 0x769   :  { %v632_v19 = vpop.f32.mrb[16].mxu1 }
 0x76a   :  { %v1872_v21 = vadd.f32 %v679_v63, %v632_v19  ;;  %v1435_v23 = vpop.f32.mrb[17].mxu1 }
 0x76b   :  { %v635_v24 = vpop.f32.mrb[18].mxu1 }
 0x76c   :  { %v1874_v25 = vadd.f32 %v682_v5, %v635_v24  ;;  %v1436_v26 = vpop.f32.mrb[19].mxu1 }
 0x771   :  { %v730_v27 = vpop.f32.mrb[20].mxu1 }
 0x772   :  { %v1447_v22 = vpop.f32.mrb[21].mxu1  ;;  %v786_v28 = vsel %vm150_vm2, %v730_v27, -inf }
 0x773   :  { %787 = vmax.xlane.f32.xlu0 %v786_v28  ;;  %v733_v30 = vpop.f32.mrb[22].mxu1 }
 0x774   :  { %v1448_v31 = vpop.f32.mrb[23].mxu1 }
 0x777   :  { %802 = vadd.xlane.f32.xlu0 %v801_v32 }
 0x800   :  { %v788_v33 = vpop.xlane.xlu0 %787 }
 0x801   :  { %v792_v34 = vsub.f32 %v730_v27, %v788_v33 }
 0x803   :  { %v794_v35 = vmul.f32 1.442695, %v792_v34 }
 0x804   :  { %v803_v38 = vpop.xlane.xlu0 %802 }
 0x805   :  { %1541 = vpow2.f32 %v794_v35 }
 0x806   :  { %1543 = vrcp.f32 %v803_v38 }
 0x80f   :  { %v1542_v36 = vpop.eup %1541 }
 0x810   :  { %v798_v37 = vsel %vm150_vm2, %v1542_v36, 0.0  ;;  %v1544_v39 = vpop.eup %1543 }
 0x811   :  { %799 = vadd.xlane.f32.xlu0 %v798_v37  ;;  %v807_v41 = vmul.f32 %v1544_v39, %v1540_v29  ;;  %v1323_v37 = vld [vmem:[%s1949_s3 + $0xc] sm:$0xf] }
 0x812   :  { %v1185_v38 = vsel %vm275_vm3, %v1323_v37, 0 }
 0x813   :  { %v809_v44 = vpack.c.bf16 %v807_v41, %v807_v41 }
 0x827   :  { %858 = vrot.lane.b32.xlu0 %v1759_v14, %s1643_s30 }
 0x82b   :  { %958 = vrot.lane.b32.xlu0 %v1765_v20, %s1645_s9  ;;  %v961_v20 = vpop.permute.xlu1 %960 }
 0x82c   :  { %v966_v47 = vsel %vm150_vm2, %v961_v20, 0 }
 0x82f   :  { %v1011_v56 = vpop.permute.xlu1 %1010 }
 0x830   :  { %v1016_v61 = vsel %vm150_vm2, %v1011_v56, 0 }
 0x833   :  { %v1009_v7 = vpop.permute.xlu1 %1008 }
 0x89e   :  { %v800_v40 = vpop.xlane.xlu0 %799 }
 0x89f   :  { %1545 = vrcp.f32 %v800_v40 }
 0x8a2   :  { %v859_v42 = vpop.permute.xlu0 %858 }
 0x8a3   :  { %v864_v43 = vsel %vm275_vm3, %v859_v42, 0 }
 0x8a4   :  { %1462 = vmatpush3.bf16.msra.mxu0 %v864_v43 }
 0x8a5   :  { %1473 = vmatprep.subr.bf16.mxu0 %v1634_v0 }
 0x8a6   :  { %v959_v49 = vpop.permute.xlu0 %958 }
 0x8a7   :  { %1464 = vmatmul.mubr.msk.bf16.vlgmr.msra.gmra.mrb[28].mxu0 %vm150_vm2, %v809_v44 }
 0x8a8   :  { %1475 = vmatprep.mubr.msk.bf16.mxu0 %vm1635_vm0, %v1634_v0 }
 0x8a9   :  { %v1546_v45 = vpop.eup %1545 }
 0x8aa   :  { %v806_v46 = vmul.f32 %v1546_v45, %v1542_v36 }
 0x8ac   :  { %v808_v48 = vpack.c.bf16 %v806_v46, %v806_v46 }
 0x8ad   :  { %1474 = vmatpush3.bf16.xpose.msra.mxu0 %v966_v47 }
 0x8ae   :  { %1458 = vmatmul.mubr.msk.bf16.vlgmr.msra.gmra.mrb[24].mxu1 %vm150_vm2, %v808_v48  ;;  %1485 = vmatprep.subr.bf16.mxu0 %v1634_v0 }
 0x8af   :  { %1469 = vmatprep.mubr.msk.bf16.mxu1 %vm1635_vm0, %v1634_v0  ;;  %1468 = vmatpush3.bf16.msra.mxu1 %v913_v51 }
 0x8b0   :  { %1479 = vmatprep.subr.bf16.mxu1 %v1634_v0 }
 0x8b4   :  { %1476 = vmatmul.mubr.msk.bf16.vlgmr.msra.gmra.mrb[32].mxu0 %vm150_vm2, %v959_v49 }
 0x8b5   :  { %1487 = vmatprep.mubr.msk.bf16.mxu0 %vm1635_vm0, %v1634_v0 }
 0x97a   :  { %v900_v52 = vpop.f32.mrb[28].mxu0 }
 0x97b   :  { %v1465_v53 = vpop.f32.mrb[29].mxu0 }
 0x97c   :  { %v903_v54 = vpop.f32.mrb[30].mxu0 }
 0x97d   :  { %v1466_v55 = vpop.f32.mrb[31].mxu0 }
 0x97e   :  { %v1325_v55 = vld [vmem:[%s1950_s4] ss:$0 sm:$0xff] }
 0x981   :  { %v852_v57 = vpop.f32.mrb[24].mxu1 }
 0x982   :  { %v906_v58 = vpack.c.bf16 %v900_v52, %v852_v57  ;;  %v1459_v59 = vpop.f32.mrb[25].mxu1 }
 0x983   :  { %v855_v60 = vpop.f32.mrb[26].mxu1 }
 0x984   :  { %v1460_v62 = vpop.f32.mrb[27].mxu1  ;;  %1470 = vmatmul.mubr.msk.bf16.vlgmr.msra.gmra.mrb[28].mxu1 %vm150_vm2, %v906_v58 }
 0x985   :  { %1480 = vmatpush3.bf16.xpose.msra.mxu1 %v1016_v61  ;;  %1481 = vmatprep.mubr.msk.bf16.mxu1 %vm1635_vm0, %v1634_v0 }
 0x986   :  { %1491 = vmatprep.subr.bf16.mxu1 %v1634_v0 }
 0x987   :  { %v1002_v63 = vpop.f32.mrb[32].mxu0 }
 0x988   :  { %v1477_v1 = vpop.f32.mrb[33].mxu0  ;;  %v1058_v2 = vsel %vm150_vm2, %v1002_v63, -inf }
 0x989   :  { %1059 = vmax.xlane.f32.xlu0 %v1058_v2  ;;  %v1005_v5 = vpop.f32.mrb[34].mxu0 }
 0x98a   :  { %v1478_v6 = vpop.f32.mrb[35].mxu0 }
 0x98c   :  { %1482 = vmatmul.mubr.msk.bf16.vlgmr.msra.gmra.mrb[32].mxu1 %vm150_vm2, %v1009_v7 }
 0x98d   :  { %1493 = vmatprep.mubr.msk.bf16.mxu1 %vm1635_vm0, %v1634_v0 }
 0xa16   :  { %v1060_v8 = vpop.xlane.xlu0 %1059 }
 0xa17   :  { %v1064_v9 = vsub.f32 %v1002_v63, %v1060_v8 }
 0xa19   :  { %v1066_v10 = vmul.f32 1.442695, %v1064_v9 }
 0xa1b   :  { %1547 = vpow2.f32 %v1066_v10 }
 0xa25   :  { %v1548_v12 = vpop.eup %1547 }
 0xa26   :  { %v1070_v13 = vsel %vm150_vm2, %v1548_v12, 0.0 }
 0xa27   :  { %1071 = vadd.xlane.f32.xlu0 %v1070_v13 }
 0xa57   :  { %v949_v15 = vpop.f32.mrb[28].mxu1 }
 0xa58   :  { %v956_v16 = vadd.f32 %v949_v15, %v1872_v21  ;;  %v1471_v17 = vpop.f32.mrb[29].mxu1 }
 0xa59   :  { %v952_v18 = vpop.f32.mrb[30].mxu1 }
 0xa5a   :  { %v957_v19 = vadd.f32 %v952_v18, %v1874_v25  ;;  %v1472_v23 = vpop.f32.mrb[31].mxu1 }
 0xa5b   :  { %v1326_v23 = vld [vmem:[#allocation4] ss:$0 sm:$0xff] }
 0xa5f   :  { %v1052_v24 = vpop.f32.mrb[32].mxu1 }
 0xa60   :  { %v1483_v26 = vpop.f32.mrb[33].mxu1  ;;  %v1061_v27 = vsel %vm150_vm2, %v1052_v24, -inf }
 0xa61   :  { %1062 = vmax.xlane.f32.xlu1 %v1061_v27  ;;  %v1055_v22 = vpop.f32.mrb[34].mxu1  ;;  %v1327_v27 = vld [vmem:[#allocation6] ss:$0 sm:$0xff] }
 0xa62   :  { %v1484_v28 = vpop.f32.mrb[35].mxu1 }
 0xa72   :  { %1082 = vrot.lane.b32.xlu1 %v1756_v11, %s1646_s12 }
 0xab4   :  { %v1072_v29 = vpop.xlane.xlu0 %1071 }
 0xab5   :  { %1549 = vrcp.f32 %v1072_v29 }
 0xabf   :  { %v1550_v30 = vpop.eup %1549 }
 0xac0   :  { %v1078_v32 = vmul.f32 %v1550_v30, %v1548_v12 }
 0xac2   :  { %v1080_v35 = vpack.c.bf16 %v1078_v32, %v1078_v32 }
 0xaee   :  { %v1063_v31 = vpop.xlane.xlu1 %1062 }
 0xaef   :  { %v1065_v21 = vsub.f32 %v1052_v24, %v1063_v31 }
 0xaf1   :  { %v1068_v33 = vmul.f32 1.442695, %v1065_v21 }
 0xaf2   :  { %v1083_v34 = vpop.permute.xlu1 %1082 }
 0xaf3   :  { %1551 = vpow2.f32 %v1068_v33  ;;  %v1088_v25 = vsel %vm275_vm3, %v1083_v34, 0 }
 0xaf4   :  { %1486 = vmatpush3.bf16.msra.mxu0 %v1088_v25 }
 0xaf5   :  { %1497 = vmatprep.subr.bf16.mxu0 %v1634_v0 }
 0xaf7   :  { %1488 = vmatmul.mubr.msk.bf16.vlgmr.msra.gmra.mrb[36].mxu0 %vm150_vm2, %v1080_v35 }
 0xaf8   :  { %1499 = vmatprep.mubr.msk.bf16.mxu0 %vm1635_vm0, %v1634_v0  ;;  %1498 = vmatpush3.bf16.msra.mxu0 %v1185_v38 }
 0xafd   :  { %v1552_v11 = vpop.eup %1551 }
 0xafe   :  { %v1073_v36 = vsel %vm150_vm2, %v1552_v11, 0.0 }
 0xaff   :  { %1074 = vadd.xlane.f32.xlu0 %v1073_v36 }
 0xb15   :  { %1130 = vrot.lane.b32.xlu0 %v1759_v14, %s1646_s12 }
 0xb8c   :  { %v1075_v39 = vpop.xlane.xlu0 %1074 }
 0xb8d   :  { %1553 = vrcp.f32 %v1075_v39 }
 0xb90   :  { %v1131_v40 = vpop.permute.xlu0 %1130 }
 0xb91   :  { %v1136_v41 = vsel %vm275_vm3, %v1131_v40, 0 }
 0xb92   :  { %1492 = vmatpush3.bf16.msra.mxu1 %v1136_v41 }
 0xb97   :  { %v1554_v0 = vpop.eup %1553 }
 0xb98   :  { %v1079_v42 = vmul.f32 %v1554_v0, %v1552_v11 }
 0xb9a   :  { %v1081_v43 = vpack.c.bf16 %v1079_v42, %v1079_v42 }
 0xb9c   :  { %1494 = vmatmul.mubr.msk.bf16.vlgmr.msra.gmra.mrb[36].mxu1 %vm150_vm2, %v1081_v43 }
 0xbca   :  { %v1124_v44 = vpop.f32.mrb[36].mxu0 }
 0xbcb   :  { %v1489_v14 = vpop.f32.mrb[37].mxu0 }
 0xbcc   :  { %v1127_v45 = vpop.f32.mrb[38].mxu0 }
 0xbcd   :  { %v1490_v20 = vpop.f32.mrb[39].mxu0 }
 0xc6f   :  { %v1172_v46 = vpop.f32.mrb[36].mxu1 }
 0xc70   :  { %v1178_v47 = vpack.c.bf16 %v1172_v46, %v1124_v44  ;;  %v1495_v48 = vpop.f32.mrb[37].mxu1 }
 0xc71   :  { %v1175_v49 = vpop.f32.mrb[38].mxu1 }
 0xc72   :  { %v1496_v50 = vpop.f32.mrb[39].mxu1  ;;  %1500 = vmatmul.mubr.msk.bf16.vlgmr.msra.gmra.mrb[40].mxu0 %vm150_vm2, %v1178_v47 }
 0xd45   :  { %v1221_v51 = vpop.f32.mrb[40].mxu0 }
 0xd46   :  { %v1228_v52 = vadd.f32 %v1221_v51, %v956_v16  ;;  %v1501_v53 = vpop.f32.mrb[41].mxu0 }
 0xd47   :  { %v1224_v54 = vpop.f32.mrb[42].mxu0 }
 0xd48   :  { %v1230_v56 = vadd.f32 %v1228_v52, %v1742_v3  ;;  %v1229_v57 = vadd.f32 %v1224_v54, %v957_v19  ;;  %v1502_v58 = vpop.f32.mrb[43].mxu0 }
 0xd4a   :  { %v1231_v59 = vadd.f32 %v1229_v57, %v1744_v4  ;;  %v1239_v60 = vadd.f32 %v1325_v55, %v1230_v56 }
 0xd4c   :  { %v1241_v61 = vsel %vm90_vm1, %v1239_v60, 0.0  ;;  %v1240_v62 = vadd.f32 %v1325_v55, %v1231_v59 }
 0xd4d   :  { %1242 = vadd.xlane.f32.xlu1 %v1241_v61 }
 0xd4e   :  { %v1244_v63 = vsel %vm90_vm1, %v1240_v62, 0.0 }
 0xd4f   :  { %1245 = vadd.xlane.f32.xlu0 %v1244_v63 }
 0xdda   :  { %v1243_v1 = vpop.xlane.xlu1 %1242 }
 0xddb   :  { %v1248_v2 = vmul.f32 0.03125, %v1243_v1 }
 0xddc   :  { %v1246_v5 = vpop.xlane.xlu0 %1245 }
 0xddd   :  { %v1250_v6 = vsub.f32 %v1239_v60, %v1248_v2  ;;  %v1249_v7 = vmul.f32 0.03125, %v1246_v5 }
 0xddf   :  { %v1251_v8 = vsub.f32 %v1240_v62, %v1249_v7  ;;  %v1252_v9 = vmul.f32 %v1250_v6, %v1250_v6 }
 0xde1   :  { %v1254_v3 = vsel %vm90_vm1, %v1252_v9, 0.0  ;;  %v1253_v10 = vmul.f32 %v1251_v8, %v1251_v8 }
 0xde2   :  { %1255 = vadd.xlane.f32.xlu1 %v1254_v3 }
 0xde3   :  { %v1257_v4 = vsel %vm90_vm1, %v1253_v10, 0.0 }
 0xde4   :  { %1258 = vadd.xlane.f32.xlu0 %v1257_v4 }
 0xe6f   :  { %v1256_v12 = vpop.xlane.xlu1 %1255 }
 0xe70   :  { %v1260_v13 = vmul.f32 0.03125, %v1256_v12 }
 0xe71   :  { %v1259_v15 = vpop.xlane.xlu0 %1258 }
 0xe72   :  { %v1262_v16 = vadd.f32 1e-05, %v1260_v13  ;;  %v1261_v17 = vmul.f32 0.03125, %v1259_v15 }
 0xe74   :  { %1555 = vrsqrt.f32 %v1262_v16  ;;  %v1263_v18 = vadd.f32 1e-05, %v1261_v17 }
 0xe76   :  { %1557 = vrsqrt.f32 %v1263_v18 }
 0xe7e   :  { %v1556_v19 = vpop.eup %1555 }
 0xe7f   :  { %v1266_v24 = vmul.f32 %v1556_v19, %v1250_v6 }
 0xe80   :  { %v1558_v26 = vpop.eup %1557 }
 0xe81   :  { %v1275_v22 = vmul.f32 %v1326_v23, %v1266_v24  ;;  %v1267_v28 = vmul.f32 %v1558_v26, %v1251_v8 }
 0xe83   :  { %v1284_v29 = vadd.f32 %v1327_v27, %v1275_v22  ;;  %v1276_v30 = vmul.f32 %v1326_v23, %v1267_v28 }
 0xe85   :  { %1286 = vst.msk [vmem:[%s1953_s7] sm:$0xff] %vm90_vm1, %v1284_v29  ;;  %v1285_v31 = vadd.f32 %v1327_v27, %v1276_v30 }
 0xe87   :  { %1287 = vst.msk [vmem:[%s1953_s7 + $0x8] sm:$0xff] %vm90_vm1, %v1285_v31 }
 0xe88   :  { %1292 = vsyncpa [#allocation3], 1 }
 0xe89   :  { %1293 = vsyncpa [#allocation5], 1 }

// kernel: general_transformer_nope.7
= control target key start
LH: loop header
LB: loop body
LE: loop exit
PB: predicated region body
PF: predicated region fallthrough
CT: control target
= control target key end

     0   :  { %12 = vsyncpa [#allocation5], 0  ;;  %s1398_s24 = smov 0   ;;  %s1400_s25 = smov 0   ;;  %s1573_s0 = inlined_call_operand.vmem [shape: f32[2,8,32], index: 0, kind: input, shape index: {}]   ;;  %s1574_s1 = inlined_call_operand.vmem [shape: bf16[32,2048], index: 1, kind: input, shape index: {}]   ;;  %s1575_s2 = inlined_call_operand.vmem [shape: f32[1,2048], index: 2, kind: input, shape index: {}]   ;;  %s1576_s3 = inlined_call_operand.vmem [shape: bf16[2048,32], index: 3, kind: input, shape index: {}]   ;;  %s1577_s4 = inlined_call_operand.vmem [shape: f32[1,32], index: 4, kind: input, shape index: {}]   ;;  %s1578_s5 = inlined_call_operand.vmem [shape: f32[1,32], index: 5, kind: input, shape index: {}]   ;;  %s1579_s6 = inlined_call_operand.vmem [shape: f32[1,32], index: 6, kind: input, shape index: {}]   ;;  %s1580_s7 = inlined_call_operand.hbm [shape: f32[2,8,32], index: 7, kind: output, shape index: {}]  }
   0x1   :  { %s1402_s26 = smov 0   ;;  %s1404_s27 = smov 0  }
   0x2   :  { %s1406_s28 = smov 0  }
   0x3 LB: > { %s1076_s29 = sadd.s32 4294967295, %s1351_s28   ;;  %s27_s30 = sadd.s32 1, %s1347_s27  ;;  %s1351_s28 = sphi %s1406_s28, %s18_s28   ;;  %s1347_s27 = sphi %s1404_s27, %s1585_s27   ;;  %s1343_s26 = sphi %s1402_s26, %s1584_s26   ;;  %s1339_s25 = sphi %s1400_s25, %s1583_s25   ;;  %s1335_s24 = sphi %s1398_s24, %s1582_s24  }
   0x4   : > { %p28_p0 = scmp.ge.s32.totalorder %s27_s30, 4  ;;  %p70_p1 = scmp.ne.s32.totalorder %s1339_s25, %s1335_s24 }
   0x5   : > { %p71_p2 = scmp.eq.s32.totalorder %s1351_s28, 0  ;;  %s63_s9 = sadd.s32 1, %s1339_s25 }
   0x6   : > { %s1587_s30 = smov (%p28_p0, %s27_s30), 0  ;;  %p1079_p5 = scmp.ge.s32.totalorder %s1351_s28, 4 }
   0x7   : > { %p72_p3 = por %p71_p2, %p70_p1  ;;  %s60_s8 = ssub.s32 %s1347_s27, %s1587_s30 }
   0x8   : > { %p61_p4 = scmp.eq.s32.totalorder %s60_s8, 0  ;;  %255 = sbr.rel (%p1079_p5) target bundleno = 23 (0x17), region = 32 }
   0xa   : > { %s1434_s10 = scalar_select %p61_p4, %s1339_s25, %s63_s9  }
   0xf   : > { %258 = sbr.rel (!%p72_p3) target bundleno = 23 (0x17), region = 36  ;;  %s260_s11 = sand.u32 (%p72_p3), 1, %s1339_s25  }
  0x10   : > { %s1139_s12 = sshll.u32 (%p72_p3), %s1347_s27, 4  ;;  %s1080_s13 = sshll.u32 (%p72_p3), %s260_s11, 6 }
  0x11   : > { %s265_s16 = scalar_lea.vmem (%p72_p3), %s1574_s1, %s1139_s12  ;;  %s262_s17 = scalar_lea.vmem (%p72_p3), [#allocation3], %s1080_s13 }
  0x12   : > { %v278_v0 = vld [vmem:[%s265_s16] sm:$0xff] (%p72_p3)  ;;  %v280_v1 = vld [vmem:[%s265_s16 + $0x8] sm:$0xff] (%p72_p3) }
  0x13   : > { %v282_v2 = vld [vmem:[%s265_s16 + $0x40] sm:$0xff] (%p72_p3)  ;;  %279 = vst [vmem:[%s262_s17] sm:$0xff] (%p72_p3), %v278_v0  ;;  %281 = vst [vmem:[%s262_s17 + $0x8] sm:$0xff] (%p72_p3), %v280_v1  ;;  %v284_v3 = vld [vmem:[%s265_s16 + $0x48] sm:$0xff] (%p72_p3) }
  0x14   : > { %283 = vst [vmem:[%s262_s17 + $0x10] sm:$0xff] (%p72_p3), %v282_v2  ;;  %v286_v4 = vld [vmem:[%s265_s16 + $0x80] sm:$0xff] (%p72_p3)  ;;  %v288_v5 = vld [vmem:[%s265_s16 + $0x88] sm:$0xff] (%p72_p3)  ;;  %285 = vst [vmem:[%s262_s17 + $0x18] sm:$0xff] (%p72_p3), %v284_v3 }
  0x15   : > { %287 = vst [vmem:[%s262_s17 + $0x20] sm:$0xff] (%p72_p3), %v286_v4  ;;  %289 = vst [vmem:[%s262_s17 + $0x28] sm:$0xff] (%p72_p3), %v288_v5  ;;  %v290_v6 = vld [vmem:[%s265_s16 + $0xc0] sm:$0xff] (%p72_p3)  ;;  %v292_v7 = vld [vmem:[%s265_s16 + $0xc8] sm:$0xff] (%p72_p3) }
  0x16   : > { %291 = vst [vmem:[%s262_s17 + $0x30] sm:$0xff] %v290_v6  ;;  %293 = vst [vmem:[%s262_s17 + $0x38] sm:$0xff] %v292_v7 }
  0x17 PF: > { %p1083_p6 = scmp.ge.s32.totalorder %s1351_s28, 1  ;;  %p315_p7 = scmp.lt.s32.totalorder %s1351_s28, 5 }
  0x19   : > { %p316_p8 = pnand %p1083_p6, %p315_p7 }
  0x1a   : > { %s322_s18 = sand.u32 (!%p316_p8), 1, %s1335_s24   ;;  %s1085_s19 = sshll.u32 (!%p316_p8), %s1343_s26, 2 }
  0x1b   : > { %319 = sbr.rel (%p316_p8) target bundleno = 850 (0x352), region = 67  ;;  %s1084_s20 = sshll.u32 (!%p316_p8), %s322_s18, 6 }
  0x1c   : > { %p370_p9 = scmp.lt.s32.totalorder (!%p316_p8), %s1085_s19, 15  ;;  %s1086_s21 = sshll.u32 (!%p316_p8), %s1343_s26, 6 }
  0x1d   : > { %p375_p10 = scmp.lt.s32.totalorder (!%p316_p8), %s1086_s21, 255  ;;  %s324_s24 = scalar_lea.vmem (!%p316_p8), [#allocation3], %s1084_s20 }
  0x1e   : > { %p1088_p11 = scmp.ne.s32.totalorder (!%p316_p8), %s1343_s26, 0 }
  0x22   : > { %s1589_s19 = smov (!%p370_p9, %s1085_s19), 15  ;;  %s1591_s21 = smov (!%p375_p10, %s1086_s21), 255 }
  0x23   : > { %s372_s8 = scalar_lea.vmem %s1575_s2, %s1589_s19  ;;  %s1087_s9 = sshll.u32 %s1591_s21, 2  ;;  %vm386_vm0 = vcmask (!%p1088_p11), 261120   ;;  %v1353_v8 = vmov (!%p1088_p11), 0.0  }
  0x24   : > { %s1456_s13 = scalar_lea.vmem %s1576_s3, %s1087_s9  ;;  %385 = sbr.rel (%p1088_p11) target bundleno = 43 (0x2b), region = 75  ;;  %387 = vst.msk [vmem:[#allocation2] sm:$0xff] (!%p1088_p11), %vm386_vm0, %v1353_v8  ;;  %388 = vst.msk [vmem:[#allocation2 + $0x8] sm:$0xff] (!%p1088_p11), %vm386_vm0, %v1353_v8 }
  0x2b PF: > { %v1235_v9 = vld [vmem:[%s324_s24 + $0x4] ss:$16 sps:$4 sm:$0xff]   ;;  %v1237_v10 = vld [vmem:[%s324_s24 + $0xc] ss:$16 sps:$4 sm:$0xff]   ;;  %v1354_v11 = vmov 0   ;;  %vm462_vm1 = vcmask 261120   ;;  %v402_v53 = vlaneseq }
  0x2c   : > { %498 = vmatprep.mubr.bf16.mxu0 %v1354_v11  ;;  %541 = vmatprep.mubr.bf16.mxu1 %v1354_v11  ;;  %v1239_v12 = vld [vmem:[%s324_s24] ss:$16 sps:$4 sm:$0xff]   ;;  %v1240_v13 = vld [vmem:[%s324_s24 + $0x8] ss:$16 sps:$4 sm:$0xff]   ;;  %v1241_v14 = vld [vmem:[%s324_s24 + $0x24] ss:$16 sps:$4 sm:$0xff]  }
  0x2d   : > { %466 = vmatprep.subr.bf16.mxu0 %v1235_v9  ;;  %509 = vmatprep.subr.bf16.mxu1 %v1237_v10  ;;  %v1243_v15 = vld [vmem:[%s324_s24 + $0x2c] ss:$16 sps:$4 sm:$0xff]   ;;  %v1245_v16 = vld [vmem:[%s324_s24 + $0x20] ss:$16 sps:$4 sm:$0xff]   ;;  %v1246_v17 = vld [vmem:[%s324_s24 + $0x28] ss:$16 sps:$4 sm:$0xff]  }
  0x2e   : > { %467 = vmatpush1.bf16.msra.mxu0 %v1239_v12  ;;  %510 = vmatpush1.bf16.msra.mxu1 %v1240_v13  ;;  %v1462_v18 = vld [vmem:[%s1573_s0] sm:$0xff]  ;;  %v1467_v19 = vld [vmem:[%s1573_s0 + $0x8] sm:$0xff]  ;;  %v1255_v29 = vld [vmem:[%s1456_s13 + $0x50] sm:$0xff]   ;;  %v403_v54 = vshrl.u32 %v402_v53, 7  ;;  %p1131_p12 = scmp.ne.s32.totalorder %s1343_s26, 3 }
  0x2f   : > { %468 = vmatprep.subr.bf16.mxu0 %v1241_v14  ;;  %511 = vmatprep.subr.bf16.mxu1 %v1243_v15  ;;  %v1247_v20 = vld [vmem:[%s1456_s13 + $0x40] sm:$0xff]   ;;  %v391_v21 = vpack.c.bf16 %v1467_v19, %v1462_v18  ;;  %v1251_v25 = vld [vmem:[%s1456_s13 + $0x48] sm:$0xff]   ;;  %v1256_v30 = vld [vmem:[%s1456_s13 + $0xd0] sm:$0xff]  }
  0x30   : > { %v1248_v22 = vld [vmem:[%s1456_s13 + $0xc0] sm:$0xff]   ;;  %v1252_v26 = vld [vmem:[%s1456_s13 + $0xc8] sm:$0xff]   ;;  %v1257_v31 = vld [vmem:[%s1456_s13 + $0x10] sm:$0xff]   ;;  %v404_v55 = vsub.s32 0, %v403_v54  ;;  %v412_v56 = vsub.s32 2, %v403_v54  ;;  %v408_v58 = vsub.s32 1, %v403_v54 }
  0x31   : > { %v1249_v23 = vld [vmem:[%s1456_s13] sm:$0xff]   ;;  %v1253_v27 = vld [vmem:[%s1456_s13 + $0x8] sm:$0xff]   ;;  %v1258_v32 = vld [vmem:[%s1456_s13 + $0x90] sm:$0xff]   ;;  %v416_v59 = vsub.s32 3, %v403_v54 }
  0x32   : > { %469 = vmatpush1.bf16.msra.mxu0 %v1245_v16  ;;  %512 = vmatpush1.bf16.msra.mxu1 %v1246_v17  ;;  %v1250_v24 = vld [vmem:[%s1456_s13 + $0x80] sm:$0xff]   ;;  %v1254_v28 = vld [vmem:[%s1456_s13 + $0x88] sm:$0xff]   ;;  %v1259_v33 = vld [vmem:[%s1456_s13 + $0x58] sm:$0xff]  }
  0x33   : > { %1140 = vmatprep.subr.bf16.mxu0 %v1247_v20  ;;  %1162 = vmatprep.subr.bf16.mxu1 %v1248_v22  ;;  %v1260_v34 = vld [vmem:[%s1456_s13 + $0xd8] sm:$0xff]   ;;  %v1263_v37 = vld [vmem:[%s1456_s13 + $0x60] sm:$0xff]   ;;  %v1267_v41 = vld [vmem:[%s1456_s13 + $0x68] sm:$0xff]  }
  0x34   : > { %v1261_v35 = vld [vmem:[%s1456_s13 + $0x18] sm:$0xff]   ;;  %v1264_v38 = vld [vmem:[%s1456_s13 + $0xe0] sm:$0xff]   ;;  %v1268_v42 = vld [vmem:[%s1456_s13 + $0xe8] sm:$0xff]  }
  0x35   : > { %1097 = vmatmul.mubr.msk.bf16.vlgmr.msra.gmra.mrb[0].mxu0 %vm462_vm1, %v391_v21  ;;  %1098 = vmatmul.mubr.msk.bf16.vlgmr.msra.gmra.mrb[0].mxu1 %vm462_vm1, %v391_v21  ;;  %v1262_v36 = vld [vmem:[%s1456_s13 + $0x98] sm:$0xff]   ;;  %v1265_v39 = vld [vmem:[%s1456_s13 + $0x20] sm:$0xff]   ;;  %v1269_v43 = vld [vmem:[%s1456_s13 + $0x28] sm:$0xff]  }
  0x36   : > { %1141 = vmatpush3.bf16.msra.mxu0 %v1249_v23  ;;  %1163 = vmatpush3.bf16.msra.mxu1 %v1250_v24  ;;  %v1266_v40 = vld [vmem:[%s1456_s13 + $0xa0] sm:$0xff]   ;;  %v1270_v44 = vld [vmem:[%s1456_s13 + $0xa8] sm:$0xff]   ;;  %v1271_v45 = vld [vmem:[%s1456_s13 + $0x70] sm:$0xff]  }
  0x37   : > { %1142 = vmatprep.subr.bf16.mxu0 %v1251_v25  ;;  %1164 = vmatprep.subr.bf16.mxu1 %v1252_v26  ;;  %v1272_v46 = vld [vmem:[%s1456_s13 + $0xf0] sm:$0xff]   ;;  %v1275_v49 = vld [vmem:[%s1456_s13 + $0x78] sm:$0xff]   ;;  %v400_v57 = vld [vmem:[%s372_s8] sm:$0xf] }
  0x38   : > { %v1273_v47 = vld [vmem:[%s1456_s13 + $0x30] sm:$0xff]   ;;  %v1276_v50 = vld [vmem:[%s1456_s13 + $0xf8] sm:$0xff]   ;;  %v405_v60 = vrot.slane %v400_v57, %v404_v55  ;;  %v413_v61 = vrot.slane %v400_v57, %v412_v56  ;;  %v409_v62 = vrot.slane %v400_v57, %v408_v58  ;;  %v417_v63 = vrot.slane %v400_v57, %v416_v59 }
  0x39   : > { %v1274_v48 = vld [vmem:[%s1456_s13 + $0xb0] sm:$0xff]   ;;  %v1277_v51 = vld [vmem:[%s1456_s13 + $0x38] sm:$0xff]  }
  0x3a   : > { %1143 = vmatpush3.bf16.msra.mxu0 %v1253_v27  ;;  %1165 = vmatpush3.bf16.msra.mxu1 %v1254_v28  ;;  %v1278_v52 = vld [vmem:[%s1456_s13 + $0xb8] sm:$0xff]  }
  0x3b   : > { %1144 = vmatprep.subr.bf16.mxu0 %v1255_v29  ;;  %1166 = vmatprep.subr.bf16.mxu1 %v1256_v30 }
  0x3e   : > { %1145 = vmatpush3.bf16.msra.mxu0 %v1257_v31  ;;  %1167 = vmatpush3.bf16.msra.mxu1 %v1258_v32 }
  0x3f   : > { %1146 = vmatprep.subr.bf16.mxu0 %v1259_v33  ;;  %1168 = vmatprep.subr.bf16.mxu1 %v1260_v34 }
  0x42   : > { %1147 = vmatpush3.bf16.msra.mxu0 %v1261_v35  ;;  %1169 = vmatpush3.bf16.msra.mxu1 %v1262_v36 }
  0x43   : > { %1148 = vmatprep.subr.bf16.mxu0 %v1263_v37  ;;  %1170 = vmatprep.subr.bf16.mxu1 %v1264_v38  ;;  %v564_v38 = vld [vmem:[#allocation2] sm:$0xff] }
  0x46   : > { %1149 = vmatpush3.bf16.msra.mxu0 %v1265_v39  ;;  %1171 = vmatpush3.bf16.msra.mxu1 %v1266_v40 }
  0x47   : > { %1150 = vmatprep.subr.bf16.mxu0 %v1267_v41  ;;  %1172 = vmatprep.subr.bf16.mxu1 %v1268_v42 }
  0x4a   : > { %1151 = vmatpush3.bf16.msra.mxu0 %v1269_v43  ;;  %1173 = vmatpush3.bf16.msra.mxu1 %v1270_v44  ;;  %v565_v44 = vld [vmem:[#allocation2 + $0x8] sm:$0xff] }
  0x4b   : > { %1152 = vmatprep.subr.bf16.mxu0 %v1271_v45  ;;  %1174 = vmatprep.subr.bf16.mxu1 %v1272_v46 }
  0x4e   : > { %1153 = vmatpush3.bf16.msra.mxu0 %v1273_v47  ;;  %1175 = vmatpush3.bf16.msra.mxu1 %v1274_v48 }
  0x4f   : > { %1154 = vmatprep.subr.bf16.mxu0 %v1275_v49  ;;  %1176 = vmatprep.subr.bf16.mxu1 %v1276_v50  ;;  %v1132_v49 = vld [vmem:[%s1577_s4] ss:$0 sm:$0xff] (!%p1131_p12) }
  0x52   : > { %1155 = vmatpush3.bf16.msra.mxu0 %v1277_v51  ;;  %1177 = vmatpush3.bf16.msra.mxu1 %v1278_v52 }
 0x108   : > { %v500_v0 = vpop.f32.mrb[0].mxu0  ;;  %v543_v1 = vpop.f32.mrb[0].mxu1 }
 0x109   : > { %v501_v2 = vadd.f32 %v500_v0, %v405_v60  ;;  %v544_v3 = vadd.f32 %v543_v1, %v413_v61  ;;  %v502_v4 = vpop.f32.mrb[1].mxu0  ;;  %v545_v5 = vpop.f32.mrb[1].mxu1 }
 0x10a   : > { %v503_v6 = vadd.f32 %v502_v4, %v409_v62  ;;  %v546_v7 = vadd.f32 %v545_v5, %v417_v63  ;;  %v504_v8 = vpop.f32.mrb[2].mxu0  ;;  %v547_v9 = vpop.f32.mrb[2].mxu1 }
 0x10b   : > { %v505_v10 = vadd.f32 %v504_v8, %v405_v60  ;;  %v548_v11 = vadd.f32 %v547_v9, %v413_v61  ;;  %v506_v12 = vpop.f32.mrb[3].mxu0  ;;  %v549_v13 = vpop.f32.mrb[3].mxu1  ;;  %v552_v16 = vmax.f32 %v501_v2, 0.0  ;;  %v554_v17 = vmax.f32 %v544_v3, 0.0  ;;  %v1133_v8 = vld [vmem:[%s1578_s5] ss:$0 sm:$0xff] (!%p1131_p12) }
 0x10c   : > { %v507_v14 = vadd.f32 %v506_v12, %v409_v62  ;;  %v550_v15 = vadd.f32 %v549_v13, %v417_v63  ;;  %v553_v22 = vmax.f32 %v503_v6, 0.0  ;;  %v555_v23 = vmax.f32 %v546_v7, 0.0 }
 0x10d   : > { %v556_v20 = vmax.f32 %v505_v10, 0.0  ;;  %v558_v21 = vmax.f32 %v548_v11, 0.0  ;;  %v1134_v10 = vld [vmem:[%s1579_s6] ss:$0 sm:$0xff] (!%p1131_p12) }
 0x10e   : > { %v557_v24 = vmax.f32 %v507_v14, 0.0  ;;  %v559_v25 = vmax.f32 %v550_v15, 0.0 }
 0x10f   : > { %v560_v26 = vpack.c.bf16 %v556_v20, %v552_v16  ;;  %v562_v27 = vpack.c.bf16 %v558_v21, %v554_v17 }
 0x110   : > { %v561_v28 = vpack.c.bf16 %v557_v24, %v553_v22  ;;  %v563_v29 = vpack.c.bf16 %v559_v25, %v555_v23 }
 0x112   : > { %854 = vmatprep.mubr.bf16.mxu0 %v561_v28  ;;  %895 = vmatprep.mubr.bf16.mxu1 %v563_v29 }
 0x113   : > { %855 = vmatmul.mubr.bf16.vlgmr.msra.gmra.mrb[4].mxu0 %v560_v26  ;;  %896 = vmatmul.mubr.bf16.vlgmr.msra.gmra.mrb[4].mxu1 %v562_v27 }
 0x1e6   : > { %v1156_v30 = vpop.f32.mrb[4].mxu0  ;;  %v1178_v31 = vpop.f32.mrb[4].mxu1 }
 0x1e7   : > { %v1157_v32 = vpop.f32.mrb[5].mxu0  ;;  %v1179_v33 = vpop.f32.mrb[5].mxu1 }
 0x1e8   : > { %v1158_v34 = vadd.f32 %v1157_v32, %v1156_v30  ;;  %v1180_v35 = vadd.f32 %v1179_v33, %v1178_v31  ;;  %v1159_v36 = vpop.f32.mrb[6].mxu0  ;;  %v1181_v37 = vpop.f32.mrb[6].mxu1 }
 0x1e9   : > { %v1160_v39 = vpop.f32.mrb[7].mxu0  ;;  %v1182_v40 = vpop.f32.mrb[7].mxu1 }
 0x1ea   : > { %v898_v41 = vadd.f32 %v1180_v35, %v1158_v34  ;;  %v1161_v42 = vadd.f32 %v1160_v39, %v1159_v36  ;;  %v1183_v43 = vadd.f32 %v1182_v40, %v1181_v37  ;;  %911 = sbr.rel (%p1131_p12) target bundleno = 824 (0x338), region = 79 }
 0x1ec   : > { %v904_v45 = vadd.f32 %v898_v41, %v564_v38  ;;  %v901_v46 = vadd.f32 %v1183_v43, %v1161_v42 }
 0x1ee   : > { %906 = vst.msk [vmem:[#allocation2] sm:$0xff] %vm462_vm1, %v904_v45  ;;  %v905_v47 = vadd.f32 %v901_v46, %v565_v44 }
 0x1f0   : > { %907 = vst.msk [vmem:[#allocation2 + $0x8] sm:$0xff] %vm462_vm1, %v905_v47 }
 0x1f5   : > { %v912_v48 = vld [vmem:[#allocation2] sm:$0xff] }
 0x1f6   : > { %v914_v51 = vadd.f32 %v912_v48, %v1462_v18 }
 0x1f7   : > { %v913_v50 = vld [vmem:[#allocation2 + $0x8] sm:$0xff] }
 0x1f8   : > { %v915_v52 = vadd.f32 %v913_v50, %v1467_v19  ;;  %v923_v53 = vadd.f32 %v1132_v49, %v914_v51 }
 0x1fa   : > { %v924_v54 = vadd.f32 %v1132_v49, %v915_v52  ;;  %v925_v55 = vsel %vm462_vm1, %v923_v53, 0.0 }
 0x1fb   : > { %926 = vadd.xlane.f32.xlu0 %v925_v55 }
 0x1fc   : > { %v928_v56 = vsel %vm462_vm1, %v924_v54, 0.0 }
 0x1ff   : > { %929 = vadd.xlane.f32.xlu0 %v928_v56 }
 0x288   : > { %v927_v57 = vpop.xlane.xlu0 %926 }
 0x289   : > { %v932_v58 = vmul.f32 0.03125, %v927_v57 }
 0x28b   : > { %v934_v59 = vsub.f32 %v923_v53, %v932_v58 }
 0x28c   : > { %v930_v60 = vpop.xlane.xlu0 %929 }
 0x28d   : > { %v933_v61 = vmul.f32 0.03125, %v930_v60  ;;  %v936_v62 = vmul.f32 %v934_v59, %v934_v59 }
 0x28f   : > { %v935_v63 = vsub.f32 %v924_v54, %v933_v61  ;;  %v938_v0 = vsel %vm462_vm1, %v936_v62, 0.0 }
 0x290   : > { %939 = vadd.xlane.f32.xlu1 %v938_v0 }
 0x291   : > { %v937_v18 = vmul.f32 %v935_v63, %v935_v63 }
 0x293   : > { %v941_v19 = vsel %vm462_vm1, %v937_v18, 0.0 }
 0x294   : > { %942 = vadd.xlane.f32.xlu1 %v941_v19 }
 0x31d   : > { %v940_v1 = vpop.xlane.xlu1 %939 }
 0x31e   : > { %v944_v2 = vmul.f32 0.03125, %v940_v1 }
 0x320   : > { %v946_v3 = vadd.f32 1e-05, %v944_v2 }
 0x321   : > { %v943_v4 = vpop.xlane.xlu1 %942 }
 0x322   : > { %1279 = vrsqrt.f32 %v946_v3  ;;  %v945_v5 = vmul.f32 0.03125, %v943_v4 }
 0x324   : > { %v947_v6 = vadd.f32 1e-05, %v945_v5 }
 0x326   : > { %1281 = vrsqrt.f32 %v947_v6 }
 0x32c   : > { %v1280_v7 = vpop.eup %1279 }
 0x32d   : > { %v950_v9 = vmul.f32 %v1280_v7, %v934_v59 }
 0x32f   : > { %v959_v11 = vmul.f32 %v1133_v8, %v950_v9 }
 0x330   : > { %v1282_v12 = vpop.eup %1281 }
 0x331   : > { %v968_v13 = vadd.f32 %v1134_v10, %v959_v11  ;;  %v951_v14 = vmul.f32 %v1282_v12, %v935_v63 }
 0x333   : > { %970 = vst.msk [vmem:[#allocation4] sm:$0xff] %vm462_vm1, %v968_v13  ;;  %v960_v15 = vmul.f32 %v1133_v8, %v951_v14 }
 0x335   : > { %v969_v16 = vadd.f32 %v1134_v10, %v960_v15 }
 0x337   : > { %971 = vst.msk [vmem:[#allocation4 + $0x8] sm:$0xff] %vm462_vm1, %v969_v16 }
 0x338 PF: > { %p1532_p13 = scmp.eq.s32.totalorder %s1076_s29, 3  ;;  %s1355_s11 = smov [#allocation4]  }
 0x339   : > { %s981_s12 = sshll.u32 %s1355_s11, 4  ;;  %s982_s12 = int_to_ptr.vmem [resolvable:$true] %s981_s12 }
 0x33a   : > { %s1283_s13 = scalar_lea.vmem %s982_s12, 256  ;;  %p1290_p3 = scmp.lt.s32.totalorder %s982_s12, %s982_s12 }
 0x33b   : > { %p1284_p0 = scmp.ne.s32.totalorder %s982_s12, %s1283_s13  ;;  %p1291_p4 = scmp.lt.s32.totalorder %s1283_s13, %s1283_s13 }
 0x33d   : > { %p1285_p1 = pnand %p1284_p0, %p1532_p13  ;;  %p1292_p5 = por %p1291_p4, %p1290_p3 }
 0x33f   : > { %p1286_p2 = pneg %p1285_p1 }
 0x341   : > { %p1293_p6 = pnand %p1292_p5, %p1286_p2 }
 0x343   : > { %1296 = shalt.err (!%p1293_p6)
}
 0x344   : > { %s1297_s29 = scalar_lea.hbm %s1580_s7, 256 }
 0x345   : > { %p1298_p7 = scmp.ne.s32.totalorder %s1580_s7, %s1297_s29  ;;  %p1303_p10 = scmp.lt.u32.totalorder %s1297_s29, %s1580_s7 }
 0x347   : > { %p1299_p8 = pnand %p1298_p7, %p1532_p13 }
 0x349   : > { %p1300_p9 = pneg %p1299_p8 }
 0x34b   : > { %p1305_p11 = pnand %p1303_p10, %p1300_p9 }
 0x34d   : > { %1308 = shalt.err (!%p1305_p11)
}
 0x34e   : > { %s1356_s20 = smov 128   ;;  %s1357_s19 = smov 8  }
 0x34f   : > { %1185 = dma.vmem_to_hbm [thread:$0]  (%p1532_p13), %s982_s12, 256, %s1580_s7, [#allocation5], %s1356_s20, %s1356_s20, %s1357_s19  }
 0x350   : > { %1330 = dma.done.wait (%p1532_p13), [#allocation5], 256  }
 0x351   : > { %1332 = vsyncadd (%p1532_p13), [#allocation5], 4294967040 }
 0x352 PF: > { %s18_s28 = sadd.s32 1, %s1351_s28   ;;  %s1582_s24 = smov %s1339_s25 }
 0x353   : > { %p15_p12 = scmp.ge.s32.totalorder %s18_s28, 6   ;;  %s1583_s25 = smov %s1434_s10 }
 0x354   : > { %s1584_s26 = smov %s1347_s27  ;;  %s1585_s27 = smov %s1587_s30 }
 0x355   :  { %17 = sbr.rel (!%p15_p12) target bundleno = 3 (0x3), region = 121 }
 0x35c   :  { %997 = vsyncpa [#allocation5], 1 }
 0x35d   :  { %999 = vsyncpa [#allocation5 + $0x1], 1 }

</bundles_post_ra>
